<compile_context>
chip_gen: v5e
topology: v5e:2x2
jax: 0.10.0
libtpu: 0.0.40
codegen_flags: <defaults>
</compile_context>

<pallas_src>
import jax
import jax.numpy as jnp
from jax.experimental import pallas as pl
from jax.experimental.pallas import tpu as pltpu


# ------------------------------ fused kernel ------------------------------- #

def _gml_kernel(inv_ts_ref,            # SMEM (1,)        f32: 1/T_s
                q_ref,                 # VMEM (tq, D)     bf16 (already * 1/T_c)
                kt_ref,                # VMEM (D, tk)     bf16 (key^T tile, 0-padded)
                klab_ref,              # VMEM (tk, 1)     i32  (-1 in padding)
                qlab_ref,              # VMEM (tq, 1)     i32
                qidx_ref,              # VMEM (tq, 1)     i32
                kidx_ref,              # VMEM (1, tk)     i32
                sup_ref,               # VMEM (tq, C)     f32
                clsw_ref,              # VMEM (1, C)      f32
                cnt_ref,               # VMEM (1, C)      f32 (per-class key counts)
                out_ref,               # VMEM (1, 8, 128) f32 partial CE sums
                m_sc, se_all, se_msk, cnt_msk):
    j = pl.program_id(1)
    nk_steps = pl.num_programs(1)
    tq = q_ref.shape[0]
    tk = kt_ref.shape[1]
    c = clsw_ref.shape[1]

    @pl.when(j == 0)
    def _init():
        m_sc[...] = jnp.full_like(m_sc, -jnp.inf)
        se_all[...] = jnp.zeros_like(se_all)
        se_msk[...] = jnp.zeros_like(se_msk)
        cnt_msk[...] = jnp.zeros_like(cnt_msk)

    # ---- hot path: one bf16 MXU matmul + one exp feed BOTH branches -------- #
    # 1/T_c already folded into q (wrapper), key already transposed -> standard
    # [M,K]x[K,N] contraction, f32 accumulation.
    logits = jnp.dot(q_ref[...], kt_ref[...],
                     preferred_element_type=jnp.float32)        # [tq, tk] f32

    m_prev = m_sc[...]                                          # [tq, 1]
    m_new = jnp.maximum(m_prev, jnp.max(logits, axis=1, keepdims=True))
    alpha = jnp.exp(m_prev - m_new)                             # [tq, 1] f32
    e = jnp.exp(logits - m_new)                                 # [tq, tk] f32 (EUP)

    # bool mask; masked exp via select (no f32 cast + mul on the big slab)
    neq = qidx_ref[...] != kidx_ref[...]                        # [tq, tk] bool
    e_bf = e.astype(jnp.bfloat16)
    e_msk_bf = jnp.where(neq, e_bf, 0)                          # bf16
    msk_bf = neq.astype(jnp.bfloat16)                           # bf16 0/1 (exact)

    # one-hot(k_labels); padded rows (label -1) are all-zero -> contribute nothing
    onehot_bf = (klab_ref[...] ==
                 jax.lax.broadcasted_iota(jnp.int32, (tk, c), 1)
                 ).astype(jnp.bfloat16)                         # [tk, C]

    # flash-style rescaled per-class accumulation; bf16 operands, f32 accumulate.
    se_all[...] = alpha * se_all[...] + jnp.dot(
        e_bf, onehot_bf, preferred_element_type=jnp.float32)
    se_msk[...] = alpha * se_msk[...] + jnp.dot(
        e_msk_bf, onehot_bf, preferred_element_type=jnp.float32)
    cnt_msk[...] = cnt_msk[...] + jnp.dot(
        msk_bf, onehot_bf, preferred_element_type=jnp.float32)
    m_sc[...] = m_new

    # ---- epilogue (once per q-tile): log-mean-exp + 3 cross-entropy sums ---- #
    @pl.when(j == nk_steps - 1)
    def _finalize():
        clsw = clsw_ref[...]                                    # [1, C]
        # log(sumexp) - log(count) + running max == log(mean exp) of the reference.
        logS = jnp.log(se_all[...]) - jnp.log(cnt_ref[...]) + m_sc[...]
        logS_T = jnp.log(se_msk[...]) - jnp.log(cnt_msk[...]) + m_sc[...]

        onehot_q = (qlab_ref[...] ==
                    jax.lax.broadcasted_iota(jnp.int32, (tq, c), 1)
                    ).astype(jnp.float32)                       # [tq, C]

        def ce_sum(x):                                          # x: [tq, C] -> scalar
            m = jnp.max(x, axis=1, keepdims=True)
            lse = jnp.log(jnp.sum(jnp.exp(x - m), axis=1, keepdims=True)) + m
            tgt = jnp.sum(x * onehot_q, axis=1, keepdims=True)
            return jnp.sum(lse - tgt)                           # per-tile SUM (mean in wrapper)

        sup = ce_sum(sup_ref[...] * inv_ts_ref[0] + clsw)       # loss_sup partial
        con = ce_sum(logS + clsw)                               # loss_con partial
        con_t = ce_sum(logS_T + clsw)                           # loss_con_T partial

        # pack the 3 scalars into lanes 0..2 of the q-tile's (8,128) output tile
        sub = jax.lax.broadcasted_iota(jnp.int32, (8, 128), 0)
        lane = jax.lax.broadcasted_iota(jnp.int32, (8, 128), 1)
        row0 = sub == 0
        tile = jnp.where(row0 & (lane == 0), sup,
               jnp.where(row0 & (lane == 1), con,
               jnp.where(row0 & (lane == 2), con_t, 0.0)))
        out_ref[0] = tile


# ------------------------------ tiling helpers ------------------------------ #

def _round_up(x, m):
    return (x + m - 1) // m * m


def _pick_tk(nk):
    """Key-tile size and padded Nk. Always 128-aligned tiles (pad, never full-Nk)."""
    for t in (512, 256, 128):
        if nk % t == 0:
            return t, nk
    t = 256 if nk > 128 else 128
    return t, _round_up(nk, t)


def _pick_tq(nq):
    """Query-tile size; full Nq if it doesn't split cleanly (always legal)."""
    for t in (256, 128):
        if nq % t == 0 and nq > t:
            return t
    return nq


# ------------------------------- pallas wrapper ------------------------------ #

def gml_losses_pallas(query, key, k_labels, q_labels, q_idx, k_idx,
                      sup_logits, cls_weight, t_c, t_s):
    """Returns (loss_sup, loss_con, loss_con_T) means, fused in one kernel."""
    nq, d = query.shape
    nk = key.shape[0]
    c = cls_weight.shape[-1]
    tk, nk_pad = _pick_tk(nk)
    tq = _pick_tq(nq)
    nq_tiles = nq // tq

    # one-time prep (review items: bf16 streams, fold 1/T_c, pre-transpose key,
    # pad Nk, precompute per-class key counts)
    inv_tc = (1.0 / t_c).astype(jnp.float32)
    q_bf = (query.astype(jnp.float32) * inv_tc).astype(jnp.bfloat16)     # [Nq, D]
    key_t = key.astype(jnp.bfloat16).T                                   # [D, Nk]
    klab = k_labels.astype(jnp.int32)
    kidx = k_idx.astype(jnp.int32)
    if nk_pad != nk:
        pad = nk_pad - nk
        key_t = jnp.pad(key_t, ((0, 0), (0, pad)))                       # zero keys
        klab = jnp.pad(klab, (0, pad), constant_values=-1)               # zero one-hot
        kidx = jnp.pad(kidx, (0, pad), constant_values=-1)               # never matches q_idx>=0
    klab2 = klab.reshape(nk_pad, 1)
    kidx2 = kidx.reshape(1, nk_pad)
    qlab2 = q_labels.reshape(nq, 1).astype(jnp.int32)
    qidx2 = q_idx.reshape(nq, 1).astype(jnp.int32)
    clsw2 = cls_weight.reshape(1, c).astype(jnp.float32)
    cnt_all = jnp.sum(jax.nn.one_hot(k_labels, c, dtype=jnp.float32),
                      axis=0).reshape(1, c)                              # grid-invariant
    inv_ts = jnp.reshape(1.0 / t_s, (1,)).astype(jnp.float32)
    sup_f32 = sup_logits.astype(jnp.float32)

    smem = pl.BlockSpec(memory_space=pltpu.MemorySpace.SMEM)

    partials = pl.pallas_call(
        _gml_kernel,
        out_shape=jax.ShapeDtypeStruct((nq_tiles, 8, 128), jnp.float32),
        grid=(nq_tiles, nk_pad // tk),
        in_specs=[
            smem,                                              # 1/T_s scalar (SMEM)
            pl.BlockSpec((tq, d), lambda qi, j: (qi, 0)),      # query tile (bf16, scaled)
            pl.BlockSpec((d, tk), lambda qi, j: (0, j)),       # key^T tile (bf16)
            pl.BlockSpec((tk, 1), lambda qi, j: (j, 0)),       # k_labels tile
            pl.BlockSpec((tq, 1), lambda qi, j: (qi, 0)),      # q_labels tile
            pl.BlockSpec((tq, 1), lambda qi, j: (qi, 0)),      # q_idx tile
            pl.BlockSpec((1, tk), lambda qi, j: (0, j)),       # k_idx tile
            pl.BlockSpec((tq, c), lambda qi, j: (qi, 0)),      # sup_logits tile
            pl.BlockSpec((1, c), lambda qi, j: (0, 0)),        # cls_weight
            pl.BlockSpec((1, c), lambda qi, j: (0, 0)),        # per-class key counts
        ],
        out_specs=pl.BlockSpec((1, 8, 128), lambda qi, j: (qi, 0, 0)),
        scratch_shapes=[
            pltpu.VMEM((tq, 1), jnp.float32),   # running max
            pltpu.VMEM((tq, c), jnp.float32),   # sumexp, all-ones branch
            pltpu.VMEM((tq, c), jnp.float32),   # sumexp, masked branch
            pltpu.VMEM((tq, c), jnp.float32),   # masked per-class counts
        ],
        compiler_params=pltpu.CompilerParams(
            dimension_semantics=("parallel", "arbitrary"),     # q-tiles shard across TCs
            vmem_limit_bytes=32 * 1024 * 1024),                # explicit, v7x-safe
    )(inv_ts, q_bf, key_t, klab2, qlab2, qidx2, kidx2, sup_f32, clsw2, cnt_all)

    sums = jnp.sum(partials[:, 0, 0:3], axis=0)                # reduce q-tile partials
    inv_nq = 1.0 / nq
    return sums[0] * inv_nq, sums[1] * inv_nq, sums[2] * inv_nq


# --------------------------------- GML loss -------------------------------- #

def make_gml_loss(cls_num_list, beta=1.0, gamma=1.0, temperature=0.07,
                  num_classes=8):
    """Deterministic parameter setup mirroring GMLLoss.__init__."""
    t_base = 0.05
    log_t_c = jnp.log(jnp.float32(temperature))      # nn.Parameter in torch (forward value)
    log_t_s = jnp.log(jnp.float32(t_base))           # buffer
    t_c = jnp.exp(log_t_c)
    t_s = jnp.exp(log_t_s)
    cls_num = jnp.asarray(cls_num_list, jnp.float32).reshape(num_classes)
    cls_weight = jax.nn.log_softmax(cls_num / jnp.sum(cls_num))  # [C]

    @jax.jit
    def forward(query, q_labels, q_idx, key, k_labels, k_idx, sup_logits):
        loss_sup, loss_con, loss_con_t = gml_losses_pallas(
            query, key, k_labels, q_labels, q_idx, k_idx, sup_logits,
            cls_weight, t_c, t_s)
        loss = gamma * loss_sup
        if beta > 0:
            loss = loss + beta * (loss_con + loss_con_t)
        return loss

    return forward, cls_weight, t_c, t_s


# ----------------------------- pure-JAX reference --------------------------- #

def _ref_loss(query, q_labels, q_idx, key, k_labels, k_idx, sup_logits,
              cls_weight, t_c, t_s, beta, gamma, num_classes):
    def get_logS(logits, weights, target):
        max_logit = jnp.max(logits, axis=1, keepdims=True)
        l = logits - max_logit
        onehot = jax.nn.one_hot(target, num_classes, dtype=jnp.float32)
        sumexp = (jnp.exp(l) * weights) @ onehot
        sumw = weights @ onehot
        return jnp.log(sumexp / sumw) + max_logit

    def ce(logits, labels):
        ls = jax.nn.log_softmax(logits, axis=1)
        return -jnp.mean(jnp.take_along_axis(ls, labels[:, None], axis=1))

    qk = query @ key.T / t_c
    logS = get_logS(qk, jnp.ones((query.shape[0], key.shape[0]), jnp.float32),
                    k_labels)
    mask = (q_idx[:, None] != k_idx[None, :]).astype(jnp.float32)
    logS_T = get_logS(qk, mask, k_labels)
    loss_sup = ce(sup_logits / t_s + cls_weight, q_labels)
    loss_con = ce(logS + cls_weight, q_labels)
    loss_con_T = ce(logS_T + cls_weight, q_labels)
    loss = gamma * loss_sup
    if beta > 0:
        loss = loss + beta * (loss_con + loss_con_T)
    return loss


# ------------------------------------ main ---------------------------------- #

if __name__ == "__main__":
    # Shapes chosen to exercise multi-q-tile (Nq=256 -> 2 parallel q-tiles),
    # multi-k-step + Nk padding (Nk=300 -> tk=256, padded to 512), while staying small.
    NQ, NK, D, C = 256, 300, 64, 8
    BETA, GAMMA, TEMP = 1.0, 1.0, 0.07

    # deterministic long-tailed class counts (module __init__ argument)
    cls_num_list = [float(100.0 * (0.8 ** i)) for i in range(C)]

    key0 = jax.random.PRNGKey(0)
    kq, kk, kql, ksl = jax.random.split(key0, 4)

    query = jax.random.normal(kq, (NQ, D), jnp.float32)
    query = query / jnp.linalg.norm(query, axis=1, keepdims=True)
    keyf = jax.random.normal(kk, (NK, D), jnp.float32)
    keyf = keyf / jnp.linalg.norm(keyf, axis=1, keepdims=True)

    q_labels = jax.random.randint(kql, (NQ,), 0, C, jnp.int32)
    k_labels = jnp.arange(NK, dtype=jnp.int32) % C        # every class present
    q_idx = jnp.arange(NQ, dtype=jnp.int32)
    k_idx = jnp.arange(NK, dtype=jnp.int32)                # overlaps q_idx -> mask is non-trivial
    sup_logits = jax.random.normal(ksl, (NQ, C), jnp.float32)

    gml_forward, cls_weight, t_c, t_s = make_gml_loss(
        cls_num_list, beta=BETA, gamma=GAMMA, temperature=TEMP, num_classes=C)

    loss = gml_forward(query, q_labels, q_idx, keyf, k_labels, k_idx, sup_logits)
    loss = jax.block_until_ready(loss)

    ref = _ref_loss(query, q_labels, q_idx, keyf, k_labels, k_idx, sup_logits,
                    cls_weight, t_c, t_s, BETA, GAMMA, C)
    ref = jax.block_until_ready(ref)

    # q@k.T and the segment sums run with bf16 MXU operands (f32 accumulation);
    # compare against the pure-f32 reference at a bf16-appropriate tolerance.
    if not jnp.allclose(loss, ref, rtol=2e-2, atol=2e-2):
        raise AssertionError(f"mismatch: pallas={loss} ref={ref}")

    print("KERNEL_OK")
</pallas_src>

<mosaic_0001>
module attributes {stable_mosaic.version = 11 : i64} {
  func.func @_gml_kernel(%arg0: i32, %arg1: i32, %arg2: memref<1xf32, #tpu.memory_space<smem>>, %arg3: memref<128x64xbf16, #tpu.memory_space<vmem>>, %arg4: memref<64x256xbf16, #tpu.memory_space<vmem>>, %arg5: memref<256x1xi32, #tpu.memory_space<vmem>>, %arg6: memref<128x1xi32, #tpu.memory_space<vmem>>, %arg7: memref<128x1xi32, #tpu.memory_space<vmem>>, %arg8: memref<1x256xi32, #tpu.memory_space<vmem>>, %arg9: memref<128x8xf32, #tpu.memory_space<vmem>>, %arg10: memref<1x8xf32, #tpu.memory_space<vmem>>, %arg11: memref<1x8xf32, #tpu.memory_space<vmem>>, %arg12: memref<1x8x128xf32, #tpu.memory_space<vmem>>, %arg13: memref<128x1xf32, #tpu.memory_space<vmem>>, %arg14: memref<128x8xf32, #tpu.memory_space<vmem>>, %arg15: memref<128x8xf32, #tpu.memory_space<vmem>>, %arg16: memref<128x8xf32, #tpu.memory_space<vmem>>) attributes {dimension_semantics = [#tpu.dimension_semantics<parallel>, #tpu.dimension_semantics<arbitrary>], iteration_bounds = array<i64: 2, 2>, scalar_prefetch = 0 : i64, scratch_operands = 4 : i64, tpu.core_type = #tpu.core_type<tc>, window_params = [{transform_indices = @transform_0, window_bounds = array<i64: 1>}, {transform_indices = @transform_1, window_bounds = array<i64: 128, 64>}, {transform_indices = @transform_2, window_bounds = array<i64: 64, 256>}, {transform_indices = @transform_3, window_bounds = array<i64: 256, 1>}, {transform_indices = @transform_4, window_bounds = array<i64: 128, 1>}, {transform_indices = @transform_5, window_bounds = array<i64: 128, 1>}, {transform_indices = @transform_6, window_bounds = array<i64: 1, 256>}, {transform_indices = @transform_7, window_bounds = array<i64: 128, 8>}, {pipeline_mode = #tpu.pipeline_mode<synchronous>, transform_indices = @transform_8, window_bounds = array<i64: 1, 8>}, {pipeline_mode = #tpu.pipeline_mode<synchronous>, transform_indices = @transform_9, window_bounds = array<i64: 1, 8>}, {transform_indices = @transform_10, window_bounds = array<i64: 1, 8, 128>}]} {
    %c0_i32 = arith.constant 0 : i32
    %0 = arith.cmpi eq, %arg1, %c0_i32 : i32
    %1 = arith.extui %0 : i1 to i32
    %c0_i32_0 = arith.constant 0 : i32
    %2 = arith.cmpi ne, %1, %c0_i32_0 : i32
    scf.if %2 {
      %cst_32 = arith.constant 0xFF800000 : f32
      %54 = vector.broadcast %cst_32 : f32 to vector<128x1xf32>
      %c0_33 = arith.constant 0 : index
      %c0_34 = arith.constant 0 : index
      %55 = vector.load %arg13[%c0_33, %c0_34] : memref<128x1xf32, #tpu.memory_space<vmem>>, vector<128x1xf32>
      tpu.vector_store %arg13[%c0_33, %c0_34], %54 {strides = array<i32>} : memref<128x1xf32, #tpu.memory_space<vmem>>, vector<128x1xf32>,
      %cst_35 = arith.constant 0.000000e+00 : f32
      %56 = vector.broadcast %cst_35 : f32 to vector<128x8xf32>
      %c0_36 = arith.constant 0 : index
      %c0_37 = arith.constant 0 : index
      %57 = vector.load %arg14[%c0_36, %c0_37] : memref<128x8xf32, #tpu.memory_space<vmem>>, vector<128x8xf32>
      tpu.vector_store %arg14[%c0_36, %c0_37], %56 {strides = array<i32>} : memref<128x8xf32, #tpu.memory_space<vmem>>, vector<128x8xf32>,
      %cst_38 = arith.constant 0.000000e+00 : f32
      %58 = vector.broadcast %cst_38 : f32 to vector<128x8xf32>
      %c0_39 = arith.constant 0 : index
      %c0_40 = arith.constant 0 : index
      %59 = vector.load %arg15[%c0_39, %c0_40] : memref<128x8xf32, #tpu.memory_space<vmem>>, vector<128x8xf32>
      tpu.vector_store %arg15[%c0_39, %c0_40], %58 {strides = array<i32>} : memref<128x8xf32, #tpu.memory_space<vmem>>, vector<128x8xf32>,
      %cst_41 = arith.constant 0.000000e+00 : f32
      %60 = vector.broadcast %cst_41 : f32 to vector<128x8xf32>
      %c0_42 = arith.constant 0 : index
      %c0_43 = arith.constant 0 : index
      %61 = vector.load %arg16[%c0_42, %c0_43] : memref<128x8xf32, #tpu.memory_space<vmem>>, vector<128x8xf32>
      tpu.vector_store %arg16[%c0_42, %c0_43], %60 {strides = array<i32>} : memref<128x8xf32, #tpu.memory_space<vmem>>, vector<128x8xf32>,
    } else {
    }
    %c0 = arith.constant 0 : index
    %c0_1 = arith.constant 0 : index
    %3 = vector.load %arg3[%c0, %c0_1] : memref<128x64xbf16, #tpu.memory_space<vmem>>, vector<128x64xbf16>
    %c0_2 = arith.constant 0 : index
    %c0_3 = arith.constant 0 : index
    %4 = vector.load %arg4[%c0_2, %c0_3] : memref<64x256xbf16, #tpu.memory_space<vmem>>, vector<64x256xbf16>
    %cst = arith.constant dense<0.000000e+00> : vector<128x256xf32>
    %5 = tpu.matmul %3, %4, %cst {dimension_numbers = #tpu.dot_dimension_numbers<[1], [0], [0], [1], [0, 0, 1, 1], [], []>} : vector<128x64xbf16>, vector<64x256xbf16>, vector<128x256xf32> -> vector<128x256xf32>
    %c0_4 = arith.constant 0 : index
    %c0_5 = arith.constant 0 : index
    %6 = vector.load %arg13[%c0_4, %c0_5] : memref<128x1xf32, #tpu.memory_space<vmem>>, vector<128x1xf32>
    %cst_6 = arith.constant dense<0xFF800000> : vector<128xf32>
    %7 = vector.multi_reduction <maximumf>, %5, %cst_6 [1] : vector<128x256xf32> to vector<128xf32>
    %8 = vector.shape_cast %7 : vector<128xf32> to vector<128x1xf32>
    %9 = arith.maximumf %6, %8 : vector<128x1xf32>
    %10 = arith.subf %6, %9 : vector<128x1xf32>
    %11 = math.exp %10 : vector<128x1xf32>
    %12 = vector.broadcast %9 : vector<128x1xf32> to vector<128x256xf32>
    %13 = arith.subf %5, %12 : vector<128x256xf32>
    %14 = math.exp %13 : vector<128x256xf32>
    %c0_7 = arith.constant 0 : index
    %c0_8 = arith.constant 0 : index
    %15 = vector.load %arg7[%c0_7, %c0_8] : memref<128x1xi32, #tpu.memory_space<vmem>>, vector<128x1xi32>
    %c0_9 = arith.constant 0 : index
    %c0_10 = arith.constant 0 : index
    %16 = vector.load %arg8[%c0_9, %c0_10] : memref<1x256xi32, #tpu.memory_space<vmem>>, vector<1x256xi32>
    %17 = vector.broadcast %15 : vector<128x1xi32> to vector<128x256xi32>
    %18 = vector.broadcast %16 : vector<1x256xi32> to vector<128x256xi32>
    %19 = arith.cmpi ne, %17, %18 : vector<128x256xi32>
    %20 = arith.truncf %14 : vector<128x256xf32> to vector<128x256xbf16>
    %c0_i32_11 = arith.constant 0 : i32
    %21 = arith.sitofp %c0_i32_11 : i32 to bf16
    %22 = vector.broadcast %21 : bf16 to vector<128x256xbf16>
    %23 = arith.select %19, %20, %22 : vector<128x256xi1>, vector<128x256xbf16>
    %24 = arith.extui %19 : vector<128x256xi1> to vector<128x256xi32>
    %25 = arith.sitofp %24 : vector<128x256xi32> to vector<128x256xf32>
    %26 = arith.truncf %25 : vector<128x256xf32> to vector<128x256xbf16>
    %c0_12 = arith.constant 0 : index
    %c0_13 = arith.constant 0 : index
    %27 = vector.load %arg5[%c0_12, %c0_13] : memref<256x1xi32, #tpu.memory_space<vmem>>, vector<256x1xi32>
    %28 = tpu.iota {dimensions = array<i32: 1>} : vector<256x8xi32>
    %29 = vector.broadcast %27 : vector<256x1xi32> to vector<256x8xi32>
    %30 = arith.cmpi eq, %29, %28 : vector<256x8xi32>
    %31 = arith.extui %30 : vector<256x8xi1> to vector<256x8xi32>
    %32 = arith.sitofp %31 : vector<256x8xi32> to vector<256x8xf32>
    %33 = arith.truncf %32 : vector<256x8xf32> to vector<256x8xbf16>
    %c0_14 = arith.constant 0 : index
    %c0_15 = arith.constant 0 : index
    %34 = vector.load %arg14[%c0_14, %c0_15] : memref<128x8xf32, #tpu.memory_space<vmem>>, vector<128x8xf32>
    %35 = vector.broadcast %11 : vector<128x1xf32> to vector<128x8xf32>
    %36 = arith.mulf %35, %34 : vector<128x8xf32>
    %cst_16 = arith.constant dense<0.000000e+00> : vector<128x8xf32>
    %37 = tpu.matmul %20, %33, %cst_16 {dimension_numbers = #tpu.dot_dimension_numbers<[1], [0], [0], [1], [0, 0, 1, 1], [], []>} : vector<128x256xbf16>, vector<256x8xbf16>, vector<128x8xf32> -> vector<128x8xf32>
    %38 = arith.addf %36, %37 : vector<128x8xf32>
    %c0_17 = arith.constant 0 : index
    %c0_18 = arith.constant 0 : index
    %39 = vector.load %arg14[%c0_17, %c0_18] : memref<128x8xf32, #tpu.memory_space<vmem>>, vector<128x8xf32>
    tpu.vector_store %arg14[%c0_17, %c0_18], %38 {strides = array<i32>} : memref<128x8xf32, #tpu.memory_space<vmem>>, vector<128x8xf32>,
    %c0_19 = arith.constant 0 : index
    %c0_20 = arith.constant 0 : index
    %40 = vector.load %arg15[%c0_19, %c0_20] : memref<128x8xf32, #tpu.memory_space<vmem>>, vector<128x8xf32>
    %41 = vector.broadcast %11 : vector<128x1xf32> to vector<128x8xf32>
    %42 = arith.mulf %41, %40 : vector<128x8xf32>
    %cst_21 = arith.constant dense<0.000000e+00> : vector<128x8xf32>
    %43 = tpu.matmul %23, %33, %cst_21 {dimension_numbers = #tpu.dot_dimension_numbers<[1], [0], [0], [1], [0, 0, 1, 1], [], []>} : vector<128x256xbf16>, vector<256x8xbf16>, vector<128x8xf32> -> vector<128x8xf32>
    %44 = arith.addf %42, %43 : vector<128x8xf32>
    %c0_22 = arith.constant 0 : index
    %c0_23 = arith.constant 0 : index
    %45 = vector.load %arg15[%c0_22, %c0_23] : memref<128x8xf32, #tpu.memory_space<vmem>>, vector<128x8xf32>
    tpu.vector_store %arg15[%c0_22, %c0_23], %44 {strides = array<i32>} : memref<128x8xf32, #tpu.memory_space<vmem>>, vector<128x8xf32>,
    %c0_24 = arith.constant 0 : index
    %c0_25 = arith.constant 0 : index
    %46 = vector.load %arg16[%c0_24, %c0_25] : memref<128x8xf32, #tpu.memory_space<vmem>>, vector<128x8xf32>
    %cst_26 = arith.constant dense<0.000000e+00> : vector<128x8xf32>
    %47 = tpu.matmul %26, %33, %cst_26 {dimension_numbers = #tpu.dot_dimension_numbers<[1], [0], [0], [1], [0, 0, 1, 1], [], []>} : vector<128x256xbf16>, vector<256x8xbf16>, vector<128x8xf32> -> vector<128x8xf32>
    %48 = arith.addf %46, %47 : vector<128x8xf32>
    %c0_27 = arith.constant 0 : index
    %c0_28 = arith.constant 0 : index
    %49 = vector.load %arg16[%c0_27, %c0_28] : memref<128x8xf32, #tpu.memory_space<vmem>>, vector<128x8xf32>
    tpu.vector_store %arg16[%c0_27, %c0_28], %48 {strides = array<i32>} : memref<128x8xf32, #tpu.memory_space<vmem>>, vector<128x8xf32>,
    %c0_29 = arith.constant 0 : index
    %c0_30 = arith.constant 0 : index
    %50 = vector.load %arg13[%c0_29, %c0_30] : memref<128x1xf32, #tpu.memory_space<vmem>>, vector<128x1xf32>
    tpu.vector_store %arg13[%c0_29, %c0_30], %9 {strides = array<i32>} : memref<128x1xf32, #tpu.memory_space<vmem>>, vector<128x1xf32>,
    %c1_i32 = arith.constant 1 : i32
    %51 = arith.cmpi eq, %arg1, %c1_i32 : i32
    %52 = arith.extui %51 : i1 to i32
    %c0_i32_31 = arith.constant 0 : i32
    %53 = arith.cmpi ne, %52, %c0_i32_31 : i32
    scf.if %53 {
      %c0_32 = arith.constant 0 : index
      %c0_33 = arith.constant 0 : index
      %54 = vector.load %arg10[%c0_32, %c0_33] : memref<1x8xf32, #tpu.memory_space<vmem>>, vector<1x8xf32>
      %c0_34 = arith.constant 0 : index
      %c0_35 = arith.constant 0 : index
      %55 = vector.load %arg14[%c0_34, %c0_35] : memref<128x8xf32, #tpu.memory_space<vmem>>, vector<128x8xf32>
      %56 = math.log %55 : vector<128x8xf32>
      %c0_36 = arith.constant 0 : index
      %c0_37 = arith.constant 0 : index
      %57 = vector.load %arg11[%c0_36, %c0_37] : memref<1x8xf32, #tpu.memory_space<vmem>>, vector<1x8xf32>
      %58 = math.log %57 : vector<1x8xf32>
      %59 = vector.broadcast %58 : vector<1x8xf32> to vector<128x8xf32>
      %60 = arith.subf %56, %59 : vector<128x8xf32>
      %c0_38 = arith.constant 0 : index
      %c0_39 = arith.constant 0 : index
      %61 = vector.load %arg13[%c0_38, %c0_39] : memref<128x1xf32, #tpu.memory_space<vmem>>, vector<128x1xf32>
      %62 = vector.broadcast %61 : vector<128x1xf32> to vector<128x8xf32>
      %63 = arith.addf %60, %62 : vector<128x8xf32>
      %c0_40 = arith.constant 0 : index
      %c0_41 = arith.constant 0 : index
      %64 = vector.load %arg15[%c0_40, %c0_41] : memref<128x8xf32, #tpu.memory_space<vmem>>, vector<128x8xf32>
      %65 = math.log %64 : vector<128x8xf32>
      %c0_42 = arith.constant 0 : index
      %c0_43 = arith.constant 0 : index
      %66 = vector.load %arg16[%c0_42, %c0_43] : memref<128x8xf32, #tpu.memory_space<vmem>>, vector<128x8xf32>
      %67 = math.log %66 : vector<128x8xf32>
      %68 = arith.subf %65, %67 : vector<128x8xf32>
      %c0_44 = arith.constant 0 : index
      %c0_45 = arith.constant 0 : index
      %69 = vector.load %arg13[%c0_44, %c0_45] : memref<128x1xf32, #tpu.memory_space<vmem>>, vector<128x1xf32>
      %70 = vector.broadcast %69 : vector<128x1xf32> to vector<128x8xf32>
      %71 = arith.addf %68, %70 : vector<128x8xf32>
      %c0_46 = arith.constant 0 : index
      %c0_47 = arith.constant 0 : index
      %72 = vector.load %arg6[%c0_46, %c0_47] : memref<128x1xi32, #tpu.memory_space<vmem>>, vector<128x1xi32>
      %73 = tpu.iota {dimensions = array<i32: 1>} : vector<128x8xi32>
      %74 = vector.broadcast %72 : vector<128x1xi32> to vector<128x8xi32>
      %75 = arith.cmpi eq, %74, %73 : vector<128x8xi32>
      %76 = arith.extui %75 : vector<128x8xi1> to vector<128x8xi32>
      %77 = arith.sitofp %76 : vector<128x8xi32> to vector<128x8xf32>
      %c0_48 = arith.constant 0 : index
      %c0_49 = arith.constant 0 : index
      %78 = vector.load %arg9[%c0_48, %c0_49] : memref<128x8xf32, #tpu.memory_space<vmem>>, vector<128x8xf32>
      %c0_50 = arith.constant 0 : index
      %79 = memref.load %arg2[%c0_50] : memref<1xf32, #tpu.memory_space<smem>>
      %80 = vector.broadcast %79 : f32 to vector<128x8xf32>
      %81 = arith.mulf %78, %80 : vector<128x8xf32>
      %82 = vector.broadcast %54 : vector<1x8xf32> to vector<128x8xf32>
      %83 = arith.addf %81, %82 : vector<128x8xf32>
      %cst_51 = arith.constant dense<0xFF800000> : vector<128xf32>
      %84 = vector.multi_reduction <maximumf>, %83, %cst_51 [1] : vector<128x8xf32> to vector<128xf32>
      %85 = vector.shape_cast %84 : vector<128xf32> to vector<128x1xf32>
      %86 = vector.broadcast %85 : vector<128x1xf32> to vector<128x8xf32>
      %87 = arith.subf %83, %86 : vector<128x8xf32>
      %88 = math.exp %87 : vector<128x8xf32>
      %cst_52 = arith.constant dense<0.000000e+00> : vector<128xf32>
      %89 = vector.multi_reduction <add>, %88, %cst_52 [1] : vector<128x8xf32> to vector<128xf32>
      %90 = vector.shape_cast %89 : vector<128xf32> to vector<128x1xf32>
      %91 = math.log %90 : vector<128x1xf32>
      %92 = arith.addf %91, %85 : vector<128x1xf32>
      %93 = arith.mulf %83, %77 : vector<128x8xf32>
      %cst_53 = arith.constant dense<0.000000e+00> : vector<128xf32>
      %94 = vector.multi_reduction <add>, %93, %cst_53 [1] : vector<128x8xf32> to vector<128xf32>
      %95 = vector.shape_cast %94 : vector<128xf32> to vector<128x1xf32>
      %96 = arith.subf %92, %95 : vector<128x1xf32>
      %97 = vector.shape_cast %96 : vector<128x1xf32> to vector<1x128x1xf32>
      %cst_54 = arith.constant dense<0.000000e+00> : vector<1xf32>
      %98 = vector.multi_reduction <add>, %97, %cst_54 [1, 2] : vector<1x128x1xf32> to vector<1xf32>
      %99 = vector.shape_cast %98 : vector<1xf32> to vector<1x1x1xf32>
      %100 = vector.extract %99[0, 0, 0] : f32 from vector<1x1x1xf32>
      %101 = vector.broadcast %54 : vector<1x8xf32> to vector<128x8xf32>
      %102 = arith.addf %63, %101 : vector<128x8xf32>
      %cst_55 = arith.constant dense<0xFF800000> : vector<128xf32>
      %103 = vector.multi_reduction <maximumf>, %102, %cst_55 [1] : vector<128x8xf32> to vector<128xf32>
      %104 = vector.shape_cast %103 : vector<128xf32> to vector<128x1xf32>
      %105 = vector.broadcast %104 : vector<128x1xf32> to vector<128x8xf32>
      %106 = arith.subf %102, %105 : vector<128x8xf32>
      %107 = math.exp %106 : vector<128x8xf32>
      %cst_56 = arith.constant dense<0.000000e+00> : vector<128xf32>
      %108 = vector.multi_reduction <add>, %107, %cst_56 [1] : vector<128x8xf32> to vector<128xf32>
      %109 = vector.shape_cast %108 : vector<128xf32> to vector<128x1xf32>
      %110 = math.log %109 : vector<128x1xf32>
      %111 = arith.addf %110, %104 : vector<128x1xf32>
      %112 = arith.mulf %102, %77 : vector<128x8xf32>
      %cst_57 = arith.constant dense<0.000000e+00> : vector<128xf32>
      %113 = vector.multi_reduction <add>, %112, %cst_57 [1] : vector<128x8xf32> to vector<128xf32>
      %114 = vector.shape_cast %113 : vector<128xf32> to vector<128x1xf32>
      %115 = arith.subf %111, %114 : vector<128x1xf32>
      %116 = vector.shape_cast %115 : vector<128x1xf32> to vector<1x128x1xf32>
      %cst_58 = arith.constant dense<0.000000e+00> : vector<1xf32>
      %117 = vector.multi_reduction <add>, %116, %cst_58 [1, 2] : vector<1x128x1xf32> to vector<1xf32>
      %118 = vector.shape_cast %117 : vector<1xf32> to vector<1x1x1xf32>
      %119 = vector.extract %118[0, 0, 0] : f32 from vector<1x1x1xf32>
      %120 = vector.broadcast %54 : vector<1x8xf32> to vector<128x8xf32>
      %121 = arith.addf %71, %120 : vector<128x8xf32>
      %cst_59 = arith.constant dense<0xFF800000> : vector<128xf32>
      %122 = vector.multi_reduction <maximumf>, %121, %cst_59 [1] : vector<128x8xf32> to vector<128xf32>
      %123 = vector.shape_cast %122 : vector<128xf32> to vector<128x1xf32>
      %124 = vector.broadcast %123 : vector<128x1xf32> to vector<128x8xf32>
      %125 = arith.subf %121, %124 : vector<128x8xf32>
      %126 = math.exp %125 : vector<128x8xf32>
      %cst_60 = arith.constant dense<0.000000e+00> : vector<128xf32>
      %127 = vector.multi_reduction <add>, %126, %cst_60 [1] : vector<128x8xf32> to vector<128xf32>
      %128 = vector.shape_cast %127 : vector<128xf32> to vector<128x1xf32>
      %129 = math.log %128 : vector<128x1xf32>
      %130 = arith.addf %129, %123 : vector<128x1xf32>
      %131 = arith.mulf %121, %77 : vector<128x8xf32>
      %cst_61 = arith.constant dense<0.000000e+00> : vector<128xf32>
      %132 = vector.multi_reduction <add>, %131, %cst_61 [1] : vector<128x8xf32> to vector<128xf32>
      %133 = vector.shape_cast %132 : vector<128xf32> to vector<128x1xf32>
      %134 = arith.subf %130, %133 : vector<128x1xf32>
      %135 = vector.shape_cast %134 : vector<128x1xf32> to vector<1x128x1xf32>
      %cst_62 = arith.constant dense<0.000000e+00> : vector<1xf32>
      %136 = vector.multi_reduction <add>, %135, %cst_62 [1, 2] : vector<1x128x1xf32> to vector<1xf32>
      %137 = vector.shape_cast %136 : vector<1xf32> to vector<1x1x1xf32>
      %138 = vector.extract %137[0, 0, 0] : f32 from vector<1x1x1xf32>
      %139 = tpu.iota {dimensions = array<i32: 0>} : vector<8x128xi32>
      %140 = tpu.iota {dimensions = array<i32: 1>} : vector<8x128xi32>
      %c0_i32_63 = arith.constant 0 : i32
      %141 = vector.broadcast %c0_i32_63 : i32 to vector<8x128xi32>
      %142 = arith.cmpi eq, %139, %141 : vector<8x128xi32>
      %c0_i32_64 = arith.constant 0 : i32
      %143 = vector.broadcast %c0_i32_64 : i32 to vector<8x128xi32>
      %144 = arith.cmpi eq, %140, %143 : vector<8x128xi32>
      %145 = arith.andi %142, %144 : vector<8x128xi1>
      %c1_i32_65 = arith.constant 1 : i32
      %146 = vector.broadcast %c1_i32_65 : i32 to vector<8x128xi32>
      %147 = arith.cmpi eq, %140, %146 : vector<8x128xi32>
      %148 = arith.andi %142, %147 : vector<8x128xi1>
      %c2_i32 = arith.constant 2 : i32
      %149 = vector.broadcast %c2_i32 : i32 to vector<8x128xi32>
      %150 = arith.cmpi eq, %140, %149 : vector<8x128xi32>
      %151 = arith.andi %142, %150 : vector<8x128xi1>
      %cst_66 = arith.constant 0.000000e+00 : f32
      %152 = vector.broadcast %138 : f32 to vector<8x128xf32>
      %153 = vector.broadcast %cst_66 : f32 to vector<8x128xf32>
      %154 = arith.select %151, %152, %153 : vector<8x128xi1>, vector<8x128xf32>
      %155 = vector.broadcast %119 : f32 to vector<8x128xf32>
      %156 = arith.select %148, %155, %154 : vector<8x128xi1>, vector<8x128xf32>
      %157 = vector.broadcast %100 : f32 to vector<8x128xf32>
      %158 = arith.select %145, %157, %156 : vector<8x128xi1>, vector<8x128xf32>
      %c0_67 = arith.constant 0 : index
      %c0_68 = arith.constant 0 : index
      %c0_69 = arith.constant 0 : index
      %159 = vector.load %arg12[%c0_67, %c0_68, %c0_69] : memref<1x8x128xf32, #tpu.memory_space<vmem>>, vector<1x8x128xf32>
      %160 = vector.shape_cast %159 : vector<1x8x128xf32> to vector<8x128xf32>
      %161 = vector.shape_cast %158 : vector<8x128xf32> to vector<1x8x128xf32>
      tpu.vector_store %arg12[%c0_67, %c0_68, %c0_69], %161 {strides = array<i32>} : memref<1x8x128xf32, #tpu.memory_space<vmem>>, vector<1x8x128xf32>,
    } else {
    }
    return
  }
  func.func @transform_0(%arg0: i32, %arg1: i32) -> i32 {
    %c0_i32 = arith.constant 0 : i32
    %c0_i32_0 = arith.constant 0 : i32
    return %c0_i32 : i32
  }
  func.func @transform_1(%arg0: i32, %arg1: i32) -> (i32, i32) {
    %c0_i32 = arith.constant 0 : i32
    %c0_i32_0 = arith.constant 0 : i32
    return %arg0, %c0_i32 : i32, i32
  }
  func.func @transform_2(%arg0: i32, %arg1: i32) -> (i32, i32) {
    %c0_i32 = arith.constant 0 : i32
    %c0_i32_0 = arith.constant 0 : i32
    return %c0_i32, %arg1 : i32, i32
  }
  func.func @transform_3(%arg0: i32, %arg1: i32) -> (i32, i32) {
    %c0_i32 = arith.constant 0 : i32
    %c0_i32_0 = arith.constant 0 : i32
    return %arg1, %c0_i32 : i32, i32
  }
  func.func @transform_4(%arg0: i32, %arg1: i32) -> (i32, i32) {
    %c0_i32 = arith.constant 0 : i32
    %c0_i32_0 = arith.constant 0 : i32
    return %arg0, %c0_i32 : i32, i32
  }
  func.func @transform_5(%arg0: i32, %arg1: i32) -> (i32, i32) {
    %c0_i32 = arith.constant 0 : i32
    %c0_i32_0 = arith.constant 0 : i32
    return %arg0, %c0_i32 : i32, i32
  }
  func.func @transform_6(%arg0: i32, %arg1: i32) -> (i32, i32) {
    %c0_i32 = arith.constant 0 : i32
    %c0_i32_0 = arith.constant 0 : i32
    return %c0_i32, %arg1 : i32, i32
  }
  func.func @transform_7(%arg0: i32, %arg1: i32) -> (i32, i32) {
    %c0_i32 = arith.constant 0 : i32
    %c0_i32_0 = arith.constant 0 : i32
    return %arg0, %c0_i32 : i32, i32
  }
  func.func @transform_8(%arg0: i32, %arg1: i32) -> (i32, i32) {
    %c0_i32 = arith.constant 0 : i32
    %c0_i32_0 = arith.constant 0 : i32
    %c0_i32_1 = arith.constant 0 : i32
    return %c0_i32, %c0_i32_0 : i32, i32
  }
  func.func @transform_9(%arg0: i32, %arg1: i32) -> (i32, i32) {
    %c0_i32 = arith.constant 0 : i32
    %c0_i32_0 = arith.constant 0 : i32
    %c0_i32_1 = arith.constant 0 : i32
    return %c0_i32, %c0_i32_0 : i32, i32
  }
  func.func @transform_10(%arg0: i32, %arg1: i32) -> (i32, i32, i32) {
    %c0_i32 = arith.constant 0 : i32
    %c0_i32_0 = arith.constant 0 : i32
    %c0_i32_1 = arith.constant 0 : i32
    return %arg0, %c0_i32, %c0_i32_0 : i32, i32, i32
  }
}

</mosaic_0001>

<bundles_post_ra>
// kernel: forward.1
= control target key start
LH: loop header
LB: loop body
LE: loop exit
PB: predicated region body
PF: predicated region fallthrough
CT: control target
= control target key end

     0   :  { %s7344_s0 = inlined_call_operand.<no memory space> [shape: f32[1], index: 0, kind: input, shape index: {}]   ;;  %s7345_s1 = inlined_call_operand.vmem [shape: bf16[256,64], index: 1, kind: input, shape index: {}]   ;;  %s7346_s2 = inlined_call_operand.vmem [shape: bf16[64,512], index: 2, kind: input, shape index: {}]   ;;  %s7347_s3 = inlined_call_operand.vmem [shape: s32[512,1], index: 3, kind: input, shape index: {}]   ;;  %s7348_s4 = inlined_call_operand.vmem [shape: s32[256,1], index: 4, kind: input, shape index: {}]   ;;  %s7349_s5 = inlined_call_operand.vmem [shape: s32[256,1], index: 5, kind: input, shape index: {}]   ;;  %s7350_s6 = inlined_call_operand.vmem [shape: s32[1,512], index: 6, kind: input, shape index: {}]   ;;  %s7351_s7 = inlined_call_operand.vmem [shape: f32[256,8], index: 7, kind: input, shape index: {}]   ;;  %s7352_s8 = inlined_call_operand.vmem [shape: f32[1,8], index: 8, kind: input, shape index: {}]   ;;  %s7353_s9 = inlined_call_operand.vmem [shape: f32[1,8], index: 9, kind: input, shape index: {}]   ;;  %s7354_s10 = inlined_call_operand.vmem [shape: f32[2,8,128], index: 10, kind: output, shape index: {}]  }
   0x1   :  { %7472 = sst [smem:[#allocation78_spill]] %s7345_s1 }
   0x2   :  { %7473 = sst [smem:[#allocation79_spill]] %s7346_s2 }
   0x3   :  { %15 = sst [smem:[#allocation6]] %s7344_s0 }
   0x4   :  { %s4879_s15 = smov 0   ;;  %s4881_s16 = smov 0  }
   0x5   :  { %s4883_s17 = smov 0   ;;  %s4885_s18 = smov 0  }
   0x6   :  { %s4887_s19 = smov 0   ;;  %s4889_s20 = smov 0  }
   0x7   :  { %s4891_s21 = smov 0  }
   0x8 LB: > { %7474 = sst [smem:[#allocation8_spill]] %s4805_s19  ;;  %s30_s0 = sadd.s32 1, %s4805_s19  ;;  %s4813_s21 = sphi %s4891_s21, %s21_s21   ;;  %s4809_s20 = sphi %s4889_s20, %s7745_s20   ;;  %s4805_s19 = sphi %s4887_s19, %s7744_s19   ;;  %s4801_s18 = sphi %s4885_s18, %s7743_s18   ;;  %s4797_s17 = sphi %s4883_s17, %s7742_s17   ;;  %s4793_s16 = sphi %s4881_s16, %s7747_s16   ;;  %s4789_s15 = sphi %s4879_s15, %s7746_s15  }
   0x9   : > { %7475 = sst [smem:[#allocation9_spill]] %s4809_s20  ;;  %s33_s22 = sadd.s32 1, %s4809_s20 }
   0xa   : > { %p31_p0 = scmp.ge.s32.totalorder %s30_s0, 2  ;;  %s87_s23 = sadd.s32 1, %s4793_s16 }
   0xb   : > { %p94_p1 = scmp.ne.s32.totalorder %s4793_s16, %s4789_s15  ;;  %p95_p2 = scmp.eq.s32.totalorder %s4813_s21, 0 }
   0xc   : > { %s7749_s0 = smov (%p31_p0, %s30_s0), 0  ;;  %s7751_s22 = smov (!%p31_p0, %s33_s22), %s4809_s20 }
   0xd   : > { %7476 = sst [smem:[#allocation10_spill]] %s7749_s0  ;;  %s84_s24 = ssub.s32 %s4805_s19, %s7749_s0 }
   0xe   : > { %p96_p3 = por %p95_p2, %p94_p1  ;;  %p35_p4 = scmp.ge.s32.totalorder %s7751_s22, 2 }
   0xf   : > { %p85_p5 = scmp.eq.s32.totalorder %s84_s24, 0  ;;  %p3970_p6 = scmp.ge.s32.totalorder %s4813_s21, 4 }
  0x10   : > { %s7753_s22 = smov (%p35_p4, %s7751_s22), 0 }
  0x11   : > { %7477 = sst [smem:[#allocation11_spill]] %s7753_s22  ;;  %327 = sbr.rel (%p3970_p6) target bundleno = 40 (0x28), region = 28 }
  0x12   : > { %s4928_s25 = scalar_select %p85_p5, %s4793_s16, %s87_s23  }
  0x14   : > { %7478 = sst [smem:[#allocation12_spill]] %s4928_s25 }
  0x16   : > { %339 = sbr.rel (!%p96_p3) target bundleno = 40 (0x28), region = 36  ;;  %s341_s26 = sand.u32 (%p96_p3), 1, %s4793_s16  }
  0x17   : > { %s4280_s27 = sshll.u32 (%p96_p3), %s4805_s19, 3  ;;  %s3971_s28 = sshll.u32 (%p96_p3), %s341_s26, 6 }
  0x18   : > { %s7479_s2 = sld [smem:[#allocation79_spill]] (%p96_p3)  ;;  %s343_s12 = scalar_lea.vmem (%p96_p3), [#allocation7], %s3971_s28 }
  0x1e   : > { %s346_s11 = scalar_lea.vmem %s7479_s2, %s4280_s27 }
  0x1f   : > { %v389_v0 = vld [vmem:[%s346_s11] sm:$0xff]  ;;  %v391_v1 = vld [vmem:[%s346_s11 + $0x10] sm:$0xff] }
  0x20   : > { %v393_v2 = vld [vmem:[%s346_s11 + $0x20] sm:$0xff]  ;;  %390 = vst [vmem:[%s343_s12] sm:$0xff] %v389_v0  ;;  %v395_v3 = vld [vmem:[%s346_s11 + $0x30] sm:$0xff] }
  0x21   : > { %392 = vst [vmem:[%s343_s12 + $0x8] sm:$0xff] %v391_v1  ;;  %v397_v4 = vld [vmem:[%s346_s11 + $0x40] sm:$0xff]  ;;  %v399_v5 = vld [vmem:[%s346_s11 + $0x50] sm:$0xff] }
  0x22   : > { %394 = vst [vmem:[%s343_s12 + $0x10] sm:$0xff] %v393_v2  ;;  %v401_v6 = vld [vmem:[%s346_s11 + $0x60] sm:$0xff]  ;;  %v403_v7 = vld [vmem:[%s346_s11 + $0x70] sm:$0xff] }
  0x23   : > { %396 = vst [vmem:[%s343_s12 + $0x18] sm:$0xff] %v395_v3 }
  0x24   : > { %398 = vst [vmem:[%s343_s12 + $0x20] sm:$0xff] %v397_v4 }
  0x25   : > { %400 = vst [vmem:[%s343_s12 + $0x28] sm:$0xff] %v399_v5 }
  0x26   : > { %402 = vst [vmem:[%s343_s12 + $0x30] sm:$0xff] %v401_v6 }
  0x27   : > { %404 = vst [vmem:[%s343_s12 + $0x38] sm:$0xff] %v403_v7 }
  0x28 PF: > { %p3974_p7 = scmp.ge.s32.totalorder %s4813_s21, 1  ;;  %p453_p8 = scmp.lt.s32.totalorder %s4813_s21, 5 }
  0x2a   : > { %p454_p9 = pnand %p3974_p7, %p453_p8 }
  0x2c   : > { %457 = sbr.rel (%p454_p9) target bundleno = 1996 (0x7cc), region = 94 }
  0x31   : > { %s460_s13 = sand.u32 1, %s4789_s15   ;;  %s3976_s14 = sshll.u32 %s4801_s18, 4 }
  0x32   : > { %s3975_s23 = sshll.u32 %s460_s13, 6  ;;  %p526_p10 = scmp.lt.s32.totalorder %s3976_s14, 31 }
  0x33   : > { %s3978_s24 = sshll.u32 %s4797_s17, 5  ;;  %s3984_s26 = sshll.u32 %s4797_s17, 1 }
  0x34   : > { %s7755_s14 = smov (!%p526_p10, %s3976_s14), 31  ;;  %p533_p11 = scmp.lt.s32.totalorder %s3978_s24, 63 }
  0x35   : > { %s3977_s27 = sshll.u32 %s7755_s14, 2  ;;  %s3981_s28 = sshll.u32 %s7755_s14, 3 }
  0x36   : > { %s7480_s1 = sld [smem:[#allocation78_spill]]  ;;  %s4950_s15 = scalar_lea.vmem %s7348_s4, %s3981_s28 }
  0x37   : > { %s7757_s24 = smov (!%p533_p11, %s3978_s24), 63  ;;  %s4955_s0 = scalar_lea.vmem %s7349_s5, %s3981_s28 }
  0x38   : > { %p551_p12 = scmp.lt.s32.totalorder %s3984_s26, 3  ;;  %s3979_s20 = sshll.u32 %s7757_s24, 3 }
  0x39   : > { %s4960_s25 = scalar_lea.vmem %s7351_s7, %s3981_s28  ;;  %s4965_s30 = scalar_lea.vmem %s7347_s3, %s3979_s20 }
  0x3a   : > { %p561_p13 = scmp.lt.s32.totalorder %s4801_s18, 1  ;;  %s7759_s26 = smov (!%p551_p12, %s3984_s26), 3 }
  0x3b   : > { %s553_s12 = scalar_lea.vmem %s7350_s6, %s7759_s26  ;;  %s4980_s28 = scalar_lea.vmem [#allocation7], %s3975_s23 }
  0x3c   : > { %s4945_s11 = scalar_lea.vmem %s7480_s1, %s3977_s27  ;;  %s7761_s18 = smov (!%p561_p13, %s4801_s18), 1 }
  0x3d   : > { %s3987_s24 = sshll.u32 %s7761_s18, 3  ;;  %p3988_p0 = scmp.ne.s32.totalorder %s4797_s17, 0 }
  0x3e   : > { %s4978_s19 = scalar_lea.vmem %s7354_s10, %s3987_s24 }
  0x3f   : > { %569 = sbr.rel (%p3988_p0) target bundleno = 133 (0x85), region = 102 }
  0x44   : > { %vm570_vm0 = vcmask 7168   ;;  %v4815_v8 = vmov -inf   ;;  %vm587_vm1 = vcmask 64512   ;;  %v4816_v9 = vmov 0.0  }
  0x45   : > { %571 = vst.msk [vmem:[#allocation2] sm:$0xff] %vm570_vm0, %v4815_v8 }
  0x46   : > { %572 = vst.msk [vmem:[#allocation2 + $0x8] sm:$0xff] %vm570_vm0, %v4815_v8 }
  0x47   : > { %573 = vst.msk [vmem:[#allocation2 + $0x10] sm:$0xff] %vm570_vm0, %v4815_v8 }
  0x48   : > { %574 = vst.msk [vmem:[#allocation2 + $0x18] sm:$0xff] %vm570_vm0, %v4815_v8 }
  0x49   : > { %575 = vst.msk [vmem:[#allocation2 + $0x20] sm:$0xff] %vm570_vm0, %v4815_v8 }
  0x4a   : > { %576 = vst.msk [vmem:[#allocation2 + $0x28] sm:$0xff] %vm570_vm0, %v4815_v8 }
  0x4b   : > { %577 = vst.msk [vmem:[#allocation2 + $0x30] sm:$0xff] %vm570_vm0, %v4815_v8 }
  0x4c   : > { %578 = vst.msk [vmem:[#allocation2 + $0x38] sm:$0xff] %vm570_vm0, %v4815_v8 }
  0x4d   : > { %579 = vst.msk [vmem:[#allocation2 + $0x40] sm:$0xff] %vm570_vm0, %v4815_v8 }
  0x4e   : > { %580 = vst.msk [vmem:[#allocation2 + $0x48] sm:$0xff] %vm570_vm0, %v4815_v8 }
  0x4f   : > { %581 = vst.msk [vmem:[#allocation2 + $0x50] sm:$0xff] %vm570_vm0, %v4815_v8 }
  0x50   : > { %582 = vst.msk [vmem:[#allocation2 + $0x58] sm:$0xff] %vm570_vm0, %v4815_v8 }
  0x51   : > { %583 = vst.msk [vmem:[#allocation2 + $0x60] sm:$0xff] %vm570_vm0, %v4815_v8 }
  0x52   : > { %584 = vst.msk [vmem:[#allocation2 + $0x68] sm:$0xff] %vm570_vm0, %v4815_v8 }
  0x53   : > { %585 = vst.msk [vmem:[#allocation2 + $0x70] sm:$0xff] %vm570_vm0, %v4815_v8 }
  0x54   : > { %586 = vst.msk [vmem:[#allocation2 + $0x78] sm:$0xff] %vm570_vm0, %v4815_v8 }
  0x55   : > { %588 = vst.msk [vmem:[#allocation3] sm:$0xff] %vm587_vm1, %v4816_v9 }
  0x56   : > { %589 = vst.msk [vmem:[#allocation3 + $0x8] sm:$0xff] %vm587_vm1, %v4816_v9 }
  0x57   : > { %590 = vst.msk [vmem:[#allocation3 + $0x10] sm:$0xff] %vm587_vm1, %v4816_v9 }
  0x58   : > { %591 = vst.msk [vmem:[#allocation3 + $0x18] sm:$0xff] %vm587_vm1, %v4816_v9 }
  0x59   : > { %592 = vst.msk [vmem:[#allocation3 + $0x20] sm:$0xff] %vm587_vm1, %v4816_v9 }
  0x5a   : > { %593 = vst.msk [vmem:[#allocation3 + $0x28] sm:$0xff] %vm587_vm1, %v4816_v9 }
  0x5b   : > { %594 = vst.msk [vmem:[#allocation3 + $0x30] sm:$0xff] %vm587_vm1, %v4816_v9 }
  0x5c   : > { %595 = vst.msk [vmem:[#allocation3 + $0x38] sm:$0xff] %vm587_vm1, %v4816_v9 }
  0x5d   : > { %596 = vst.msk [vmem:[#allocation3 + $0x40] sm:$0xff] %vm587_vm1, %v4816_v9 }
  0x5e   : > { %597 = vst.msk [vmem:[#allocation3 + $0x48] sm:$0xff] %vm587_vm1, %v4816_v9 }
  0x5f   : > { %598 = vst.msk [vmem:[#allocation3 + $0x50] sm:$0xff] %vm587_vm1, %v4816_v9 }
  0x60   : > { %599 = vst.msk [vmem:[#allocation3 + $0x58] sm:$0xff] %vm587_vm1, %v4816_v9 }
  0x61   : > { %600 = vst.msk [vmem:[#allocation3 + $0x60] sm:$0xff] %vm587_vm1, %v4816_v9 }
  0x62   : > { %601 = vst.msk [vmem:[#allocation3 + $0x68] sm:$0xff] %vm587_vm1, %v4816_v9 }
  0x63   : > { %602 = vst.msk [vmem:[#allocation3 + $0x70] sm:$0xff] %vm587_vm1, %v4816_v9 }
  0x64   : > { %603 = vst.msk [vmem:[#allocation3 + $0x78] sm:$0xff] %vm587_vm1, %v4816_v9 }
  0x65   : > { %604 = vst.msk [vmem:[#allocation4] sm:$0xff] %vm587_vm1, %v4816_v9 }
  0x66   : > { %605 = vst.msk [vmem:[#allocation4 + $0x8] sm:$0xff] %vm587_vm1, %v4816_v9 }
  0x67   : > { %606 = vst.msk [vmem:[#allocation4 + $0x10] sm:$0xff] %vm587_vm1, %v4816_v9 }
  0x68   : > { %607 = vst.msk [vmem:[#allocation4 + $0x18] sm:$0xff] %vm587_vm1, %v4816_v9 }
  0x69   : > { %608 = vst.msk [vmem:[#allocation4 + $0x20] sm:$0xff] %vm587_vm1, %v4816_v9 }
  0x6a   : > { %609 = vst.msk [vmem:[#allocation4 + $0x28] sm:$0xff] %vm587_vm1, %v4816_v9 }
  0x6b   : > { %610 = vst.msk [vmem:[#allocation4 + $0x30] sm:$0xff] %vm587_vm1, %v4816_v9 }
  0x6c   : > { %611 = vst.msk [vmem:[#allocation4 + $0x38] sm:$0xff] %vm587_vm1, %v4816_v9 }
  0x6d   : > { %612 = vst.msk [vmem:[#allocation4 + $0x40] sm:$0xff] %vm587_vm1, %v4816_v9 }
  0x6e   : > { %613 = vst.msk [vmem:[#allocation4 + $0x48] sm:$0xff] %vm587_vm1, %v4816_v9 }
  0x6f   : > { %614 = vst.msk [vmem:[#allocation4 + $0x50] sm:$0xff] %vm587_vm1, %v4816_v9 }
  0x70   : > { %615 = vst.msk [vmem:[#allocation4 + $0x58] sm:$0xff] %vm587_vm1, %v4816_v9 }
  0x71   : > { %616 = vst.msk [vmem:[#allocation4 + $0x60] sm:$0xff] %vm587_vm1, %v4816_v9 }
  0x72   : > { %617 = vst.msk [vmem:[#allocation4 + $0x68] sm:$0xff] %vm587_vm1, %v4816_v9 }
  0x73   : > { %618 = vst.msk [vmem:[#allocation4 + $0x70] sm:$0xff] %vm587_vm1, %v4816_v9 }
  0x74   : > { %619 = vst.msk [vmem:[#allocation4 + $0x78] sm:$0xff] %vm587_vm1, %v4816_v9 }
  0x75   : > { %620 = vst.msk [vmem:[#allocation5] sm:$0xff] %vm587_vm1, %v4816_v9 }
  0x76   : > { %621 = vst.msk [vmem:[#allocation5 + $0x8] sm:$0xff] %vm587_vm1, %v4816_v9 }
  0x77   : > { %622 = vst.msk [vmem:[#allocation5 + $0x10] sm:$0xff] %vm587_vm1, %v4816_v9 }
  0x78   : > { %623 = vst.msk [vmem:[#allocation5 + $0x18] sm:$0xff] %vm587_vm1, %v4816_v9 }
  0x79   : > { %624 = vst.msk [vmem:[#allocation5 + $0x20] sm:$0xff] %vm587_vm1, %v4816_v9 }
  0x7a   : > { %625 = vst.msk [vmem:[#allocation5 + $0x28] sm:$0xff] %vm587_vm1, %v4816_v9 }
  0x7b   : > { %626 = vst.msk [vmem:[#allocation5 + $0x30] sm:$0xff] %vm587_vm1, %v4816_v9 }
  0x7c   : > { %627 = vst.msk [vmem:[#allocation5 + $0x38] sm:$0xff] %vm587_vm1, %v4816_v9 }
  0x7d   : > { %628 = vst.msk [vmem:[#allocation5 + $0x40] sm:$0xff] %vm587_vm1, %v4816_v9 }
  0x7e   : > { %629 = vst.msk [vmem:[#allocation5 + $0x48] sm:$0xff] %vm587_vm1, %v4816_v9 }
  0x7f   : > { %630 = vst.msk [vmem:[#allocation5 + $0x50] sm:$0xff] %vm587_vm1, %v4816_v9 }
  0x80   : > { %631 = vst.msk [vmem:[#allocation5 + $0x58] sm:$0xff] %vm587_vm1, %v4816_v9 }
  0x81   : > { %632 = vst.msk [vmem:[#allocation5 + $0x60] sm:$0xff] %vm587_vm1, %v4816_v9 }
  0x82   : > { %633 = vst.msk [vmem:[#allocation5 + $0x68] sm:$0xff] %vm587_vm1, %v4816_v9 }
  0x83   : > { %634 = vst.msk [vmem:[#allocation5 + $0x70] sm:$0xff] %vm587_vm1, %v4816_v9 }
  0x84   : > { %635 = vst.msk [vmem:[#allocation5 + $0x78] sm:$0xff] %vm587_vm1, %v4816_v9 }
  0x85 PF: > { %v1408_v10 = vld [vmem:[%s4965_s30 + $0x70] sm:$0xff]  ;;  %v1407_v11 = vld [vmem:[%s4965_s30 + $0x68] sm:$0xff]  ;;  %v4817_v13 = vmov 0   ;;  %v4296_v14 = vld [vmem:[%s4980_s28 + $0x34] sm:$0xf0]  ;;  %vm740_vm2 = vcmask 523264   ;;  %v7360_v7 = vlaneseq }
  0x86   : > { %v4047_v12 = vld [vmem:[%s4980_s28 + $0x30] sm:$0xf]  ;;  %4365 = vset.pattern.permute.xlu1 %v4817_v13  ;;  %4367 = vset.pattern.permute.xlu0 %v4817_v13  ;;  %v4295_v15 = vld [vmem:[%s4980_s28 + $0x34] sm:$0xf]  ;;  %v4049_v16 = vld [vmem:[%s4980_s28 + $0x38] sm:$0xf0] }
  0x87   : > { %1471 = vperm.xlu1 %4365, %v1408_v10   ;;  %1468 = vperm.xlu0 %4367, %v1407_v11   ;;  %v4048_v17 = vor.u32 %v4296_v14, %v4047_v12  ;;  %v4052_v18 = vor.u32 %v4295_v15, %v4049_v16  ;;  %v4039_v19 = vld [vmem:[%s4980_s28 + $0x20] sm:$0xf]  ;;  %v4294_v20 = vld [vmem:[%s4980_s28 + $0x24] sm:$0xf0]  ;;  %v4293_v21 = vld [vmem:[%s4980_s28 + $0x24] sm:$0xf] }
  0x88   : > { %v4041_v22 = vld [vmem:[%s4980_s28 + $0x28] sm:$0xf0]  ;;  %4366 = vset.pattern.permute.xlu2 %v4817_v13  ;;  %v4040_v23 = vor.u32 %v4294_v20, %v4039_v19  ;;  %v1409_v25 = vld [vmem:[%s4965_s30 + $0x78] sm:$0xff]  ;;  %v4031_v26 = vld [vmem:[%s4980_s28 + $0x10] sm:$0xf]  ;;  %v5111_v10 = vand.u32 127, %v7360_v7 }
  0x89   : > { %769 = vmatpush.bf16.msra.mxu0 %v4048_v17  ;;  %818 = vmatpush.bf16.msra.mxu1 %v4052_v18  ;;  %v4044_v24 = vor.u32 %v4293_v21, %v4041_v22  ;;  %v4292_v27 = vld [vmem:[%s4980_s28 + $0x14] sm:$0xf0]  ;;  %v4291_v28 = vld [vmem:[%s4980_s28 + $0x14] sm:$0xf]  ;;  %v4033_v29 = vld [vmem:[%s4980_s28 + $0x18] sm:$0xf0] }
  0x8a   : > { %1474 = vperm.xlu2 %4366, %v1409_v25   ;;  %v1424_v30 = vld [vmem:[%s4965_s30 + $0xf0] sm:$0xff]  ;;  %v4032_v32 = vor.u32 %v4292_v27, %v4031_v26  ;;  %v4036_v33 = vor.u32 %v4291_v28, %v4033_v29  ;;  %v4023_v34 = vld [vmem:[%s4980_s28] sm:$0xf]  ;;  %v4290_v35 = vld [vmem:[%s4980_s28 + $0x4] sm:$0xf0]  ;;  %7481 = vst [vmem:[#allocation13_spill] sm:$0xff] %v5111_v10 }
  0x8b   : > { %v1404_v31 = vld [vmem:[%s4965_s30 + $0x50] sm:$0xff]  ;;  %v4289_v36 = vld [vmem:[%s4980_s28 + $0x4] sm:$0xf]  ;;  %v4025_v37 = vld [vmem:[%s4980_s28 + $0x8] sm:$0xf0]  ;;  %v4024_v39 = vor.u32 %v4290_v35, %v4023_v34  ;;  %p4261_p1 = scmp.ne.s32.totalorder %s4797_s17, 1 }
  0x8c   : > { %v1425_v38 = vld [vmem:[%s4965_s30 + $0xf8] sm:$0xff]  ;;  %v4028_v40 = vor.u32 %v4289_v36, %v4025_v37  ;;  %v1406_v41 = vld [vmem:[%s4965_s30 + $0x60] sm:$0xff]  ;;  %v1423_v45 = vld [vmem:[%s4965_s30 + $0xe8] sm:$0xff]  ;;  %v7361_v17 = vmov 1.0|1.0  }
  0x8d   : > { %770 = vmatpush.bf16.msra.mxu0 %v4040_v23  ;;  %819 = vmatpush.bf16.msra.mxu1 %v4044_v24  ;;  %v4281_v42 = vld [vmem:[%s4945_s11] sm:$0xff]  ;;  %v1421_v43 = vld [vmem:[%s4965_s30 + $0xd8] sm:$0xff]  ;;  %v1420_v48 = vld [vmem:[%s4965_s30 + $0xd0] sm:$0xff] }
  0x8e   : > { %v1422_v44 = vld [vmem:[%s4965_s30 + $0xe0] sm:$0xff]  ;;  %v1405_v47 = vld [vmem:[%s4965_s30 + $0x58] sm:$0xff]  ;;  %v4282_v49 = vld [vmem:[%s4945_s11 + $0x8] sm:$0xff] }
  0x8f   : > { %1519 = vperm.xlu1 %4365, %v1424_v30   ;;  %1459 = vperm.xlu0 %4367, %v1404_v31   ;;  %v1418_v46 = vld [vmem:[%s4965_s30 + $0xc0] sm:$0xff]  ;;  %v1401_v50 = vld [vmem:[%s4965_s30 + $0x38] sm:$0xff]  ;;  %v1403_v52 = vld [vmem:[%s4965_s30 + $0x48] sm:$0xff] }
  0x90   : > { %v1402_v51 = vld [vmem:[%s4965_s30 + $0x40] sm:$0xff]  ;;  %v1419_v54 = vld [vmem:[%s4965_s30 + $0xc8] sm:$0xff]  ;;  %v1400_v55 = vld [vmem:[%s4965_s30 + $0x30] sm:$0xff] }
  0x91   : > { %771 = vmatpush.bf16.msra.mxu0 %v4032_v32  ;;  %820 = vmatpush.bf16.msra.mxu1 %v4036_v33  ;;  %v1398_v53 = vld [vmem:[%s4965_s30 + $0x20] sm:$0xff]  ;;  %v4283_v56 = vld [vmem:[%s4945_s11 + $0x10] sm:$0xff]  ;;  %v1415_v57 = vld [vmem:[%s4965_s30 + $0xa8] sm:$0xff] }
  0x92   : > { %1522 = vperm.xlu2 %4366, %v1425_v38   ;;  %v1416_v58 = vld [vmem:[%s4965_s30 + $0xb0] sm:$0xff]  ;;  %v1417_v59 = vld [vmem:[%s4965_s30 + $0xb8] sm:$0xff]  ;;  %v1399_v61 = vld [vmem:[%s4965_s30 + $0x28] sm:$0xff] }
  0x93   : > { %v1412_v60 = vld [vmem:[%s4965_s30 + $0x90] sm:$0xff]  ;;  %v1414_v62 = vld [vmem:[%s4965_s30 + $0xa0] sm:$0xff]  ;;  %v4284_v63 = vld [vmem:[%s4945_s11 + $0x18] sm:$0xff] }
  0x94   : > { %v1396_v0 = vld [vmem:[%s4965_s30 + $0x10] sm:$0xff]  ;;  %v1397_v1 = vld [vmem:[%s4965_s30 + $0x18] sm:$0xff]  ;;  %v4285_v3 = vld [vmem:[%s4945_s11 + $0x20] sm:$0xff] }
  0x95   : > { %772 = vmatpush.bf16.msra.mxu0 %v4024_v39  ;;  %821 = vmatpush.bf16.msra.mxu1 %v4028_v40  ;;  %v1413_v2 = vld [vmem:[%s4965_s30 + $0x98] sm:$0xff]  ;;  %v4286_v4 = vld [vmem:[%s4945_s11 + $0x28] sm:$0xff]  ;;  %v4287_v8 = vld [vmem:[%s4945_s11 + $0x30] sm:$0xff] }
  0x96   : > { %v4288_v19 = vld [vmem:[%s4945_s11 + $0x38] sm:$0xff]  ;;  %v5424_v7 = vld [vmem:[#allocation2 + $0x20] sm:$0xff] }
  0x97   : > { %1465 = vperm.xlu1 %4365, %v1406_v41   ;;  %1510 = vperm.xlu0 %4367, %v1421_v43  }
  0x98   : > { %4053 = vmatmul.msk.bf16.vlgmr.msra.gmra.mxu0 %vm740_vm2, %v4281_v42  ;;  %4061 = vmatmul.msk.bf16.vlgmr.msra.gmra.mxu1 %vm740_vm2, %v4281_v42 }
  0x9a   : > { %1513 = vperm.xlu2 %4366, %v1422_v44  }
  0x9f   : > { %1516 = vperm.xlu1 %4365, %v1423_v45   ;;  %1501 = vperm.xlu0 %4367, %v1418_v46  }
  0xa2   : > { %1462 = vperm.xlu2 %4366, %v1405_v47  }
  0xa7   : > { %1507 = vperm.xlu1 %4365, %v1420_v48   ;;  %1450 = vperm.xlu0 %4367, %v1401_v50  }
  0xa8   : > { %4054 = vmatmul.msk.bf16.gmra.mxu0 %vm740_vm2, %v4282_v49  ;;  %4062 = vmatmul.msk.bf16.gmra.mxu1 %vm740_vm2, %v4282_v49  ;;  %v7500_v49 = vmov 0 }
  0xaa   : > { %1453 = vperm.xlu2 %4366, %v1402_v51  }
  0xaf   : > { %1456 = vperm.xlu1 %4365, %v1403_v52   ;;  %1441 = vperm.xlu0 %4367, %v1398_v53  }
  0xb2   : > { %1504 = vperm.xlu2 %4366, %v1419_v54  }
  0xb7   : > { %1447 = vperm.xlu1 %4365, %v1400_v55   ;;  %1492 = vperm.xlu0 %4367, %v1415_v57  }
  0xb8   : > { %4055 = vmatmul.msk.bf16.gmra.mxu0 %vm740_vm2, %v4283_v56  ;;  %4063 = vmatmul.msk.bf16.gmra.mxu1 %vm740_vm2, %v4283_v56 }
  0xba   : > { %1495 = vperm.xlu2 %4366, %v1416_v58  }
  0xbf   : > { %1498 = vperm.xlu1 %4365, %v1417_v59   ;;  %1483 = vperm.xlu0 %4367, %v1412_v60  }
  0xc2   : > { %1444 = vperm.xlu2 %4366, %v1399_v61  }
  0xc7   : > { %1489 = vperm.xlu1 %4365, %v1414_v62  }
  0xc8   : > { %4056 = vmatmul.msk.bf16.gmra.mxu0 %vm740_vm2, %v4284_v63  ;;  %4064 = vmatmul.msk.bf16.gmra.mxu1 %vm740_vm2, %v4284_v63  ;;  %v7504_v63 = vmov 0 }
  0xca   : > { %1435 = vperm.xlu2 %4366, %v1396_v0  }
  0xcf   : > { %1438 = vperm.xlu1 %4365, %v1397_v1  }
  0xd2   : > { %1486 = vperm.xlu2 %4366, %v1413_v2  }
  0xd8   : > { %4057 = vmatmul.msk.bf16.gmra.mxu0 %vm740_vm2, %v4285_v3  ;;  %4065 = vmatmul.msk.bf16.gmra.mxu1 %vm740_vm2, %v4285_v3 }
  0xe4   : > { %v1475_v5 = vpop.permute.xlu2 %1474 }
  0xe5   : > { %vm1539_vm3 = vcmp.eq.s32.totalorder %v1475_v5, %v5111_v10  ;;  %v7508_v5 = vmov 0 }
  0xe8   : > { %4058 = vmatmul.msk.bf16.gmra.mxu0 %vm740_vm2, %v4286_v4  ;;  %4066 = vmatmul.msk.bf16.gmra.mxu1 %vm740_vm2, %v4286_v4 }
  0xec   : > { %v1523_v6 = vpop.permute.xlu2 %1522 }
  0xed   : > { %vm1555_vm6 = vcmp.eq.s32.totalorder %v1523_v6, %v5111_v10 }
  0xf4   : > { %v1514_v9 = vpop.permute.xlu2 %1513 }
  0xf5   : > { %vm1552_vm15 = vcmp.eq.s32.totalorder %v1514_v9, %v5111_v10 }
  0xf8   : > { %4059 = vmatmul.msk.bf16.gmra.mxu0 %vm740_vm2, %v4287_v8  ;;  %4067 = vmatmul.msk.bf16.gmra.mxu1 %vm740_vm2, %v4287_v8 }
  0xf9   : > { %v1472_v11 = vpop.permute.xlu1 %1471  ;;  %v1469_v12 = vpop.permute.xlu0 %1468 }
  0xfa   : > { %vm1538_vm4 = vcmp.eq.s32.totalorder %v1472_v11, %v5111_v10  ;;  %vm1537_vm9 = vcmp.eq.s32.totalorder %v1469_v12, %v5111_v10 }
  0xfb   : > { %vm5117_vm5 = vmpackc.low %vm1539_vm3, %vm1538_vm4 }
  0xfc   : > { %v1463_v13 = vpop.permute.xlu2 %1462  ;;  %4134 = vmatpush.bf16.msk.msra.mxu2 %vm5117_vm5, %v7361_v17  ;;  %4166 = vmatpush.bf16.msk.msrb.mxu0 %vm5117_vm5, %v7361_v17 }
  0xfd   : > { %vm1535_vm11 = vcmp.eq.s32.totalorder %v1463_v13, %v5111_v10 }
 0x101   : > { %v1520_v15 = vpop.permute.xlu1 %1519  ;;  %v1460_v16 = vpop.permute.xlu0 %1459 }
 0x102   : > { %vm1554_vm7 = vcmp.eq.s32.totalorder %v1520_v15, %v5111_v10  ;;  %vm1534_vm10 = vcmp.eq.s32.totalorder %v1460_v16, %v5111_v10 }
 0x103   : > { %vm5129_vm8 = vmpackc.low %vm1555_vm6, %vm1554_vm7 }
 0x104   : > { %4150 = vmatpush.bf16.msk.msra.mxu3 %vm5129_vm8, %v7361_v17  ;;  %4182 = vmatpush.bf16.msk.msrb.mxu1 %vm5129_vm8, %v7361_v17  ;;  %v1454_v20 = vpop.permute.xlu2 %1453  ;;  %vm5156_vm14 = vmpackc.low %vm1535_vm11, %vm1534_vm10 }
 0x105   : > { %vm1532_vm10 = vcmp.eq.s32.totalorder %v1454_v20, %v5111_v10 }
 0x108   : > { %4060 = vmatmul.msk.bf16.gmra.mxu0 %vm740_vm2, %v4288_v19  ;;  %4068 = vmatmul.msk.bf16.gmra.mxu1 %vm740_vm2, %v4288_v19 }
 0x109   : > { %v1466_v21 = vpop.permute.xlu1 %1465  ;;  %v1511_v22 = vpop.permute.xlu0 %1510 }
 0x10a   : > { %vm1536_vm12 = vcmp.eq.s32.totalorder %v1466_v21, %v5111_v10  ;;  %vm1551_vm2 = vcmp.eq.s32.totalorder %v1511_v22, %v5111_v10 }
 0x10b   : > { %vm5146_vm13 = vmpackc.low %vm1537_vm9, %vm1536_vm12 }
 0x10c   : > { %4136 = vmatpush.bf16.msk.msra.mxu2 %vm5146_vm13, %v7361_v17  ;;  %4168 = vmatpush.bf16.msk.msrb.mxu0 %vm5146_vm13, %v7361_v17  ;;  %v1505_v25 = vpop.permute.xlu2 %1504 }
 0x10d   : > { %vm1549_vm4 = vcmp.eq.s32.totalorder %v1505_v25, %v5111_v10 }
 0x110   : > { %4138 = vmatpush.bf16.msk.msra.mxu2 %vm5156_vm14, %v7361_v17  ;;  %4170 = vmatpush.bf16.msk.msrb.mxu0 %vm5156_vm14, %v7361_v17 }
 0x111   : > { %v1517_v26 = vpop.permute.xlu1 %1516  ;;  %v1502_v27 = vpop.permute.xlu0 %1501 }
 0x112   : > { %vm1553_vm0 = vcmp.eq.s32.totalorder %v1517_v26, %v5111_v10  ;;  %vm1548_vm3 = vcmp.eq.s32.totalorder %v1502_v27, %v5111_v10 }
 0x113   : > { %vm5168_vm1 = vmpackc.low %vm1553_vm0, %vm1552_vm15 }
 0x114   : > { %4152 = vmatpush.bf16.msk.msra.mxu3 %vm5168_vm1, %v7361_v17  ;;  %4184 = vmatpush.bf16.msk.msrb.mxu1 %vm5168_vm1, %v7361_v17  ;;  %v1496_v34 = vpop.permute.xlu2 %1495  ;;  %vm5198_vm9 = vmpackc.low %vm1549_vm4, %vm1548_vm3 }
 0x115   : > { %v5178_v29 = vpop.f32.mrf.mxu0  ;;  %v5180_v30 = vpop.f32.mrf.mxu1 }
 0x116   : > { %v879_v31 = vmax.f32 %v5178_v29, %v5180_v30 }
 0x118   : > { %880 = vmax.xlane.f32.xlu0 %v879_v31 }
 0x119   : > { %v1508_v32 = vpop.permute.xlu1 %1507  ;;  %v1451_v33 = vpop.permute.xlu0 %1450 }
 0x11a   : > { %vm1550_vm6 = vcmp.eq.s32.totalorder %v1508_v32, %v5111_v10  ;;  %vm1531_vm15 = vcmp.eq.s32.totalorder %v1451_v33, %v5111_v10 }
 0x11b   : > { %vm5188_vm7 = vmpackc.low %vm1551_vm2, %vm1550_vm6 }
 0x11c   : > { %4154 = vmatpush.bf16.msk.msra.mxu3 %vm5188_vm7, %v7361_v17  ;;  %4186 = vmatpush.bf16.msk.msrb.mxu1 %vm5188_vm7, %v7361_v17  ;;  %v1445_v43 = vpop.permute.xlu2 %1444 }
 0x11d   : > { %v5202_v37 = vpop.f32.mrf.mxu0  ;;  %v5204_v38 = vpop.f32.mrf.mxu1  ;;  %vm1529_vm2 = vcmp.eq.s32.totalorder %v1445_v43, %v5111_v10 }
 0x11e   : > { %v882_v39 = vmax.f32 %v5202_v37, %v5204_v38 }
 0x120   : > { %883 = vmax.xlane.f32.xlu0 %v882_v39  ;;  %4156 = vmatpush.bf16.msk.msra.mxu3 %vm5198_vm9, %v7361_v17 }
 0x121   : > { %v1457_v40 = vpop.permute.xlu1 %1456  ;;  %4188 = vmatpush.bf16.msk.msrb.mxu1 %vm5198_vm9, %v7361_v17  ;;  %v1442_v42 = vpop.permute.xlu0 %1441 }
 0x122   : > { %vm1533_vm11 = vcmp.eq.s32.totalorder %v1457_v40, %v5111_v10  ;;  %vm1528_vm0 = vcmp.eq.s32.totalorder %v1442_v42, %v5111_v10 }
 0x123   : > { %vm5216_vm12 = vmpackc.low %vm1533_vm11, %vm1532_vm10  ;;  %vm1546_vm10 = vcmp.eq.s32.totalorder %v1496_v34, %v5111_v10 }
 0x124   : > { %4140 = vmatpush.bf16.msk.msra.mxu2 %vm5216_vm12, %v7361_v17  ;;  %4172 = vmatpush.bf16.msk.msrb.mxu0 %vm5216_vm12, %v7361_v17  ;;  %vm5246_vm6 = vmpackc.low %vm1529_vm2, %vm1528_vm0  ;;  %v1436_v52 = vpop.permute.xlu2 %1435 }
 0x125   : > { %v5226_v44 = vpop.f32.mrf.mxu0  ;;  %v5228_v45 = vpop.f32.mrf.mxu1  ;;  %v7501_v49 = vsel %vm5246_vm6, 4294967295, %v7500_v49 }
 0x126   : > { %v885_v46 = vmax.f32 %v5226_v44, %v5228_v45 }
 0x128   : > { %886 = vmax.xlane.f32.xlu1 %v885_v46 }
 0x129   : > { %v1448_v47 = vpop.permute.xlu1 %1447  ;;  %v1493_v54 = vpop.permute.xlu0 %1492 }
 0x12a   : > { %vm1530_vm3 = vcmp.eq.s32.totalorder %v1448_v47, %v5111_v10  ;;  %vm1545_vm0 = vcmp.eq.s32.totalorder %v1493_v54, %v5111_v10  ;;  %v5376_v54 = vld [vmem:[#allocation2] sm:$0xff] }
 0x12b   : > { %vm5236_vm4 = vmpackc.low %vm1531_vm15, %vm1530_vm3 }
 0x12c   : > { %4142 = vmatpush.bf16.msk.msra.mxu2 %vm5236_vm4, %v7361_v17  ;;  %4174 = vmatpush.bf16.msk.msrb.mxu0 %vm5236_vm4, %v7361_v17  ;;  %v1487_v60 = vpop.permute.xlu2 %1486 }
 0x12d   : > { %v5250_v50 = vpop.f32.mrf.mxu0  ;;  %v5252_v51 = vpop.f32.mrf.mxu1 }
 0x12e   : > { %v888_v53 = vmax.f32 %v5250_v50, %v5252_v51 }
 0x130   : > { %889 = vmax.xlane.f32.xlu1 %v888_v53  ;;  %4144 = vmatpush.bf16.msk.msra.mxu2 %vm5246_vm6, %v7361_v17 }
 0x131   : > { %v1499_v55 = vpop.permute.xlu1 %1498  ;;  %4176 = vmatpush.bf16.msk.msrb.mxu0 %vm5246_vm6, %v7361_v17  ;;  %v1484_v61 = vpop.permute.xlu0 %1483 }
 0x132   : > { %vm1547_vm11 = vcmp.eq.s32.totalorder %v1499_v55, %v5111_v10 }
 0x133   : > { %vm5264_vm15 = vmpackc.low %vm1547_vm11, %vm1546_vm10  ;;  %vm1542_vm10 = vcmp.eq.s32.totalorder %v1484_v61, %v5111_v10  ;;  %vm1543_vm11 = vcmp.eq.s32.totalorder %v1487_v60, %v5111_v10 }
 0x134   : > { %4158 = vmatpush.bf16.msk.msra.mxu3 %vm5264_vm15, %v7361_v17  ;;  %4190 = vmatpush.bf16.msk.msrb.mxu1 %vm5264_vm15, %v7361_v17 }
 0x135   : > { %v5274_v57 = vpop.f32.mrf.mxu0  ;;  %v5276_v58 = vpop.f32.mrf.mxu1 }
 0x136   : > { %v891_v59 = vmax.f32 %v5274_v57, %v5276_v58 }
 0x138   : > { %892 = vmax.xlane.f32.xlu2 %v891_v59 }
 0x139   : > { %v1490_v62 = vpop.permute.xlu1 %1489 }
 0x13a   : > { %vm1544_vm2 = vcmp.eq.s32.totalorder %v1490_v62, %v5111_v10 }
 0x13b   : > { %vm5282_vm3 = vmpackc.low %vm1545_vm0, %vm1544_vm2  ;;  %vm1526_vm2 = vcmp.eq.s32.totalorder %v1436_v52, %v5111_v10 }
 0x13c   : > { %v7505_v63 = vsel %vm5282_vm3, 4294967295, %v7504_v63  ;;  %4160 = vmatpush.bf16.msk.msra.mxu3 %vm5282_vm3, %v7361_v17  ;;  %4192 = vmatpush.bf16.msk.msrb.mxu1 %vm5282_vm3, %v7361_v17  ;;  %vm5300_vm0 = vmpackc.low %vm1543_vm11, %vm1542_vm10 }
 0x13d   : > { %v5294_v0 = vpop.f32.mrf.mxu0  ;;  %v5296_v1 = vpop.f32.mrf.mxu1 }
 0x13e   : > { %v894_v2 = vmax.f32 %v5294_v0, %v5296_v1 }
 0x140   : > { %895 = vmax.xlane.f32.xlu2 %v894_v2  ;;  %4162 = vmatpush.bf16.msk.msra.mxu3 %vm5300_vm0, %v7361_v17 }
 0x141   : > { %4194 = vmatpush.bf16.msk.msrb.mxu1 %vm5300_vm0, %v7361_v17  ;;  %v1439_v4 = vpop.permute.xlu1 %1438 }
 0x142   : > { %vm1527_vm6 = vcmp.eq.s32.totalorder %v1439_v4, %v5111_v10  ;;  %v5391_v4 = vld [vmem:[#allocation2 + $0x8] sm:$0xff] }
 0x143   : > { %vm5312_vm3 = vmpackc.low %vm1527_vm6, %vm1526_vm2  ;;  %vm7394_vm6 = vcmask 7168  }
 0x144   : > { %v7509_v5 = vsel %vm5312_vm3, 4294967295, %v7508_v5  ;;  %4146 = vmatpush.bf16.msk.msra.mxu2 %vm5312_vm3, %v7361_v17  ;;  %4178 = vmatpush.bf16.msk.msrb.mxu0 %vm5312_vm3, %v7361_v17 }
 0x145   : > { %7510 = vst [vmem:[#allocation14_spill] sm:$0xff] %v7509_v5  ;;  %v5322_v6 = vpop.f32.mrf.mxu0  ;;  %v5324_v8 = vpop.f32.mrf.mxu1  ;;  %v1172_v5 = vld [vmem:[%s4955_s0 + $0x28] sm:$0xff] }
 0x146   : > { %v897_v9 = vmax.f32 %v5322_v6, %v5324_v8 }
 0x148   : > { %898 = vmax.xlane.f32.xlu0 %v897_v9 }
 0x14d   : > { %v5328_v11 = vpop.f32.mrf.mxu0  ;;  %v5330_v12 = vpop.f32.mrf.mxu1 }
 0x14e   : > { %7511 = vst [vmem:[#allocation15_spill] sm:$0xff] %v5328_v11  ;;  %v900_v13 = vmax.f32 %v5328_v11, %v5330_v12  ;;  %v1177_v11 = vld [vmem:[%s4955_s0 + $0x50] sm:$0xff] }
 0x14f   : > { %7512 = vst [vmem:[#allocation16_spill] sm:$0xff] %v5330_v12 }
 0x150   : > { %901 = vmax.xlane.f32.xlu1 %v900_v13 }
 0x155   : > { %v5334_v15 = vpop.f32.mrf.mxu0  ;;  %v5336_v16 = vpop.f32.mrf.mxu1 }
 0x156   : > { %7513 = vst [vmem:[#allocation17_spill] sm:$0xff] %v5334_v15  ;;  %v903_v19 = vmax.f32 %v5334_v15, %v5336_v16  ;;  %v1167_v15 = vld [vmem:[%s4955_s0] sm:$0xff] }
 0x157   : > { %7514 = vst [vmem:[#allocation18_spill] sm:$0xff] %v5336_v16 }
 0x158   : > { %904 = vmax.xlane.f32.xlu2 %v903_v19 }
 0x15d   : > { %v5340_v20 = vpop.f32.mrf.mxu0  ;;  %v5342_v21 = vpop.f32.mrf.mxu1 }
 0x15e   : > { %7515 = vst [vmem:[#allocation19_spill] sm:$0xff] %v5340_v20  ;;  %v906_v22 = vmax.f32 %v5340_v20, %v5342_v21 }
 0x15f   : > { %7516 = vst [vmem:[#allocation20_spill] sm:$0xff] %v5342_v21  ;;  %v5526_v21 = vld [vmem:[#allocation2 + $0x70] sm:$0xff] }
 0x160   : > { %907 = vmax.xlane.f32.xlu0 %v906_v22  ;;  %v5401_v22 = vld [vmem:[#allocation2 + $0x10] sm:$0xff]  ;;  %7537 = vst [vmem:[#allocation41_spill] sm:$0xff] %v5526_v21 }
 0x165   : > { %v5346_v25 = vpop.f32.mrf.mxu0  ;;  %v5348_v26 = vpop.f32.mrf.mxu1 }
 0x166   : > { %7517 = vst [vmem:[#allocation21_spill] sm:$0xff] %v5346_v25  ;;  %v909_v27 = vmax.f32 %v5346_v25, %v5348_v26 }
 0x167   : > { %7518 = vst [vmem:[#allocation22_spill] sm:$0xff] %v5348_v26 }
 0x168   : > { %910 = vmax.xlane.f32.xlu1 %v909_v27 }
 0x16d   : > { %v5352_v31 = vpop.f32.mrf.mxu0  ;;  %v5354_v32 = vpop.f32.mrf.mxu1 }
 0x16e   : > { %7519 = vst [vmem:[#allocation23_spill] sm:$0xff] %v5352_v31  ;;  %v912_v33 = vmax.f32 %v5352_v31, %v5354_v32 }
 0x16f   : > { %7520 = vst [vmem:[#allocation24_spill] sm:$0xff] %v5354_v32 }
 0x170   : > { %913 = vmax.xlane.f32.xlu2 %v912_v33 }
 0x175   : > { %v5358_v34 = vpop.f32.mrf.mxu0  ;;  %v5360_v39 = vpop.f32.mrf.mxu1 }
 0x176   : > { %7521 = vst [vmem:[#allocation25_spill] sm:$0xff] %v5358_v34  ;;  %v915_v40 = vmax.f32 %v5358_v34, %v5360_v39 }
 0x177   : > { %7522 = vst [vmem:[#allocation26_spill] sm:$0xff] %v5360_v39 }
 0x178   : > { %916 = vmax.xlane.f32.xlu0 %v915_v40 }
 0x17d   : > { %v5364_v42 = vpop.f32.mrf.mxu0  ;;  %v5366_v43 = vpop.f32.mrf.mxu1 }
 0x17e   : > { %7523 = vst [vmem:[#allocation27_spill] sm:$0xff] %v5364_v42  ;;  %v918_v46 = vmax.f32 %v5364_v42, %v5366_v43 }
 0x17f   : > { %7524 = vst [vmem:[#allocation28_spill] sm:$0xff] %v5366_v43 }
 0x180   : > { %919 = vmax.xlane.f32.xlu1 %v918_v46  ;;  %v1394_v46 = vld [vmem:[%s4965_s30] sm:$0xff] }
 0x185   : > { %v5370_v47 = vpop.f32.mrf.mxu0  ;;  %v5372_v52 = vpop.f32.mrf.mxu1 }
 0x186   : > { %7525 = vst [vmem:[#allocation29_spill] sm:$0xff] %v5370_v47  ;;  %v921_v53 = vmax.f32 %v5370_v47, %v5372_v52 }
 0x187   : > { %7526 = vst [vmem:[#allocation30_spill] sm:$0xff] %v5372_v52 }
 0x188   : > { %922 = vmax.xlane.f32.xlu2 %v921_v53  ;;  %v5412_v53 = vld [vmem:[#allocation2 + $0x18] sm:$0xff] }
 0x18b   : > { %v881_v55 = vpop.xlane.xlu0 %880 }
 0x18c   : > { %v5379_v59 = vmax.f32 %v5376_v54, %v881_v55 }
 0x18d   : > { %v5381_v60 = vpop.f32.mrf.mxu0  ;;  %v5383_v61 = vpop.f32.mrf.mxu1 }
 0x18e   : > { %7527 = vst [vmem:[#allocation31_spill] sm:$0xff] %v5381_v60  ;;  %v924_v2 = vmax.f32 %v5381_v60, %v5383_v61 }
 0x18f   : > { %7528 = vst [vmem:[#allocation32_spill] sm:$0xff] %v5383_v61 }
 0x190   : > { %2348 = vst.msk [vmem:[#allocation2] sm:$0xff] %vm7394_vm6, %v5379_v59  ;;  %925 = vmax.xlane.f32.xlu0 %v924_v2 }
 0x193   : > { %v884_v9 = vpop.xlane.xlu0 %883 }
 0x194   : > { %v5394_v13 = vmax.f32 %v5391_v4, %v884_v9  ;;  %v5435_v9 = vld [vmem:[#allocation2 + $0x28] sm:$0xff] }
 0x196   : > { %2349 = vst.msk [vmem:[#allocation2 + $0x8] sm:$0xff] %vm7394_vm6, %v5394_v13  ;;  %v7550_v35 = vsub.f32 %v5391_v4, %v5394_v13 }
 0x199   : > { %993 = vperm.xlu1 %4365, %v5379_v59  }
 0x19b   : > { %v887_v27 = vpop.xlane.xlu1 %886 }
 0x19c   : > { %v5404_v33 = vmax.f32 %v5401_v22, %v887_v27  ;;  %v1411_v27 = vld [vmem:[%s4965_s30 + $0x88] sm:$0xff] }
 0x19e   : > { %2350 = vst.msk [vmem:[#allocation2 + $0x10] sm:$0xff] %vm7394_vm6, %v5404_v33 }
 0x1a0   : > { %998 = vperm.xlu2 %4366, %v5394_v13  }
 0x1a1   : > { %1429 = vperm.xlu1 %4365, %v1394_v46   ;;  %v1395_v46 = vld [vmem:[%s4965_s30 + $0x8] sm:$0xff] }
 0x1a3   : > { %v890_v55 = vpop.xlane.xlu1 %889 }
 0x1a4   : > { %v5415_v2 = vmax.f32 %v5412_v53, %v890_v55  ;;  %1003 = vperm.xlu0 %4367, %v5404_v33   ;;  %v1410_v55 = vld [vmem:[%s4965_s30 + $0x80] sm:$0xff] }
 0x1a6   : > { %2351 = vst.msk [vmem:[#allocation2 + $0x18] sm:$0xff] %vm7394_vm6, %v5415_v2  ;;  %v7548_v14 = vsub.f32 %v5412_v53, %v5415_v2 }
 0x1a8   : > { %1008 = vperm.xlu2 %4366, %v5415_v2  }
 0x1a9   : > { %1480 = vperm.xlu1 %4365, %v1411_v27  }
 0x1ab   : > { %v893_v19 = vpop.xlane.xlu2 %892 }
 0x1ac   : > { %v5428_v40 = vmax.f32 %v5424_v7, %v893_v19  ;;  %1432 = vperm.xlu0 %4367, %v1395_v46   ;;  %v5446_v46 = vld [vmem:[#allocation2 + $0x30] sm:$0xff]  ;;  %v5456_v19 = vld [vmem:[#allocation2 + $0x38] sm:$0xff] }
 0x1ad   : > { %7529 = vst [vmem:[#allocation33_spill] sm:$0xff] %v5456_v19 }
 0x1ae   : > { %2352 = vst.msk [vmem:[#allocation2 + $0x20] sm:$0xff] %vm7394_vm6, %v5428_v40  ;;  %v7554_v48 = vsub.f32 %v5424_v7, %v5428_v40 }
 0x1b0   : > { %1477 = vperm.xlu2 %4366, %v1410_v55  }
 0x1b3   : > { %v896_v17 = vpop.xlane.xlu2 %895 }
 0x1b4   : > { %v5438_v27 = vmax.f32 %v5435_v9, %v896_v17  ;;  %1013 = vperm.xlu0 %4367, %v5428_v40  }
 0x1b6   : > { %2353 = vst.msk [vmem:[#allocation2 + $0x28] sm:$0xff] %vm7394_vm6, %v5438_v27  ;;  %v7549_v53 = vsub.f32 %v5435_v9, %v5438_v27 }
 0x1b8   : > { %1018 = vperm.xlu2 %4366, %v5438_v27   ;;  %v969_v2 = vmul.f32 1.442695, %v7549_v53 }
 0x1bb   : > { %v899_v62 = vpop.xlane.xlu0 %898 }
 0x1bc   : > { %v5449_v55 = vmax.f32 %v5446_v46, %v899_v62  ;;  %v5466_v62 = vld [vmem:[#allocation2 + $0x40] sm:$0xff] }
 0x1be   : > { %2354 = vst.msk [vmem:[#allocation2 + $0x30] sm:$0xff] %vm7394_vm6, %v5449_v55  ;;  %1023 = vperm.xlu1 %4365, %v5449_v55  }
 0x1c3   : > { %v902_v61 = vpop.xlane.xlu1 %901 }
 0x1c4   : > { %v5459_v60 = vmax.f32 %v5456_v19, %v902_v61  ;;  %v5476_v61 = vld [vmem:[#allocation2 + $0x48] sm:$0xff]  ;;  %v1171_v19 = vld [vmem:[%s4955_s0 + $0x20] sm:$0xff] }
 0x1c6   : > { %7530 = vst [vmem:[#allocation34_spill] sm:$0xff] %v5459_v60  ;;  %1028 = vperm.xlu0 %4367, %v5459_v60  }
 0x1c7   : > { %2355 = vst.msk [vmem:[#allocation2 + $0x38] sm:$0xff] %vm7394_vm6, %v5459_v60 }
 0x1cb   : > { %v905_v17 = vpop.xlane.xlu2 %904 }
 0x1cc   : > { %v5469_v47 = vmax.f32 %v5466_v62, %v905_v17  ;;  %v5486_v17 = vld [vmem:[#allocation2 + $0x50] sm:$0xff] }
 0x1cd   : > { %7531 = vst [vmem:[#allocation35_spill] sm:$0xff] %v5486_v17 }
 0x1ce   : > { %2356 = vst.msk [vmem:[#allocation2 + $0x40] sm:$0xff] %vm7394_vm6, %v5469_v47  ;;  %1033 = vperm.xlu2 %4366, %v5469_v47   ;;  %v7552_v56 = vsub.f32 %v5466_v62, %v5469_v47 }
 0x1d3   : > { %v908_v52 = vpop.xlane.xlu0 %907 }
 0x1d4   : > { %v5479_v42 = vmax.f32 %v5476_v61, %v908_v52  ;;  %v5496_v52 = vld [vmem:[#allocation2 + $0x58] sm:$0xff] }
 0x1d6   : > { %2357 = vst.msk [vmem:[#allocation2 + $0x48] sm:$0xff] %vm7394_vm6, %v5479_v42  ;;  %1038 = vperm.xlu1 %4365, %v5479_v42  }
 0x1db   : > { %v911_v43 = vpop.xlane.xlu1 %910 }
 0x1dc   : > { %v5489_v34 = vmax.f32 %v5486_v17, %v911_v43  ;;  %v5506_v43 = vld [vmem:[#allocation2 + $0x60] sm:$0xff]  ;;  %v1168_v17 = vld [vmem:[%s4955_s0 + $0x8] sm:$0xff] }
 0x1dd   : > { %7533 = vst [vmem:[#allocation37_spill] sm:$0xff] %v5506_v43 }
 0x1de   : > { %7532 = vst [vmem:[#allocation36_spill] sm:$0xff] %v5489_v34  ;;  %1043 = vperm.xlu0 %4367, %v5489_v34  }
 0x1df   : > { %2358 = vst.msk [vmem:[#allocation2 + $0x50] sm:$0xff] %vm7394_vm6, %v5489_v34 }
 0x1e3   : > { %v914_v39 = vpop.xlane.xlu2 %913 }
 0x1e4   : > { %v5499_v31 = vmax.f32 %v5496_v52, %v914_v39  ;;  %v5516_v39 = vld [vmem:[#allocation2 + $0x68] sm:$0xff] }
 0x1e5   : > { %7535 = vst [vmem:[#allocation39_spill] sm:$0xff] %v5516_v39 }
 0x1e6   : > { %2359 = vst.msk [vmem:[#allocation2 + $0x58] sm:$0xff] %vm7394_vm6, %v5499_v31  ;;  %1048 = vperm.xlu2 %4366, %v5499_v31   ;;  %v7557_v7 = vsub.f32 %v5496_v52, %v5499_v31 }
 0x1e8   : > { %v981_v40 = vmul.f32 1.442695, %v7557_v7  ;;  %v7578_v7 = vld [vmem:[#allocation19_spill] sm:$0xff] }
 0x1eb   : > { %v917_v32 = vpop.xlane.xlu0 %916 }
 0x1ec   : > { %v5509_v25 = vmax.f32 %v5506_v43, %v917_v32  ;;  %v5537_v32 = vld [vmem:[#allocation2 + $0x78] sm:$0xff] }
 0x1ed   : > { %7539 = vst [vmem:[#allocation43_spill] sm:$0xff] %v5537_v32 }
 0x1ee   : > { %7534 = vst [vmem:[#allocation38_spill] sm:$0xff] %v5509_v25  ;;  %1053 = vperm.xlu1 %4365, %v5509_v25  }
 0x1ef   : > { %2360 = vst.msk [vmem:[#allocation2 + $0x60] sm:$0xff] %vm7394_vm6, %v5509_v25  ;;  %v1170_v25 = vld [vmem:[%s4955_s0 + $0x18] sm:$0xff] }
 0x1f3   : > { %v920_v26 = vpop.xlane.xlu1 %919 }
 0x1f4   : > { %v5519_v20 = vmax.f32 %v5516_v39, %v920_v26 }
 0x1f6   : > { %7536 = vst [vmem:[#allocation40_spill] sm:$0xff] %v5519_v20  ;;  %1058 = vperm.xlu0 %4367, %v5519_v20  }
 0x1f7   : > { %2361 = vst.msk [vmem:[#allocation2 + $0x68] sm:$0xff] %vm7394_vm6, %v5519_v20 }
 0x1fb   : > { %v923_v16 = vpop.xlane.xlu2 %922 }
 0x1fc   : > { %v5530_v34 = vmax.f32 %v5526_v21, %v923_v16 }
 0x1fe   : > { %7538 = vst [vmem:[#allocation42_spill] sm:$0xff] %v5530_v34  ;;  %1063 = vperm.xlu2 %4366, %v5530_v34   ;;  %1185 = vperm.xlu0 %4367, %v1167_v15  }
 0x1ff   : > { %2362 = vst.msk [vmem:[#allocation2 + $0x70] sm:$0xff] %vm7394_vm6, %v5530_v34 }
 0x203   : > { %v999_v20 = vpop.permute.xlu2 %998  ;;  %v926_v39 = vpop.xlane.xlu0 %925 }
 0x204   : > { %v5542_v16 = vmax.f32 %v5537_v32, %v926_v39  ;;  %v1073_v26 = vsub.f32 %v5202_v37, %v999_v20  ;;  %v1074_v15 = vsub.f32 %v5204_v38, %v999_v20  ;;  %v1173_v39 = vld [vmem:[%s4955_s0 + $0x30] sm:$0xff] }
 0x205   : > { %v1169_v32 = vld [vmem:[%s4955_s0 + $0x10] sm:$0xff] }
 0x206   : > { %7540 = vst [vmem:[#allocation44_spill] sm:$0xff] %v5542_v16  ;;  %1188 = vperm.xlu2 %4366, %v1168_v17   ;;  %1194 = vperm.xlu0 %4367, %v1170_v25   ;;  %v1107_v34 = vmul.f32 1.442695, %v1073_v26  ;;  %v1109_v43 = vmul.f32 1.442695, %v1074_v15  ;;  %v1174_v26 = vld [vmem:[%s4955_s0 + $0x38] sm:$0xff] }
 0x207   : > { %2363 = vst.msk [vmem:[#allocation2 + $0x78] sm:$0xff] %vm7394_vm6, %v5542_v16  ;;  %1068 = vperm.xlu1 %4365, %v5542_v16   ;;  %v1176_v15 = vld [vmem:[%s4955_s0 + $0x48] sm:$0xff] }
 0x208   : > { %4368 = vpow2.f32 %v1107_v34 }
 0x209   : > { %4370 = vpow2.f32 %v1109_v43 }
 0x20b   : > { %v994_v60 = vpop.permute.xlu1 %993  ;;  %v1009_v38 = vpop.permute.xlu2 %1008 }
 0x20c   : > { %v1071_v37 = vsub.f32 %v5178_v29, %v994_v60  ;;  %v1072_v21 = vsub.f32 %v5180_v30, %v994_v60  ;;  %v1078_v43 = vsub.f32 %v5252_v51, %v1009_v38  ;;  %v1175_v51 = vld [vmem:[%s4955_s0 + $0x40] sm:$0xff] }
 0x20e   : > { %v1103_v17 = vmul.f32 1.442695, %v1071_v37  ;;  %v1105_v25 = vmul.f32 1.442695, %v1072_v21  ;;  %1197 = vperm.xlu2 %4366, %v1171_v19   ;;  %1203 = vperm.xlu0 %4367, %v1173_v39   ;;  %v4369_v16 = vpop.eup %4368  ;;  %v1077_v21 = vsub.f32 %v5250_v50, %v1009_v38 }
 0x20f   : > { %1191 = vperm.xlu1 %4365, %v1169_v32   ;;  %v4371_v29 = vpop.eup %4370 }
 0x210   : > { %4372 = vpow2.f32 %v1103_v17  ;;  %v5565_v17 = vpack.c.bf16 %v4371_v29, %v4369_v16  ;;  %v7543_v16 = vmov 1.0|1.0  }
 0x211   : > { %4374 = vpow2.f32 %v1105_v25 }
 0x213   : > { %v1430_v20 = vpop.permute.xlu1 %1429  ;;  %v1478_v39 = vpop.permute.xlu2 %1477 }
 0x214   : > { %vm1540_vm10 = vcmp.eq.s32.totalorder %v1478_v39, %v5111_v10  ;;  %vm1524_vm6 = vcmp.eq.s32.totalorder %v1430_v20, %v5111_v10  ;;  %v1766_v20 = vunpack.c.l.b16 %v5565_v17  ;;  %v7547_v39 = vsub.f32 %v5401_v22, %v5404_v33 }
 0x216   : > { %v4373_v12 = vpop.eup %4372  ;;  %1206 = vperm.xlu2 %4366, %v1174_v26   ;;  %1212 = vperm.xlu0 %4367, %v1176_v15   ;;  %v1004_v30 = vpop.permute.xlu0 %1003  ;;  %v1115_v26 = vmul.f32 1.442695, %v1077_v21 }
 0x217   : > { %v4375_v34 = vpop.eup %4374  ;;  %1200 = vperm.xlu1 %4365, %v1172_v5   ;;  %v1075_v60 = vsub.f32 %v5226_v44, %v1004_v30  ;;  %v1076_v19 = vsub.f32 %v5228_v45, %v1004_v30  ;;  %v1117_v5 = vmul.f32 1.442695, %v1078_v43  ;;  %v1179_v44 = vld [vmem:[%s4955_s0 + $0x60] sm:$0xff] }
 0x218   : > { %v5563_v32 = vpack.c.bf16 %v4375_v34, %v4373_v12  ;;  %v1767_v12 = vunpack.c.h.b16 %v5565_v17  ;;  %v7546_v34 = vsub.f32 %v5376_v54, %v5379_v59  ;;  %v1182_v54 = vld [vmem:[%s4955_s0 + $0x78] sm:$0xff] }
 0x219   : > { %v1111_v37 = vmul.f32 1.442695, %v1075_v60  ;;  %v1113_v25 = vmul.f32 1.442695, %v1076_v19  ;;  %v1180_v19 = vld [vmem:[%s4955_s0 + $0x68] sm:$0xff] }
 0x21a   : > { %v1765_v50 = vunpack.c.h.b16 %v5563_v32  ;;  %v1764_v29 = vunpack.c.l.b16 %v5563_v32  ;;  %v959_v21 = vmul.f32 1.442695, %v7546_v34 }
 0x21b   : > { %v1481_v15 = vpop.permute.xlu1 %1480  ;;  %4376 = vpow2.f32 %v1111_v37  ;;  %v963_v37 = vmul.f32 1.442695, %v7547_v39 }
 0x21c   : > { %vm1541_vm11 = vcmp.eq.s32.totalorder %v1481_v15, %v5111_v10  ;;  %4378 = vpow2.f32 %v1113_v25  ;;  %v1797_v30 = vpack.c.b16 %v1767_v12, %v1765_v50  ;;  %v1796_v18 = vpack.c.b16 %v1766_v20, %v1764_v29  ;;  %v1019_v25 = vpop.permute.xlu2 %1018 }
 0x21d   : > { %vm5572_vm2 = vmpackc.low %vm1541_vm11, %vm1540_vm10  ;;  %4380 = vpow2.f32 %v1115_v26  ;;  %v1178_v26 = vld [vmem:[%s4955_s0 + $0x58] sm:$0xff]  ;;  %v965_v50 = vmul.f32 1.442695, %v7548_v14  ;;  %v1081_v33 = vsub.f32 %v5294_v0, %v1019_v25  ;;  %v961_v12 = vmul.f32 1.442695, %v7550_v35  ;;  %v7564_v35 = vld [vmem:[#allocation37_spill] sm:$0xff] }
 0x21e   : > { %1215 = vperm.xlu2 %4366, %v1177_v11   ;;  %4164 = vmatpush.bf16.msk.msra.mxu3 %vm5572_vm2, %v7543_v16  ;;  %v1433_v38 = vpop.permute.xlu0 %1432  ;;  %4382 = vpow2.f32 %v1117_v5 }
 0x21f   : > { %4196 = vmatpush.bf16.msk.msrb.mxu1 %vm5572_vm2, %v7543_v16  ;;  %1221 = vperm.xlu0 %4367, %v1179_v44   ;;  %vm1525_vm10 = vcmp.eq.s32.totalorder %v1433_v38, %v5111_v10  ;;  %4384 = vpow2.f32 %v959_v21  ;;  %v1181_v38 = vld [vmem:[%s4955_s0 + $0x70] sm:$0xff]  ;;  %v7551_v21 = vsub.f32 %v5446_v46, %v5449_v55  ;;  %v7555_v46 = vsub.f32 %v5476_v61, %v5479_v42 }
 0x220   : > { %1209 = vperm.xlu1 %4365, %v1175_v51   ;;  %vm5587_vm11 = vmpackc.low %vm1525_vm10, %vm1524_vm6  ;;  %4386 = vpow2.f32 %v963_v37  ;;  %v1082_v51 = vsub.f32 %v5296_v1, %v1019_v25  ;;  %v967_v37 = vmul.f32 1.442695, %v7554_v48  ;;  %v7558_v61 = vld [vmem:[#allocation15_spill] sm:$0xff] }
 0x221   : > { %4148 = vmatpush.bf16.msk.msra.mxu2 %vm5587_vm11, %v7543_v16  ;;  %1885 = vmatmul.bf16.vlgmr.msra.gmra.mxu3 %v1797_v30  ;;  %v4377_v60 = vpop.eup %4376  ;;  %4388 = vpow2.f32 %v965_v50  ;;  %v977_v55 = vmul.f32 1.442695, %v7555_v46  ;;  %v7574_v48 = vld [vmem:[#allocation43_spill] sm:$0xff] }
 0x222   : > { %4230 = vmatpush.bf16.msk.msrb.mxu3 %vm5129_vm8, %v7543_v16  ;;  %4180 = vmatpush.bf16.msk.msrb.mxu0 %vm5587_vm11, %v7543_v16  ;;  %v4379_v43 = vpop.eup %4378  ;;  %4390 = vpow2.f32 %v969_v2  ;;  %v1125_v1 = vmul.f32 1.442695, %v1082_v51  ;;  %vm7556_vm8 = vnez %v7501_v49 }
 0x223   : > { %v4381_v59 = vpop.eup %4380  ;;  %v5625_v44 = vpack.c.bf16 %v4379_v43, %v4377_v60 }
 0x224   : > { %1836 = vmatmul.bf16.vlgmr.msra.gmra.mxu2 %v1796_v18  ;;  %v4383_v15 = vpop.eup %4382  ;;  %v971_v18 = vmul.f32 1.442695, %v7551_v21 }
 0x225   : > { %4198 = vmatpush.bf16.msk.msrb.mxu2 %vm5117_vm5, %v7543_v16  ;;  %v5634_v0 = vpack.c.bf16 %v4383_v15, %v4381_v59  ;;  %v1769_v9 = vunpack.c.h.b16 %v5625_v44  ;;  %v4385_v27 = vpop.eup %4384  ;;  %v1768_v30 = vunpack.c.l.b16 %v5625_v44  ;;  %vm7553_vm5 = vnez %v7505_v63 }
 0x226   : > { %4232 = vmatpush.bf16.msk.msrb.mxu3 %vm5168_vm1, %v7543_v16  ;;  %1224 = vperm.xlu2 %4366, %v1180_v19   ;;  %v1014_v22 = vpop.permute.xlu0 %1013  ;;  %v4387_v29 = vpop.eup %4386  ;;  %v975_v19 = vmul.f32 1.442695, %v7552_v56 }
 0x227   : > { %1230 = vperm.xlu0 %4367, %v1182_v54   ;;  %v1079_v28 = vsub.f32 %v5274_v57, %v1014_v22  ;;  %v1080_v5 = vsub.f32 %v5276_v58, %v1014_v22  ;;  %v1123_v58 = vmul.f32 1.442695, %v1081_v33  ;;  %v1771_v24 = vunpack.c.h.b16 %v5634_v0  ;;  %v4389_v13 = vpop.eup %4388  ;;  %v7561_v22 = vld [vmem:[#allocation33_spill] sm:$0xff]  ;;  %v7562_v33 = vld [vmem:[#allocation34_spill] sm:$0xff] }
 0x228   : > { %1218 = vperm.xlu1 %4365, %v1178_v26   ;;  %v1770_v4 = vunpack.c.l.b16 %v5634_v0  ;;  %v4391_v20 = vpop.eup %4390 }
 0x229   : > { %4200 = vmatpush.bf16.msk.msrb.mxu2 %vm5146_vm13, %v7543_v16  ;;  %v1119_v23 = vmul.f32 1.442695, %v1079_v28  ;;  %v1121_v57 = vmul.f32 1.442695, %v1080_v5  ;;  %v1799_v36 = vpack.c.b16 %v1771_v24, %v1769_v9  ;;  %v7563_v28 = vsub.f32 %v7561_v22, %v7562_v33 }
 0x22a   : > { %4234 = vmatpush.bf16.msk.msrb.mxu3 %vm5188_vm7, %v7543_v16  ;;  %v1798_v41 = vpack.c.b16 %v1770_v4, %v1768_v30  ;;  %v7568_v30 = vld [vmem:[#allocation42_spill] sm:$0xff] }
 0x22b   : > { %4392 = vpow2.f32 %v1119_v23  ;;  %v973_v5 = vmul.f32 1.442695, %v7563_v28 }
 0x22c   : > { %4394 = vpow2.f32 %v1121_v57 }
 0x22d   : > { %4202 = vmatpush.bf16.msk.msrb.mxu2 %vm5156_vm14, %v7543_v16  ;;  %4396 = vpow2.f32 %v1123_v58 }
 0x22e   : > { %4236 = vmatpush.bf16.msk.msrb.mxu3 %vm5198_vm9, %v7543_v16  ;;  %1654 = vperm.xlu2 %4366, %v4385_v27   ;;  %4398 = vpow2.f32 %v1125_v1 }
 0x22f   : > { %1664 = vperm.xlu0 %4367, %v4387_v29   ;;  %4400 = vpow2.f32 %v961_v12  ;;  %v7565_v12 = vld [vmem:[#allocation38_spill] sm:$0xff]  ;;  %v7567_v29 = vld [vmem:[#allocation41_spill] sm:$0xff] }
 0x230   : > { %1227 = vperm.xlu1 %4365, %v1181_v38   ;;  %v1024_v43 = vpop.permute.xlu1 %1023  ;;  %4402 = vpow2.f32 %v971_v18  ;;  %v7566_v11 = vsub.f32 %v7564_v35, %v7565_v12 }
 0x231   : > { %4204 = vmatpush.bf16.msk.msrb.mxu2 %vm5216_vm12, %v7543_v16  ;;  %1890 = vmatmul.bf16.gmra.mxu3 %v1799_v36  ;;  %v4393_v34 = vpop.eup %4392  ;;  %v1083_v63 = vsub.f32 %v5322_v6, %v1024_v43  ;;  %4404 = vpow2.f32 %v975_v19  ;;  %v1084_v42 = vsub.f32 %v5324_v8, %v1024_v43  ;;  %v7559_v6 = vld [vmem:[#allocation16_spill] sm:$0xff]  ;;  %v7569_v36 = vsub.f32 %v7567_v29, %v7568_v30  ;;  %v7573_v19 = vld [vmem:[#allocation17_spill] sm:$0xff]  ;;  %v7585_v29 = vld [vmem:[#allocation23_spill] sm:$0xff] }
 0x232   : > { %4238 = vmatpush.bf16.msk.msrb.mxu3 %vm5264_vm15, %v7543_v16  ;;  %v4395_v60 = vpop.eup %4394  ;;  %4406 = vpow2.f32 %v967_v37  ;;  %v983_v38 = vmul.f32 1.442695, %v7566_v11  ;;  %v7575_v37 = vld [vmem:[#allocation44_spill] sm:$0xff]  ;;  %v7584_v11 = vld [vmem:[#allocation22_spill] sm:$0xff] }
 0x233   : > { %v4397_v39 = vpop.eup %4396  ;;  %v5678_v62 = vpack.c.bf16 %v4395_v60, %v4393_v34  ;;  %4408 = vpow2.f32 %v977_v55  ;;  %v1127_v31 = vmul.f32 1.442695, %v1083_v63  ;;  %v1129_v3 = vmul.f32 1.442695, %v1084_v42  ;;  %v7571_v34 = vld [vmem:[#allocation36_spill] sm:$0xff]  ;;  %v7577_v55 = vld [vmem:[#allocation18_spill] sm:$0xff] }
 0x234   : > { %1841 = vmatmul.bf16.gmra.mxu2 %v1798_v41  ;;  %v4399_v25 = vpop.eup %4398  ;;  %4410 = vpow2.f32 %v981_v40  ;;  %v987_v4 = vmul.f32 1.442695, %v7569_v36  ;;  %v7570_v41 = vld [vmem:[#allocation35_spill] sm:$0xff]  ;;  %v7579_v42 = vld [vmem:[#allocation20_spill] sm:$0xff] }
 0x235   : > { %4206 = vmatpush.bf16.msk.msrb.mxu2 %vm5236_vm4, %v7543_v16  ;;  %v4401_v47 = vpop.eup %4400  ;;  %v5689_v26 = vpack.c.bf16 %v4399_v25, %v4397_v39  ;;  %v1773_v14 = vunpack.c.h.b16 %v5678_v62  ;;  %v1772_v51 = vunpack.c.l.b16 %v5678_v62  ;;  %v7572_v21 = vsub.f32 %v7570_v41, %v7571_v34 }
 0x236   : > { %4240 = vmatpush.bf16.msk.msrb.mxu3 %vm7553_vm5, %v7543_v16  ;;  %1669 = vperm.xlu2 %4366, %v4389_v13   ;;  %v4403_v50 = vpop.eup %4402  ;;  %v1034_v13 = vpop.permute.xlu2 %1033  ;;  %v7576_v25 = vsub.f32 %v7574_v48, %v7575_v37 }
 0x237   : > { %1679 = vperm.xlu0 %4367, %v4391_v20   ;;  %v1775_v53 = vunpack.c.h.b16 %v5689_v26  ;;  %v4405_v2 = vpop.eup %4404  ;;  %v1774_v58 = vunpack.c.l.b16 %v5689_v26  ;;  %v979_v18 = vmul.f32 1.442695, %v7572_v21  ;;  %v1087_v43 = vsub.f32 %v7573_v19, %v1034_v13 }
 0x238   : > { %1659 = vperm.xlu1 %4365, %v4401_v47   ;;  %v1029_v49 = vpop.permute.xlu0 %1028  ;;  %v4407_v23 = vpop.eup %4406  ;;  %v989_v46 = vmul.f32 1.442695, %v7576_v25  ;;  %v1088_v47 = vsub.f32 %v7577_v55, %v1034_v13 }
 0x239   : > { %4208 = vmatpush.bf16.msk.msrb.mxu2 %vm7556_vm8, %v7543_v16  ;;  %v1085_v54 = vsub.f32 %v7558_v61, %v1029_v49  ;;  %v1086_v59 = vsub.f32 %v7559_v6, %v1029_v49  ;;  %v1801_v45 = vpack.c.b16 %v1775_v53, %v1773_v14  ;;  %v4409_v57 = vpop.eup %4408  ;;  %v1800_v27 = vpack.c.b16 %v1774_v58, %v1772_v51  ;;  %v7581_v14 = vld [vmem:[#allocation40_spill] sm:$0xff] }
 0x23a   : > { %4242 = vmatpush.bf16.msk.msrb.mxu3 %vm5300_vm0, %v7543_v16  ;;  %v4411_v9 = vpop.eup %4410 }
 0x23b   : > { %v1131_v8 = vmul.f32 1.442695, %v1085_v54  ;;  %v1133_v52 = vmul.f32 1.442695, %v1086_v59  ;;  %v1135_v54 = vmul.f32 1.442695, %v1087_v43 }
 0x23d   : > { %4210 = vmatpush.bf16.msk.msrb.mxu2 %vm5312_vm3, %v7543_v16  ;;  %4412 = vpow2.f32 %v1131_v8 }
 0x23e   : > { %4244 = vmatpush.bf16.msk.msrb.mxu3 %vm5572_vm2, %v7543_v16  ;;  %4414 = vpow2.f32 %v1133_v52  ;;  %1684 = vperm.xlu2 %4366, %v4403_v50   ;;  %v7580_v52 = vld [vmem:[#allocation39_spill] sm:$0xff] }
 0x23f   : > { %4416 = vpow2.f32 %v1127_v31  ;;  %1694 = vperm.xlu0 %4367, %v4405_v2   ;;  %v1137_v31 = vmul.f32 1.442695, %v1088_v47 }
 0x240   : > { %4418 = vpow2.f32 %v1129_v3  ;;  %1674 = vperm.xlu1 %4365, %v4407_v23   ;;  %v7582_v3 = vsub.f32 %v7580_v52, %v7581_v14  ;;  %v1049_v2 = vpop.permute.xlu2 %1048  ;;  %v7589_v14 = vld [vmem:[#allocation27_spill] sm:$0xff] }
 0x241   : > { %4212 = vmatpush.bf16.msk.msrb.mxu2 %vm5587_vm11, %v7543_v16  ;;  %4420 = vpow2.f32 %v973_v5  ;;  %1895 = vmatmul.bf16.gmra.mxu3 %v1801_v45  ;;  %v1093_v30 = vsub.f32 %v7585_v29, %v1049_v2 }
 0x242   : > { %4422 = vpow2.f32 %v983_v38  ;;  %v985_v50 = vmul.f32 1.442695, %v7582_v3 }
 0x243   : > { %v4413_v1 = vpop.eup %4412  ;;  %4424 = vpow2.f32 %v987_v4  ;;  %v7586_v4 = vld [vmem:[#allocation24_spill] sm:$0xff] }
 0x244   : > { %v4415_v24 = vpop.eup %4414  ;;  %1846 = vmatmul.bf16.gmra.mxu2 %v1800_v27  ;;  %4426 = vpow2.f32 %v979_v18  ;;  %v1094_v13 = vsub.f32 %v7586_v4, %v1049_v2  ;;  %v1147_v18 = vmul.f32 1.442695, %v1093_v30 }
 0x245   : > { %v4417_v20 = vpop.eup %4416  ;;  %v5717_v39 = vpack.c.bf16 %v4415_v24, %v4413_v1  ;;  %4428 = vpow2.f32 %v989_v46  ;;  %v7583_v1 = vld [vmem:[#allocation21_spill] sm:$0xff] }
 0x246   : > { %v4419_v60 = vpop.eup %4418  ;;  %1699 = vperm.xlu2 %4366, %v4409_v57  }
 0x247   : > { %v4421_v56 = vpop.eup %4420  ;;  %1709 = vperm.xlu0 %4367, %v4411_v9   ;;  %v5725_v61 = vpack.c.bf16 %v4419_v60, %v4417_v20  ;;  %v1779_v15 = vunpack.c.h.b16 %v5717_v39  ;;  %v1778_v28 = vunpack.c.l.b16 %v5717_v39 }
 0x248   : > { %1689 = vperm.xlu1 %4365, %v4421_v56   ;;  %v1039_v63 = vpop.permute.xlu1 %1038  ;;  %v4423_v8 = vpop.eup %4422  ;;  %v1149_v56 = vmul.f32 1.442695, %v1094_v13 }
 0x249   : > { %v1089_v40 = vsub.f32 %v7578_v7, %v1039_v63  ;;  %v1090_v49 = vsub.f32 %v7579_v42, %v1039_v63  ;;  %v1777_v22 = vunpack.c.h.b16 %v5725_v61  ;;  %v4425_v33 = vpop.eup %4424  ;;  %v1776_v51 = vunpack.c.l.b16 %v5725_v61 }
 0x24a   : > { %v4427_v5 = vpop.eup %4426 }
 0x24b   : > { %v1139_v6 = vmul.f32 1.442695, %v1089_v40  ;;  %v1141_v59 = vmul.f32 1.442695, %v1090_v49  ;;  %v1803_v53 = vpack.c.b16 %v1779_v15, %v1777_v22  ;;  %v4429_v23 = vpop.eup %4428  ;;  %v1802_v57 = vpack.c.b16 %v1778_v28, %v1776_v51  ;;  %v1183_v40 = vld [vmem:[%s553_s12] sm:$0x3] }
 0x24c   : > { %v7587_v49 = vld [vmem:[#allocation25_spill] sm:$0xff] }
 0x24d   : > { %4430 = vpow2.f32 %v1139_v6 }
 0x24e   : > { %4432 = vpow2.f32 %v1141_v59  ;;  %1714 = vperm.xlu2 %4366, %v4423_v8   ;;  %v7588_v59 = vld [vmem:[#allocation26_spill] sm:$0xff]  ;;  %v5761_v8 = vperm.slane %v1183_v40, 1 }
 0x24f   : > { %4434 = vpow2.f32 %v1135_v54  ;;  %1724 = vperm.xlu0 %4367, %v4425_v33  }
 0x250   : > { %4436 = vpow2.f32 %v1137_v31  ;;  %1704 = vperm.xlu1 %4365, %v4427_v5   ;;  %v1044_v45 = vpop.permute.xlu0 %1043  ;;  %v5759_v31 = vperm.slane %v1183_v40, 0 }
 0x251   : > { %4438 = vpow2.f32 %v985_v50  ;;  %1900 = vmatmul.bf16.gmra.mxu3 %v1803_v53  ;;  %v1091_v35 = vsub.f32 %v7583_v1, %v1044_v45  ;;  %v1092_v38 = vsub.f32 %v7584_v11, %v1044_v45  ;;  %v7590_v50 = vld [vmem:[#allocation28_spill] sm:$0xff] }
 0x253   : > { %v4431_v58 = vpop.eup %4430  ;;  %v1143_v41 = vmul.f32 1.442695, %v1091_v35  ;;  %v1145_v21 = vmul.f32 1.442695, %v1092_v38  ;;  %v7591_v38 = vld [vmem:[#allocation29_spill] sm:$0xff] }
 0x254   : > { %v4433_v9 = vpop.eup %4432  ;;  %1851 = vmatmul.bf16.gmra.mxu2 %v1802_v57 }
 0x255   : > { %v4435_v27 = vpop.eup %4434  ;;  %v5737_v36 = vpack.c.bf16 %v4433_v9, %v4431_v58  ;;  %4440 = vpow2.f32 %v1143_v41 }
 0x256   : > { %v4437_v12 = vpop.eup %4436  ;;  %1729 = vperm.xlu2 %4366, %v4429_v23   ;;  %4442 = vpow2.f32 %v1145_v21 }
 0x257   : > { %v4439_v24 = vpop.eup %4438  ;;  %v5742_v34 = vpack.c.bf16 %v4437_v12, %v4435_v27  ;;  %v1783_v60 = vunpack.c.h.b16 %v5737_v36  ;;  %v1782_v43 = vunpack.c.l.b16 %v5737_v36  ;;  %4444 = vpow2.f32 %v1147_v18 }
 0x258   : > { %1719 = vperm.xlu1 %4365, %v4439_v24   ;;  %v5740_v20 = vpop.permute.xlu2 %1063  ;;  %4446 = vpow2.f32 %v1149_v56 }
 0x259   : > { %v1781_v19 = vunpack.c.h.b16 %v5742_v34  ;;  %v1780_v37 = vunpack.c.l.b16 %v5742_v34  ;;  %v1099_v24 = vsub.f32 %v7591_v38, %v5740_v20 }
 0x25b   : > { %v1805_v48 = vpack.c.b16 %v1783_v60, %v1781_v19  ;;  %v1804_v46 = vpack.c.b16 %v1782_v43, %v1780_v37  ;;  %v4441_v55 = vpop.eup %4440  ;;  %v7592_v60 = vld [vmem:[#allocation30_spill] sm:$0xff] }
 0x25c   : > { %v4443_v47 = vpop.eup %4442  ;;  %v1100_v56 = vsub.f32 %v7592_v60, %v5740_v20 }
 0x25d   : > { %v4445_v7 = vpop.eup %4444  ;;  %v5756_v6 = vpack.c.bf16 %v4443_v47, %v4441_v55  ;;  %v7593_v47 = vld [vmem:[#allocation31_spill] sm:$0xff] }
 0x25e   : > { %v4447_v42 = vpop.eup %4446 }
 0x25f   : > { %v5765_v33 = vpack.c.bf16 %v4447_v42, %v4445_v7  ;;  %v1785_v51 = vunpack.c.h.b16 %v5756_v6  ;;  %v1784_v57 = vunpack.c.l.b16 %v5756_v6  ;;  %v7594_v7 = vld [vmem:[#allocation32_spill] sm:$0xff]  ;;  %v1161_v42 = vmul.f32 1.442695, %v1100_v56 }
 0x260   : > { %v5748_v25 = vpop.permute.xlu2 %1188  ;;  %v1054_v63 = vpop.permute.xlu1 %1053 }
 0x261   : > { %1905 = vmatmul.bf16.gmra.mxu3 %v1805_v48  ;;  %v1095_v54 = vsub.f32 %v7587_v49, %v1054_v63  ;;  %v1096_v15 = vsub.f32 %v7588_v59, %v1054_v63  ;;  %vm1236_vm13 = vcmp.ne.s32.totalorder %v5748_v25, %v5759_v31  ;;  %vm1237_vm14 = vcmp.ne.s32.totalorder %v5748_v25, %v5761_v8  ;;  %v1636_v25 = vld [vmem:[#allocation3] sm:$0xff] }
 0x262   : > { %v1787_v45 = vunpack.c.h.b16 %v5765_v33  ;;  %vm1283_vm1 = vmpackc.low %vm1237_vm14, %vm1236_vm13  ;;  %v1786_v27 = vunpack.c.l.b16 %v5765_v33 }
 0x263   : > { %v1151_v28 = vmul.f32 1.442695, %v1095_v54  ;;  %v1153_v23 = vmul.f32 1.442695, %v1096_v15  ;;  %v1299_v1 = vsel %vm1283_vm1, %v5565_v17, 0 }
 0x264   : > { %1856 = vmatmul.bf16.gmra.mxu2 %v1804_v46  ;;  %v1807_v58 = vpack.c.b16 %v1787_v45, %v1785_v51  ;;  %v1806_v35 = vpack.c.b16 %v1786_v27, %v1784_v57  ;;  %v2009_v4 = vunpack.c.l.b16 %v1299_v1  ;;  %v2010_v13 = vunpack.c.h.b16 %v1299_v1 }
 0x265   : > { %v1159_v46 = vmul.f32 1.442695, %v1099_v24 }
 0x268   : > { %v1059_v52 = vpop.permute.xlu0 %1058  ;;  %v5767_v5 = vpop.permute.xlu2 %1197 }
 0x269   : > { %v1097_v3 = vsub.f32 %v7589_v14, %v1059_v52  ;;  %v1098_v22 = vsub.f32 %v7590_v50, %v1059_v52  ;;  %vm7401_vm5 = vcmp.ne.s32.totalorder %v5767_v5, %v5759_v31  ;;  %vm1243_vm8 = vcmp.ne.s32.totalorder %v5767_v5, %v5761_v8 }
 0x26b   : > { %v1155_v53 = vmul.f32 1.442695, %v1097_v3  ;;  %v1157_v2 = vmul.f32 1.442695, %v1098_v22 }
 0x26d   : > { %4448 = vpow2.f32 %v1155_v53 }
 0x26e   : > { %4450 = vpow2.f32 %v1157_v2 }
 0x26f   : > { %4452 = vpow2.f32 %v1151_v28 }
 0x270   : > { %4454 = vpow2.f32 %v1153_v23  ;;  %v5782_v9 = vpop.permute.xlu0 %1185  ;;  %v5799_v17 = vpop.permute.xlu2 %1206 }
 0x271   : > { %vm1234_vm7 = vcmp.ne.s32.totalorder %v5782_v9, %v5759_v31  ;;  %vm1235_vm9 = vcmp.ne.s32.totalorder %v5782_v9, %v5761_v8  ;;  %1910 = vmatmul.bf16.gmra.mxu3 %v1807_v58  ;;  %4456 = vpow2.f32 %v1159_v46 }
 0x272   : > { %vm1282_vm12 = vmpackc.low %vm1235_vm9, %vm1234_vm7 }
 0x273   : > { %v4449_v12 = vpop.eup %4448  ;;  %v1298_v29 = vsel %vm1282_vm12, %v5563_v32, 0 }
 0x274   : > { %v4451_v11 = vpop.eup %4450  ;;  %1861 = vmatmul.bf16.gmra.mxu2 %v1806_v35  ;;  %v2007_v41 = vunpack.c.l.b16 %v1298_v29  ;;  %v2008_v21 = vunpack.c.h.b16 %v1298_v29 }
 0x275   : > { %v4453_v30 = vpop.eup %4452  ;;  %v5803_v48 = vpack.c.bf16 %v4451_v11, %v4449_v12 }
 0x276   : > { %v4455_v18 = vpop.eup %4454  ;;  %v2039_v19 = vpack.c.b16 %v2009_v4, %v2007_v41  ;;  %v2040_v43 = vpack.c.b16 %v2010_v13, %v2008_v21 }
 0x277   : > { %v5807_v55 = vpack.c.bf16 %v4455_v18, %v4453_v30  ;;  %v1791_v49 = vunpack.c.h.b16 %v5803_v48  ;;  %v1790_v15 = vunpack.c.l.b16 %v5803_v48  ;;  %v4457_v2 = vpop.eup %4456 }
 0x278   : > { %v5805_v37 = vpop.permute.xlu0 %1194  ;;  %2079 = vmatmul.bf16.vlgmr.msrb.gmra.mxu0 %v2039_v19  ;;  %2128 = vmatmul.bf16.vlgmr.msrb.gmra.mxu1 %v2040_v43  ;;  %v5818_v52 = vpop.permute.xlu2 %1215 }
 0x279   : > { %v1069_v32 = vpop.permute.xlu1 %1068  ;;  %vm7395_vm4 = vcmp.ne.s32.totalorder %v5805_v37, %v5759_v31  ;;  %vm1241_vm15 = vcmp.ne.s32.totalorder %v5805_v37, %v5761_v8  ;;  %v1789_v59 = vunpack.c.h.b16 %v5807_v55  ;;  %v1788_v50 = vunpack.c.l.b16 %v5807_v55 }
 0x27a   : > { %v1101_v63 = vsub.f32 %v7593_v47, %v1069_v32  ;;  %v1102_v40 = vsub.f32 %v7594_v7, %v1069_v32  ;;  %vm1285_vm3 = vmpackc.low %vm1241_vm15, %vm7395_vm4 }
 0x27b   : > { %v1809_v14 = vpack.c.b16 %v1791_v49, %v1789_v59  ;;  %v1301_v28 = vsel %vm1285_vm3, %v5634_v0, 0  ;;  %v1808_v53 = vpack.c.b16 %v1790_v15, %v1788_v50 }
 0x27c   : > { %v1163_v20 = vmul.f32 1.442695, %v1101_v63  ;;  %v1165_v54 = vmul.f32 1.442695, %v1102_v40  ;;  %v2013_v57 = vunpack.c.l.b16 %v1301_v28  ;;  %v2014_v27 = vunpack.c.h.b16 %v1301_v28 }
 0x27e   : > { %4458 = vpow2.f32 %v1163_v20 }
 0x27f   : > { %4460 = vpow2.f32 %v1165_v54 }
 0x280   : > { %4462 = vpow2.f32 %v1161_v42  ;;  %v5826_v3 = vpop.permute.xlu0 %1203  ;;  %v5847_v24 = vpop.permute.xlu2 %1224 }
 0x281   : > { %v5829_v22 = vpop.permute.xlu1 %1191  ;;  %1915 = vmatmul.bf16.gmra.mxu3 %v1809_v14  ;;  %vm7397_vm1 = vcmp.ne.s32.totalorder %v5847_v24, %v5759_v31  ;;  %vm7399_vm12 = vcmp.ne.s32.totalorder %v5847_v24, %v5761_v8 }
 0x282   : > { %vm1238_vm0 = vcmp.ne.s32.totalorder %v5829_v22, %v5759_v31  ;;  %vm1239_vm6 = vcmp.ne.s32.totalorder %v5829_v22, %v5761_v8  ;;  %vm1295_vm4 = vmpackc.low %vm7399_vm12, %vm7397_vm1 }
 0x283   : > { %vm1284_vm2 = vmpackc.low %vm1239_vm6, %vm1238_vm0  ;;  %v1311_v19 = vsel %vm1295_vm4, %v5803_v48, 0  ;;  %vm7403_vm4 = vcmp.ne.s32.totalorder %v5826_v3, %v5759_v31 }
 0x284   : > { %v4459_v51 = vpop.eup %4458  ;;  %v1300_v23 = vsel %vm1284_vm2, %v5625_v44, 0  ;;  %1866 = vmatmul.bf16.gmra.mxu2 %v1808_v53  ;;  %vm1286_vm2 = vmpackc.low %vm1243_vm8, %vm7401_vm5  ;;  %v2033_v63 = vunpack.c.l.b16 %v1311_v19  ;;  %v2034_v7 = vunpack.c.h.b16 %v1311_v19 }
 0x285   : > { %v4461_v0 = vpop.eup %4460  ;;  %v2011_v45 = vunpack.c.l.b16 %v1300_v23  ;;  %v2012_v58 = vunpack.c.h.b16 %v1300_v23  ;;  %v1302_v60 = vsel %vm1286_vm2, %v5678_v62, 0  ;;  %vm7404_vm2 = vcmp.ne.s32.totalorder %v5826_v3, %v5761_v8 }
 0x286   : > { %v4463_v1 = vpop.eup %4462  ;;  %v5843_v11 = vpack.c.bf16 %v4461_v0, %v4459_v51  ;;  %v2015_v32 = vunpack.c.l.b16 %v1302_v60  ;;  %v2016_v47 = vunpack.c.h.b16 %v1302_v60  ;;  %vm1288_vm12 = vmpackc.low %vm7404_vm2, %vm7403_vm4 }
 0x287   : > { %v2041_v35 = vpack.c.b16 %v2013_v57, %v2011_v45  ;;  %v2042_v12 = vpack.c.b16 %v2014_v27, %v2012_v58  ;;  %v5851_v44 = vpack.c.bf16 %v4463_v1, %v4457_v2  ;;  %vm4245_vm4 = vmpackc.low %vm1237_vm14, %vm1235_vm9  ;;  %v1304_v14 = vsel %vm1288_vm12, %v5725_v61, 0 }
 0x288   : > { %v5845_v38 = vpop.permute.xlu0 %1212  ;;  %v1795_v30 = vunpack.c.h.b16 %v5843_v11  ;;  %v1794_v13 = vunpack.c.l.b16 %v5843_v11  ;;  %v2019_v53 = vunpack.c.l.b16 %v1304_v14  ;;  %vm4213_vm14 = vmpackc.low %vm1236_vm13, %vm1234_vm7  ;;  %v2020_v2 = vunpack.c.h.b16 %v1304_v14  ;;  %v5972_v9 = vpop.permute.xlu2 %1654 }
 0x289   : > { %v5849_v29 = vpop.permute.xlu1 %1200  ;;  %2084 = vmatmul.bf16.gmra.mxu0 %v2041_v35  ;;  %2133 = vmatmul.bf16.gmra.mxu1 %v2042_v12  ;;  %v1793_v4 = vunpack.c.h.b16 %v5851_v44  ;;  %v1792_v18 = vunpack.c.l.b16 %v5851_v44  ;;  %vm1942_vm13 = vcmask 64512  }
 0x28a   : > { %vm7396_vm10 = vcmp.ne.s32.totalorder %v5849_v29, %v5759_v31  ;;  %vm7402_vm11 = vcmp.ne.s32.totalorder %v5849_v29, %v5761_v8 }
 0x28b   : > { %vm1287_vm3 = vmpackc.low %vm7402_vm11, %vm7396_vm10  ;;  %v1811_v41 = vpack.c.b16 %v1795_v30, %v1793_v4  ;;  %v1810_v46 = vpack.c.b16 %v1794_v13, %v1792_v18 }
 0x28c   : > { %v1303_v21 = vsel %vm1287_vm3, %v5689_v26, 0 }
 0x28d   : > { %v2017_v62 = vunpack.c.l.b16 %v1303_v21  ;;  %v2018_v26 = vunpack.c.h.b16 %v1303_v21  ;;  %v1637_v21 = vld [vmem:[#allocation3 + $0x8] sm:$0xff] }
 0x28f   : > { %v2043_v49 = vpack.c.b16 %v2017_v62, %v2015_v32  ;;  %v2044_v20 = vpack.c.b16 %v2018_v26, %v2016_v47 }
 0x291   : > { %v5889_v56 = vpop.permute.xlu0 %1221  ;;  %1920 = vmatmul.bf16.gmra.mxu3 %v1811_v41 }
 0x292   : > { %v5892_v43 = vpop.permute.xlu1 %1209  ;;  %vm7398_vm10 = vcmp.ne.s32.totalorder %v5889_v56, %v5759_v31  ;;  %vm7400_vm1 = vcmp.ne.s32.totalorder %v5889_v56, %v5761_v8 }
 0x293   : > { %vm1294_vm3 = vmpackc.low %vm7400_vm1, %vm7398_vm10  ;;  %vm1249_vm10 = vcmp.ne.s32.totalorder %v5799_v17, %v5761_v8  ;;  %vm1250_vm7 = vcmp.ne.s32.totalorder %v5892_v43, %v5759_v31 }
 0x294   : > { %v1310_v48 = vsel %vm1294_vm3, %v5807_v55, 0  ;;  %1871 = vmatmul.bf16.gmra.mxu2 %v1810_v46  ;;  %vm1248_vm3 = vcmp.ne.s32.totalorder %v5799_v17, %v5759_v31 }
 0x295   : > { %v2031_v40 = vunpack.c.l.b16 %v1310_v48  ;;  %v2032_v42 = vunpack.c.h.b16 %v1310_v48  ;;  %vm1289_vm11 = vmpackc.low %vm1249_vm10, %vm1248_vm3 }
 0x296   : > { %v1305_v50 = vsel %vm1289_vm11, %v5717_v39, 0 }
 0x297   : > { %v5905_v54 = vpack.c.b16 %v2033_v63, %v2031_v40  ;;  %v5907_v59 = vpack.c.b16 %v2034_v7, %v2032_v42  ;;  %v2021_v23 = vunpack.c.l.b16 %v1305_v50  ;;  %v2022_v0 = vunpack.c.h.b16 %v1305_v50  ;;  %v1638_v40 = vld [vmem:[#allocation3 + $0x10] sm:$0xff] }
 0x299   : > { %2089 = vmatmul.bf16.gmra.mxu0 %v2043_v49  ;;  %2138 = vmatmul.bf16.gmra.mxu1 %v2044_v20  ;;  %v5915_v15 = vpop.permute.xlu0 %1230  ;;  %v2045_v35 = vpack.c.b16 %v2021_v23, %v2019_v53  ;;  %v2046_v12 = vpack.c.b16 %v2022_v0, %v2020_v2  ;;  %v1639_v53 = vld [vmem:[#allocation3 + $0x18] sm:$0xff] }
 0x29a   : > { %v5913_v55 = vpop.permute.xlu1 %1218  ;;  %vm7405_vm1 = vcmp.ne.s32.totalorder %v5915_v15, %v5759_v31  ;;  %vm7407_vm5 = vcmp.ne.s32.totalorder %v5915_v15, %v5761_v8 }
 0x29b   : > { %vm1297_vm2 = vmpackc.low %vm7407_vm5, %vm7405_vm1 }
 0x29c   : > { %v1313_v61 = vsel %vm1297_vm2, %v5843_v11, 0  ;;  %v1732_v11 = vmul.f32 %v5972_v9, %v1636_v25  ;;  %vm1252_vm2 = vcmp.ne.s32.totalorder %v5845_v38, %v5759_v31 }
 0x29d   : > { %v2037_v45 = vunpack.c.l.b16 %v1313_v61  ;;  %v2038_v57 = vunpack.c.h.b16 %v1313_v61  ;;  %v6033_v61 = vpop.permute.xlu2 %1669 }
 0x2a1   : > { %4246 = vmatmul.msk.bf16.vlgmr.msrb.gmra.mxu3 %vm4245_vm4, %v7543_v16  ;;  %vm1251_vm4 = vcmp.ne.s32.totalorder %v5892_v43, %v5761_v8  ;;  %v6021_v42 = vpop.permute.xlu0 %1664 }
 0x2a2   : > { %v5952_v28 = vpop.permute.xlu1 %1227  ;;  %v1734_v14 = vmul.f32 %v6021_v42, %v1638_v40 }
 0x2a3   : > { %vm7406_vm9 = vcmp.ne.s32.totalorder %v5952_v28, %v5759_v31  ;;  %vm7408_vm12 = vcmp.ne.s32.totalorder %v5952_v28, %v5761_v8 }
 0x2a4   : > { %vm1296_vm11 = vmpackc.low %vm7408_vm12, %vm7406_vm9  ;;  %v1886_v39 = vpop.f32.mrf.mxu3  ;;  %4214 = vmatmul.msk.bf16.vlgmr.msrb.gmra.mxu2 %vm4213_vm14, %v7543_v16  ;;  %vm1253_vm14 = vcmp.ne.s32.totalorder %v5845_v38, %v5761_v8 }
 0x2a5   : > { %v1312_v51 = vsel %vm1296_vm11, %v5851_v44, 0  ;;  %vm1290_vm11 = vmpackc.low %vm1251_vm4, %vm1250_vm7 }
 0x2a6   : > { %v2035_v58 = vunpack.c.l.b16 %v1312_v51  ;;  %v2036_v27 = vunpack.c.h.b16 %v1312_v51  ;;  %vm1291_vm1 = vmpackc.low %vm1253_vm14, %vm1252_vm2  ;;  %v1306_v19 = vsel %vm1290_vm11, %v5742_v34, 0  ;;  %vm7595_vm11 = vcmp.ne.s32.totalorder %v5805_v37, %v5759_v31 }
 0x2a7   : > { %v1837_v1 = vpop.f32.mrf.mxu2  ;;  %vm4247_vm9 = vmpackc.low %vm1241_vm15, %vm1239_vm6  ;;  %v1307_v26 = vsel %vm1291_vm1, %v5737_v36, 0  ;;  %v2023_v32 = vunpack.c.l.b16 %v1306_v19  ;;  %v2024_v47 = vunpack.c.h.b16 %v1306_v19  ;;  %vm7409_vm15 = vcmp.ne.s32.totalorder %v5913_v55, %v5759_v31 }
 0x2a8   : > { %v1887_v30 = vadd.f32 %v1886_v39, %v1837_v1  ;;  %v5976_v4 = vpack.c.b16 %v2037_v45, %v2035_v58  ;;  %v5978_v13 = vpack.c.b16 %v2038_v57, %v2036_v27  ;;  %vm4215_vm5 = vmpackc.low %vm7595_vm11, %vm1238_vm0  ;;  %v2025_v63 = vunpack.c.l.b16 %v1307_v26  ;;  %v1640_v1 = vld [vmem:[#allocation3 + $0x20] sm:$0xff] }
 0x2a9   : > { %2094 = vmatmul.bf16.gmra.mxu0 %v2045_v35  ;;  %2143 = vmatmul.bf16.gmra.mxu1 %v2046_v12  ;;  %v2026_v7 = vunpack.c.h.b16 %v1307_v26  ;;  %vm1257_vm0 = vcmp.ne.s32.totalorder %v5913_v55, %v5761_v8  ;;  %vm7410_vm6 = vcmp.ne.s32.totalorder %v5818_v52, %v5759_v31  ;;  %v1735_v39 = vmul.f32 %v6033_v61, %v1639_v53 }
 0x2aa   : > { %v1926_v44 = vadd.f32 %v1887_v30, %v1732_v11  ;;  %v5995_v18 = vpop.permute.xlu1 %1659  ;;  %v2047_v49 = vpack.c.b16 %v2025_v63, %v2023_v32  ;;  %vm1293_vm1 = vmpackc.low %vm1257_vm0, %vm7409_vm15  ;;  %vm7596_vm11 = vcmp.ne.s32.totalorder %v5849_v29, %v5761_v8  ;;  %vm7597_vm15 = vcmp.ne.s32.totalorder %v5767_v5, %v5759_v31  ;;  %v6087_v32 = vpop.permute.xlu2 %1684 }
 0x2ab   : > { %v1733_v46 = vmul.f32 %v5995_v18, %v1637_v21  ;;  %v2048_v20 = vpack.c.b16 %v2026_v7, %v2024_v47  ;;  %v1309_v25 = vsel %vm1293_vm1, %v5765_v33, 0  ;;  %vm4249_vm12 = vmpackc.low %vm7596_vm11, %vm1243_vm8  ;;  %vm7598_vm1 = vcmp.ne.s32.totalorder %v5849_v29, %v5759_v31  ;;  %v6069_v21 = vpop.permute.xlu0 %1679  ;;  %v1643_v7 = vld [vmem:[#allocation3 + $0x38] sm:$0xff] }
 0x2ac   : > { %1943 = vst.msk [vmem:[#allocation3] sm:$0xff] %vm1942_vm13, %v1926_v44  ;;  %v1888_v41 = vpop.f32.mrf.mxu3  ;;  %v2029_v45 = vunpack.c.l.b16 %v1309_v25  ;;  %v2030_v57 = vunpack.c.h.b16 %v1309_v25  ;;  %vm7599_vm8 = vcmp.ne.s32.totalorder %v5826_v3, %v5761_v8  ;;  %vm7605_vm11 = vcmp.ne.s32.totalorder %v5889_v56, %v5759_v31 }
 0x2af   : > { %v1839_v60 = vpop.f32.mrf.mxu2 }
 0x2b0   : > { %v1889_v62 = vadd.f32 %v1888_v41, %v1839_v60  ;;  %v1641_v41 = vld [vmem:[#allocation3 + $0x28] sm:$0xff] }
 0x2b1   : > { %4248 = vmatmul.msk.bf16.gmra.mxu3 %vm4247_vm9, %v7543_v16  ;;  %v1737_v19 = vmul.f32 %v6069_v21, %v1641_v41 }
 0x2b2   : > { %v1927_v48 = vadd.f32 %v1889_v62, %v1733_v46  ;;  %v6065_v35 = vpop.permute.xlu1 %1674 }
 0x2b3   : > { %v1736_v30 = vmul.f32 %v6065_v35, %v1640_v1 }
 0x2b4   : > { %1944 = vst.msk [vmem:[#allocation3 + $0x8] sm:$0xff] %vm1942_vm13, %v1927_v48  ;;  %v1891_v34 = vpop.f32.mrf.mxu3  ;;  %4216 = vmatmul.msk.bf16.gmra.mxu2 %vm4215_vm5, %v7543_v16  ;;  %vm1255_vm5 = vcmp.ne.s32.totalorder %v5818_v52, %v5761_v8  ;;  %v1642_v48 = vld [vmem:[#allocation3 + $0x30] sm:$0xff] }
 0x2b5   : > { %vm1292_vm9 = vmpackc.low %vm1255_vm5, %vm7410_vm6 }
 0x2b6   : > { %v1308_v23 = vsel %vm1292_vm9, %v5756_v6, 0  ;;  %vm4217_vm6 = vmpackc.low %vm7598_vm1, %vm7597_vm15  ;;  %vm7600_vm15 = vcmp.ne.s32.totalorder %v5826_v3, %v5759_v31  ;;  %vm7606_vm1 = vcmp.ne.s32.totalorder %v5847_v24, %v5759_v31 }
 0x2b7   : > { %v1842_v36 = vpop.f32.mrf.mxu2  ;;  %v2027_v58 = vunpack.c.l.b16 %v1308_v23  ;;  %v2028_v27 = vunpack.c.h.b16 %v1308_v23  ;;  %v1959_v23 = vld [vmem:[#allocation4] sm:$0xff] }
 0x2b8   : > { %v1892_v22 = vadd.f32 %v1891_v34, %v1842_v36  ;;  %v1738_v34 = vmul.f32 %v6087_v32, %v1642_v48 }
 0x2b9   : > { %2099 = vmatmul.bf16.gmra.mxu0 %v2047_v49  ;;  %2148 = vmatmul.bf16.gmra.mxu1 %v2048_v20  ;;  %v2049_v12 = vpack.c.b16 %v2029_v45, %v2027_v58  ;;  %v2050_v11 = vpack.c.b16 %v2030_v57, %v2028_v27  ;;  %v1646_v45 = vld [vmem:[#allocation3 + $0x50] sm:$0xff]  ;;  %v1975_v27 = vmul.f32 %v1959_v23, %v5972_v9 }
 0x2ba   : > { %v1928_v37 = vadd.f32 %v1892_v22, %v1734_v14  ;;  %v6093_v40 = vpop.permute.xlu1 %1689  ;;  %v1644_v14 = vld [vmem:[#allocation3 + $0x40] sm:$0xff]  ;;  %v6111_v22 = vpop.permute.xlu0 %1694 }
 0x2bb   : > { %v1739_v49 = vmul.f32 %v6093_v40, %v1643_v7 }
 0x2bc   : > { %1945 = vst.msk [vmem:[#allocation3 + $0x10] sm:$0xff] %vm1942_vm13, %v1928_v37  ;;  %v1893_v50 = vpop.f32.mrf.mxu3 }
 0x2bf   : > { %v1844_v2 = vpop.f32.mrf.mxu2 }
 0x2c0   : > { %v1894_v51 = vadd.f32 %v1893_v50, %v1844_v2  ;;  %v1740_v50 = vmul.f32 %v6111_v22, %v1644_v14  ;;  %v1645_v2 = vld [vmem:[#allocation3 + $0x48] sm:$0xff]  ;;  %v1962_v14 = vld [vmem:[#allocation4 + $0x18] sm:$0xff] }
 0x2c1   : > { %4250 = vmatmul.msk.bf16.gmra.mxu3 %vm4249_vm12, %v7543_v16  ;;  %vm4251_vm12 = vmpackc.low %vm1249_vm10, %vm7599_vm8 }
 0x2c2   : > { %v1929_v0 = vadd.f32 %v1894_v51, %v1735_v39  ;;  %vm4253_vm10 = vmpackc.low %vm1253_vm14, %vm1251_vm4  ;;  %v6117_v39 = vpop.permute.xlu2 %1699  ;;  %vm7601_vm4 = vcmp.ne.s32.totalorder %v5818_v52, %v5759_v31  ;;  %v6135_v57 = vpop.permute.xlu1 %1704 }
 0x2c3   : > { %v1741_v51 = vmul.f32 %v6117_v39, %v1645_v2  ;;  %v1742_v52 = vmul.f32 %v6135_v57, %v1646_v45  ;;  %vm4225_vm8 = vmpackc.low %vm7606_vm1, %vm7605_vm11 }
 0x2c4   : > { %1946 = vst.msk [vmem:[#allocation3 + $0x18] sm:$0xff] %vm1942_vm13, %v1929_v0  ;;  %v1896_v33 = vpop.f32.mrf.mxu3  ;;  %4218 = vmatmul.msk.bf16.gmra.mxu2 %vm4217_vm6, %v7543_v16  ;;  %vm4219_vm6 = vmpackc.low %vm1248_vm3, %vm7600_vm15  ;;  %vm7608_vm15 = vcmp.ne.s32.totalorder %v5915_v15, %v5761_v8 }
 0x2c5   : > { %vm4221_vm3 = vmpackc.low %vm1252_vm2, %vm1250_vm7  ;;  %vm7602_vm2 = vcmp.ne.s32.totalorder %v5913_v55, %v5759_v31 }
 0x2c6   : > { %vm4255_vm7 = vmpackc.low %vm1257_vm0, %vm1255_vm5  ;;  %vm7603_vm0 = vcmp.ne.s32.totalorder %v5889_v56, %v5761_v8  ;;  %vm7604_vm5 = vcmp.ne.s32.totalorder %v5847_v24, %v5761_v8 }
 0x2c7   : > { %v1847_v6 = vpop.f32.mrf.mxu2  ;;  %vm4223_vm14 = vmpackc.low %vm7602_vm2, %vm7601_vm4 }
 0x2c8   : > { %v1897_v5 = vadd.f32 %v1896_v33, %v1847_v6  ;;  %vm4257_vm9 = vmpackc.low %vm7604_vm5, %vm7603_vm0 }
 0x2c9   : > { %2104 = vmatmul.bf16.gmra.mxu0 %v2049_v12  ;;  %2153 = vmatmul.bf16.gmra.mxu1 %v2050_v11 }
 0x2ca   : > { %v1930_v29 = vadd.f32 %v1897_v5, %v1736_v30  ;;  %v1960_v30 = vld [vmem:[#allocation4 + $0x8] sm:$0xff] }
 0x2cb   : > { %v1976_v9 = vmul.f32 %v1960_v30, %v5995_v18  ;;  %v1961_v18 = vld [vmem:[#allocation4 + $0x10] sm:$0xff] }
 0x2cc   : > { %1947 = vst.msk [vmem:[#allocation3 + $0x20] sm:$0xff] %vm1942_vm13, %v1930_v29  ;;  %v1898_v44 = vpop.f32.mrf.mxu3  ;;  %v1647_v29 = vld [vmem:[#allocation3 + $0x58] sm:$0xff] }
 0x2cf   : > { %v1849_v60 = vpop.f32.mrf.mxu2 }
 0x2d0   : > { %v1899_v46 = vadd.f32 %v1898_v44, %v1849_v60  ;;  %v6141_v44 = vpop.permute.xlu0 %1709 }
 0x2d1   : > { %4252 = vmatmul.msk.bf16.gmra.mxu3 %vm4251_vm12, %v7543_v16  ;;  %vm7607_vm12 = vcmp.ne.s32.totalorder %v5952_v28, %v5761_v8 }
 0x2d2   : > { %v1931_v62 = vadd.f32 %v1899_v46, %v1737_v19 }
 0x2d4   : > { %1948 = vst.msk [vmem:[#allocation3 + $0x28] sm:$0xff] %vm1942_vm13, %v1931_v62  ;;  %v1901_v26 = vpop.f32.mrf.mxu3  ;;  %4220 = vmatmul.msk.bf16.gmra.mxu2 %vm4219_vm6, %v7543_v16  ;;  %v1743_v62 = vmul.f32 %v6141_v44, %v1647_v29  ;;  %vm4259_vm6 = vmpackc.low %vm7608_vm15, %vm7607_vm12 }
 0x2d7   : > { %v1852_v47 = vpop.f32.mrf.mxu2 }
 0x2d8   : > { %v1902_v63 = vadd.f32 %v1901_v26, %v1852_v47  ;;  %v6187_v45 = vpop.permute.xlu0 %1724 }
 0x2d9   : > { %2109 = vmatmul.bf16.gmra.mxu0 %v5905_v54  ;;  %2158 = vmatmul.bf16.gmra.mxu1 %v5907_v59 }
 0x2da   : > { %v1932_v3 = vadd.f32 %v1902_v63, %v1738_v34  ;;  %v1648_v63 = vld [vmem:[#allocation3 + $0x60] sm:$0xff] }
 0x2dc   : > { %1949 = vst.msk [vmem:[#allocation3 + $0x30] sm:$0xff] %vm1942_vm13, %v1932_v3  ;;  %v1903_v17 = vpop.f32.mrf.mxu3  ;;  %v6161_v3 = vpop.permute.xlu2 %1714 }
 0x2dd   : > { %v1744_v24 = vmul.f32 %v6161_v3, %v1648_v63  ;;  %v2201_v63 = vld [vmem:[#allocation5] sm:$0xff] }
 0x2df   : > { %v1854_v36 = vpop.f32.mrf.mxu2 }
 0x2e0   : > { %v1904_v54 = vadd.f32 %v1903_v17, %v1854_v36  ;;  %v1977_v36 = vmul.f32 %v1961_v18, %v6021_v42  ;;  %v1978_v42 = vmul.f32 %v1962_v14, %v6033_v61  ;;  %v1963_v61 = vld [vmem:[#allocation4 + $0x20] sm:$0xff]  ;;  %v2202_v14 = vld [vmem:[#allocation5 + $0x8] sm:$0xff] }
 0x2e1   : > { %4254 = vmatmul.msk.bf16.gmra.mxu3 %vm4253_vm10, %v7543_v16  ;;  %vm7609_vm10 = vcmp.ne.s32.totalorder %v5952_v28, %v5759_v31 }
 0x2e2   : > { %v1933_v59 = vadd.f32 %v1904_v54, %v1739_v49 }
 0x2e4   : > { %1950 = vst.msk [vmem:[#allocation3 + $0x38] sm:$0xff] %vm1942_vm13, %v1933_v59  ;;  %v1906_v20 = vpop.f32.mrf.mxu3  ;;  %4222 = vmatmul.msk.bf16.gmra.mxu2 %vm4221_vm3, %v7543_v16  ;;  %vm7610_vm3 = vcmp.ne.s32.totalorder %v5915_v15, %v5759_v31 }
 0x2e7   : > { %v1857_v37 = vpop.f32.mrf.mxu2 }
 0x2e8   : > { %v1907_v53 = vadd.f32 %v1906_v20, %v1857_v37 }
 0x2e9   : > { %2114 = vmatmul.bf16.gmra.mxu0 %v5976_v4  ;;  %2163 = vmatmul.bf16.gmra.mxu1 %v5978_v13 }
 0x2ea   : > { %v1934_v43 = vadd.f32 %v1907_v53, %v1740_v50  ;;  %v1649_v50 = vld [vmem:[#allocation3 + $0x68] sm:$0xff]  ;;  %v6167_v53 = vpop.permute.xlu1 %1719 }
 0x2ec   : > { %1951 = vst.msk [vmem:[#allocation3 + $0x40] sm:$0xff] %vm1942_vm13, %v1934_v43  ;;  %v1908_v38 = vpop.f32.mrf.mxu3 }
 0x2ef   : > { %v1859_v25 = vpop.f32.mrf.mxu2 }
 0x2f0   : > { %v1909_v4 = vadd.f32 %v1908_v38, %v1859_v25 }
 0x2f1   : > { %4256 = vmatmul.msk.bf16.gmra.mxu3 %vm4255_vm7, %v7543_v16  ;;  %vm4227_vm7 = vmpackc.low %vm7610_vm3, %vm7609_vm10 }
 0x2f2   : > { %v1935_v13 = vadd.f32 %v1909_v4, %v1741_v51  ;;  %v1745_v51 = vmul.f32 %v6167_v53, %v1649_v50 }
 0x2f4   : > { %1952 = vst.msk [vmem:[#allocation3 + $0x48] sm:$0xff] %vm1942_vm13, %v1935_v13  ;;  %v1911_v0 = vpop.f32.mrf.mxu3  ;;  %4224 = vmatmul.msk.bf16.gmra.mxu2 %vm4223_vm14, %v7543_v16 }
 0x2f5   : > { %v2080_v33 = vpop.f32.mrf.mxu0  ;;  %v2129_v58 = vpop.f32.mrf.mxu1 }
 0x2f6   : > { %v2130_v1 = vadd.f32 %v2129_v58, %v2080_v33 }
 0x2f7   : > { %v1862_v6 = vpop.f32.mrf.mxu2 }
 0x2f8   : > { %v1912_v12 = vadd.f32 %v1911_v0, %v1862_v6  ;;  %v2169_v55 = vadd.f32 %v2130_v1, %v1975_v27  ;;  %v1650_v0 = vld [vmem:[#allocation3 + $0x70] sm:$0xff]  ;;  %v1979_v27 = vmul.f32 %v1963_v61, %v6065_v35 }
 0x2f9   : > { %v1746_v31 = vmul.f32 %v6187_v45, %v1650_v0  ;;  %v1968_v0 = vld [vmem:[#allocation4 + $0x48] sm:$0xff] }
 0x2fa   : > { %v1936_v11 = vadd.f32 %v1912_v12, %v1742_v52  ;;  %2185 = vst.msk [vmem:[#allocation4] sm:$0xff] %vm1942_vm13, %v2169_v55  ;;  %v1964_v12 = vld [vmem:[#allocation4 + $0x28] sm:$0xff]  ;;  %v1651_v55 = vld [vmem:[#allocation3 + $0x78] sm:$0xff] }
 0x2fb   : > { %v1980_v35 = vmul.f32 %v1964_v12, %v6069_v21  ;;  %v1969_v12 = vld [vmem:[#allocation4 + $0x50] sm:$0xff] }
 0x2fc   : > { %1953 = vst.msk [vmem:[#allocation3 + $0x50] sm:$0xff] %vm1942_vm13, %v1936_v11  ;;  %v1913_v5 = vpop.f32.mrf.mxu3  ;;  %v6193_v11 = vpop.permute.xlu2 %1729 }
 0x2fd   : > { %v2082_v41 = vpop.f32.mrf.mxu0  ;;  %v2131_v60 = vpop.f32.mrf.mxu1 }
 0x2fe   : > { %v2132_v19 = vadd.f32 %v2131_v60, %v2082_v41  ;;  %v1747_v60 = vmul.f32 %v6193_v11, %v1651_v55 }
 0x2ff   : > { %v1864_v46 = vpop.f32.mrf.mxu2 }
 0x300   : > { %v1914_v26 = vadd.f32 %v1913_v5, %v1864_v46  ;;  %v2170_v48 = vadd.f32 %v2132_v19, %v1976_v9 }
 0x301   : > { %4258 = vmatmul.msk.bf16.gmra.mxu3 %vm4257_vm9, %v7543_v16 }
 0x302   : > { %v1937_v47 = vadd.f32 %v1914_v26, %v1743_v62  ;;  %2186 = vst.msk [vmem:[#allocation4 + $0x8] sm:$0xff] %vm1942_vm13, %v2170_v48  ;;  %v1965_v62 = vld [vmem:[#allocation4 + $0x30] sm:$0xff] }
 0x303   : > { %v1981_v18 = vmul.f32 %v1965_v62, %v6087_v32 }
 0x304   : > { %1954 = vst.msk [vmem:[#allocation3 + $0x58] sm:$0xff] %vm1942_vm13, %v1937_v47  ;;  %v1916_v34 = vpop.f32.mrf.mxu3  ;;  %4226 = vmatmul.msk.bf16.gmra.mxu2 %vm4225_vm8, %v7543_v16 }
 0x306   : > { %v2085_v17 = vpop.f32.mrf.mxu0  ;;  %v2134_v7 = vpop.f32.mrf.mxu1 }
 0x307   : > { %v2135_v56 = vadd.f32 %v2134_v7, %v2085_v17  ;;  %v1867_v49 = vpop.f32.mrf.mxu2 }
 0x308   : > { %v1917_v54 = vadd.f32 %v1916_v34, %v1867_v49 }
 0x309   : > { %v2171_v59 = vadd.f32 %v2135_v56, %v1977_v36  ;;  %v1966_v56 = vld [vmem:[#allocation4 + $0x38] sm:$0xff] }
 0x30a   : > { %v1938_v20 = vadd.f32 %v1917_v54, %v1744_v24 }
 0x30b   : > { %2187 = vst.msk [vmem:[#allocation4 + $0x10] sm:$0xff] %vm1942_vm13, %v2171_v59  ;;  %v1982_v59 = vmul.f32 %v1966_v56, %v6093_v40 }
 0x30c   : > { %1955 = vst.msk [vmem:[#allocation3 + $0x60] sm:$0xff] %vm1942_vm13, %v1938_v20  ;;  %v1918_v37 = vpop.f32.mrf.mxu3 }
 0x30e   : > { %v2087_v43 = vpop.f32.mrf.mxu0  ;;  %v2136_v38 = vpop.f32.mrf.mxu1 }
 0x30f   : > { %v2137_v2 = vadd.f32 %v2136_v38, %v2087_v43  ;;  %v1869_v25 = vpop.f32.mrf.mxu2  ;;  %v1967_v38 = vld [vmem:[#allocation4 + $0x40] sm:$0xff] }
 0x310   : > { %v1919_v4 = vadd.f32 %v1918_v37, %v1869_v25 }
 0x311   : > { %v2172_v13 = vadd.f32 %v2137_v2, %v1978_v42  ;;  %4260 = vmatmul.msk.bf16.gmra.mxu3 %vm4259_vm6, %v7543_v16 }
 0x312   : > { %v1939_v23 = vadd.f32 %v1919_v4, %v1745_v51  ;;  %v1983_v51 = vmul.f32 %v1967_v38, %v6111_v22 }
 0x313   : > { %2188 = vst.msk [vmem:[#allocation4 + $0x18] sm:$0xff] %vm1942_vm13, %v2172_v13  ;;  %v2203_v13 = vld [vmem:[#allocation5 + $0x10] sm:$0xff] }
 0x314   : > { %1956 = vst.msk [vmem:[#allocation3 + $0x68] sm:$0xff] %vm1942_vm13, %v1939_v23  ;;  %v1921_v8 = vpop.f32.mrf.mxu3  ;;  %4228 = vmatmul.msk.bf16.gmra.mxu2 %vm4227_vm7, %v7543_v16 }
 0x316   : > { %v2090_v33 = vpop.f32.mrf.mxu0  ;;  %v2139_v58 = vpop.f32.mrf.mxu1 }
 0x317   : > { %v2140_v28 = vadd.f32 %v2139_v58, %v2090_v33  ;;  %v1872_v1 = vpop.f32.mrf.mxu2 }
 0x318   : > { %v1922_v15 = vadd.f32 %v1921_v8, %v1872_v1 }
 0x319   : > { %v2173_v6 = vadd.f32 %v2140_v28, %v1979_v27  ;;  %v1984_v28 = vmul.f32 %v1968_v0, %v6117_v39 }
 0x31a   : > { %v1940_v52 = vadd.f32 %v1922_v15, %v1746_v31  ;;  %v2204_v31 = vld [vmem:[#allocation5 + $0x18] sm:$0xff] }
 0x31b   : > { %2189 = vst.msk [vmem:[#allocation4 + $0x20] sm:$0xff] %vm1942_vm13, %v2173_v6 }
 0x31c   : > { %1957 = vst.msk [vmem:[#allocation3 + $0x70] sm:$0xff] %vm1942_vm13, %v1940_v52  ;;  %v1923_v16 = vpop.f32.mrf.mxu3 }
 0x31e   : > { %v2092_v30 = vpop.f32.mrf.mxu0  ;;  %v2141_v5 = vpop.f32.mrf.mxu1 }
 0x31f   : > { %v2142_v29 = vadd.f32 %v2141_v5, %v2092_v30  ;;  %v1874_v41 = vpop.f32.mrf.mxu2  ;;  %v1985_v5 = vmul.f32 %v1969_v12, %v6135_v57  ;;  %v2210_v12 = vld [vmem:[#allocation5 + $0x48] sm:$0xff] }
 0x320   : > { %v1924_v9 = vadd.f32 %v1923_v16, %v1874_v41 }
 0x321   : > { %v2174_v19 = vadd.f32 %v2142_v29, %v1980_v35  ;;  %v2205_v29 = vld [vmem:[#allocation5 + $0x20] sm:$0xff] }
 0x322   : > { %v1941_v46 = vadd.f32 %v1924_v9, %v1747_v60 }
 0x323   : > { %2190 = vst.msk [vmem:[#allocation4 + $0x28] sm:$0xff] %vm1942_vm13, %v2174_v19  ;;  %v1970_v19 = vld [vmem:[#allocation4 + $0x58] sm:$0xff] }
 0x324   : > { %1958 = vst.msk [vmem:[#allocation3 + $0x78] sm:$0xff] %vm1942_vm13, %v1941_v46  ;;  %v2275_v26 = vpop.f32.mrf.mxu3 }
 0x326   : > { %v2095_v48 = vpop.f32.mrf.mxu0  ;;  %v2144_v47 = vpop.f32.mrf.mxu1 }
 0x327   : > { %v2145_v34 = vadd.f32 %v2144_v47, %v2095_v48  ;;  %v2226_v21 = vpop.f32.mrf.mxu2  ;;  %v1986_v48 = vmul.f32 %v1970_v19, %v6141_v44 }
 0x328   : > { %v2276_v17 = vadd.f32 %v2275_v26, %v2226_v21 }
 0x329   : > { %v2175_v7 = vadd.f32 %v2145_v34, %v1981_v18  ;;  %v2206_v18 = vld [vmem:[#allocation5 + $0x28] sm:$0xff] }
 0x32a   : > { %v2315_v36 = vadd.f32 %v2276_v17, %v2201_v63  ;;  %v1971_v17 = vld [vmem:[#allocation4 + $0x60] sm:$0xff] }
 0x32b   : > { %2191 = vst.msk [vmem:[#allocation4 + $0x30] sm:$0xff] %vm1942_vm13, %v2175_v7 }
 0x32c   : > { %2331 = vst.msk [vmem:[#allocation5] sm:$0xff] %vm1942_vm13, %v2315_v36  ;;  %v2277_v49 = vpop.f32.mrf.mxu3 }
 0x32e   : > { %v2097_v24 = vpop.f32.mrf.mxu0  ;;  %v2146_v54 = vpop.f32.mrf.mxu1 }
 0x32f   : > { %v2147_v20 = vadd.f32 %v2146_v54, %v2097_v24  ;;  %v2228_v37 = vpop.f32.mrf.mxu2  ;;  %v2207_v54 = vld [vmem:[#allocation5 + $0x30] sm:$0xff] }
 0x330   : > { %v2278_v32 = vadd.f32 %v2277_v49, %v2228_v37  ;;  %v1987_v49 = vmul.f32 %v1971_v17, %v6161_v3  ;;  %v1972_v37 = vld [vmem:[#allocation4 + $0x68] sm:$0xff] }
 0x331   : > { %v2176_v50 = vadd.f32 %v2147_v20, %v1982_v59  ;;  %v1988_v38 = vmul.f32 %v1972_v37, %v6167_v53 }
 0x332   : > { %v2316_v43 = vadd.f32 %v2278_v32, %v2202_v14 }
 0x333   : > { %2192 = vst.msk [vmem:[#allocation4 + $0x38] sm:$0xff] %vm1942_vm13, %v2176_v50 }
 0x334   : > { %2332 = vst.msk [vmem:[#allocation5 + $0x8] sm:$0xff] %vm1942_vm13, %v2316_v43  ;;  %v2280_v42 = vpop.f32.mrf.mxu3 }
 0x336   : > { %v2100_v2 = vpop.f32.mrf.mxu0  ;;  %v2149_v25 = vpop.f32.mrf.mxu1 }
 0x337   : > { %v2150_v4 = vadd.f32 %v2149_v25, %v2100_v2  ;;  %v2231_v23 = vpop.f32.mrf.mxu2  ;;  %v2208_v2 = vld [vmem:[#allocation5 + $0x38] sm:$0xff] }
 0x338   : > { %v2281_v40 = vadd.f32 %v2280_v42, %v2231_v23 }
 0x339   : > { %v2177_v61 = vadd.f32 %v2150_v4, %v1983_v51 }
 0x33a   : > { %v2317_v8 = vadd.f32 %v2281_v40, %v2203_v13  ;;  %v1973_v13 = vld [vmem:[#allocation4 + $0x70] sm:$0xff] }
 0x33b   : > { %2193 = vst.msk [vmem:[#allocation4 + $0x40] sm:$0xff] %vm1942_vm13, %v2177_v61 }
 0x33c   : > { %2333 = vst.msk [vmem:[#allocation5 + $0x10] sm:$0xff] %vm1942_vm13, %v2317_v8  ;;  %v2282_v33 = vpop.f32.mrf.mxu3  ;;  %v1989_v8 = vmul.f32 %v1973_v13, %v6187_v45 }
 0x33e   : > { %v2102_v58 = vpop.f32.mrf.mxu0  ;;  %v2151_v27 = vpop.f32.mrf.mxu1 }
 0x33f   : > { %v2152_v1 = vadd.f32 %v2151_v27, %v2102_v58  ;;  %v2233_v15 = vpop.f32.mrf.mxu2 }
 0x340   : > { %v2283_v22 = vadd.f32 %v2282_v33, %v2233_v15  ;;  %v2209_v33 = vld [vmem:[#allocation5 + $0x40] sm:$0xff] }
 0x341   : > { %v2178_v6 = vadd.f32 %v2152_v1, %v1984_v28  ;;  %v1974_v1 = vld [vmem:[#allocation4 + $0x78] sm:$0xff] }
 0x342   : > { %v2318_v52 = vadd.f32 %v2283_v22, %v2204_v31 }
 0x343   : > { %2194 = vst.msk [vmem:[#allocation4 + $0x48] sm:$0xff] %vm1942_vm13, %v2178_v6  ;;  %v1990_v6 = vmul.f32 %v1974_v1, %v6193_v11 }
 0x344   : > { %2334 = vst.msk [vmem:[#allocation5 + $0x18] sm:$0xff] %vm1942_vm13, %v2318_v52  ;;  %v2285_v16 = vpop.f32.mrf.mxu3 }
 0x346   : > { %v2105_v55 = vpop.f32.mrf.mxu0  ;;  %v2154_v30 = vpop.f32.mrf.mxu1 }
 0x347   : > { %v2155_v35 = vadd.f32 %v2154_v30, %v2105_v55  ;;  %v2236_v41 = vpop.f32.mrf.mxu2 }
 0x348   : > { %v2286_v39 = vadd.f32 %v2285_v16, %v2236_v41 }
 0x349   : > { %v2179_v60 = vadd.f32 %v2155_v35, %v1985_v5  ;;  %v2211_v35 = vld [vmem:[#allocation5 + $0x50] sm:$0xff] }
 0x34a   : > { %v2319_v9 = vadd.f32 %v2286_v39, %v2205_v29 }
 0x34b   : > { %2195 = vst.msk [vmem:[#allocation4 + $0x50] sm:$0xff] %vm1942_vm13, %v2179_v60 }
 0x34c   : > { %2335 = vst.msk [vmem:[#allocation5 + $0x20] sm:$0xff] %vm1942_vm13, %v2319_v9  ;;  %v2287_v46 = vpop.f32.mrf.mxu3  ;;  %v2212_v9 = vld [vmem:[#allocation5 + $0x58] sm:$0xff] }
 0x34e   : > { %v2107_v62 = vpop.f32.mrf.mxu0  ;;  %v2156_v26 = vpop.f32.mrf.mxu1 }
 0x34f   : > { %v2157_v47 = vadd.f32 %v2156_v26, %v2107_v62  ;;  %v2238_v34 = vpop.f32.mrf.mxu2  ;;  %v2213_v26 = vld [vmem:[#allocation5 + $0x60] sm:$0xff] }
 0x350   : > { %v2288_v57 = vadd.f32 %v2287_v46, %v2238_v34 }
 0x351   : > { %v2180_v63 = vadd.f32 %v2157_v47, %v1986_v48 }
 0x352   : > { %v2320_v21 = vadd.f32 %v2288_v57, %v2206_v18  ;;  %v2214_v57 = vld [vmem:[#allocation5 + $0x68] sm:$0xff] }
 0x353   : > { %2196 = vst.msk [vmem:[#allocation4 + $0x58] sm:$0xff] %vm1942_vm13, %v2180_v63 }
 0x354   : > { %2336 = vst.msk [vmem:[#allocation5 + $0x28] sm:$0xff] %vm1942_vm13, %v2320_v21  ;;  %v2290_v7 = vpop.f32.mrf.mxu3 }
 0x356   : > { %v2110_v36 = vpop.f32.mrf.mxu0  ;;  %v2159_v56 = vpop.f32.mrf.mxu1 }
 0x357   : > { %v2160_v24 = vadd.f32 %v2159_v56, %v2110_v36  ;;  %v2241_v59 = vpop.f32.mrf.mxu2  ;;  %v2215_v36 = vld [vmem:[#allocation5 + $0x70] sm:$0xff] }
 0x358   : > { %v2291_v44 = vadd.f32 %v2290_v7, %v2241_v59  ;;  %v2216_v59 = vld [vmem:[#allocation5 + $0x78] sm:$0xff] }
 0x359   : > { %v2181_v20 = vadd.f32 %v2160_v24, %v1987_v49 }
 0x35a   : > { %v2321_v14 = vadd.f32 %v2291_v44, %v2207_v54 }
 0x35b   : > { %2197 = vst.msk [vmem:[#allocation4 + $0x60] sm:$0xff] %vm1942_vm13, %v2181_v20 }
 0x35c   : > { %2337 = vst.msk [vmem:[#allocation5 + $0x30] sm:$0xff] %vm1942_vm13, %v2321_v14  ;;  %v2292_v32 = vpop.f32.mrf.mxu3 }
 0x35e   : > { %v2112_v50 = vpop.f32.mrf.mxu0  ;;  %v2161_v43 = vpop.f32.mrf.mxu1 }
 0x35f   : > { %v2162_v42 = vadd.f32 %v2161_v43, %v2112_v50  ;;  %v2243_v25 = vpop.f32.mrf.mxu2 }
 0x360   : > { %v2293_v3 = vadd.f32 %v2292_v32, %v2243_v25 }
 0x361   : > { %v2182_v51 = vadd.f32 %v2162_v42, %v1988_v38 }
 0x362   : > { %v2322_v4 = vadd.f32 %v2293_v3, %v2208_v2 }
 0x363   : > { %2198 = vst.msk [vmem:[#allocation4 + $0x68] sm:$0xff] %vm1942_vm13, %v2182_v51 }
 0x364   : > { %2338 = vst.msk [vmem:[#allocation5 + $0x38] sm:$0xff] %vm1942_vm13, %v2322_v4  ;;  %v2295_v23 = vpop.f32.mrf.mxu3 }
 0x366   : > { %v2115_v40 = vpop.f32.mrf.mxu0  ;;  %v2164_v61 = vpop.f32.mrf.mxu1 }
 0x367   : > { %v2165_v0 = vadd.f32 %v2164_v61, %v2115_v40  ;;  %v2246_v58 = vpop.f32.mrf.mxu2 }
 0x368   : > { %v2296_v53 = vadd.f32 %v2295_v23, %v2246_v58 }
 0x369   : > { %v2183_v27 = vadd.f32 %v2165_v0, %v1989_v8 }
 0x36a   : > { %v2323_v28 = vadd.f32 %v2296_v53, %v2209_v33 }
 0x36b   : > { %2199 = vst.msk [vmem:[#allocation4 + $0x70] sm:$0xff] %vm1942_vm13, %v2183_v27 }
 0x36c   : > { %2339 = vst.msk [vmem:[#allocation5 + $0x40] sm:$0xff] %vm1942_vm13, %v2323_v28  ;;  %v2297_v31 = vpop.f32.mrf.mxu3 }
 0x36e   : > { %v2117_v15 = vpop.f32.mrf.mxu0  ;;  %v2166_v22 = vpop.f32.mrf.mxu1 }
 0x36f   : > { %v2167_v52 = vadd.f32 %v2166_v22, %v2117_v15  ;;  %v2248_v16 = vpop.f32.mrf.mxu2 }
 0x370   : > { %v2298_v45 = vadd.f32 %v2297_v31, %v2248_v16 }
 0x371   : > { %v2184_v55 = vadd.f32 %v2167_v52, %v1990_v6 }
 0x372   : > { %v2324_v30 = vadd.f32 %v2298_v45, %v2210_v12 }
 0x373   : > { %2200 = vst.msk [vmem:[#allocation4 + $0x78] sm:$0xff] %vm1942_vm13, %v2184_v55 }
 0x374   : > { %2340 = vst.msk [vmem:[#allocation5 + $0x48] sm:$0xff] %vm1942_vm13, %v2324_v30  ;;  %v2300_v5 = vpop.f32.mrf.mxu3 }
 0x377   : > { %v2251_v29 = vpop.f32.mrf.mxu2 }
 0x378   : > { %v2301_v41 = vadd.f32 %v2300_v5, %v2251_v29 }
 0x37a   : > { %v2325_v39 = vadd.f32 %v2301_v41, %v2211_v35 }
 0x37c   : > { %2341 = vst.msk [vmem:[#allocation5 + $0x50] sm:$0xff] %vm1942_vm13, %v2325_v39  ;;  %v2302_v60 = vpop.f32.mrf.mxu3 }
 0x37f   : > { %v2253_v11 = vpop.f32.mrf.mxu2 }
 0x380   : > { %v2303_v19 = vadd.f32 %v2302_v60, %v2253_v11 }
 0x382   : > { %v2326_v46 = vadd.f32 %v2303_v19, %v2212_v9 }
 0x384   : > { %2342 = vst.msk [vmem:[#allocation5 + $0x58] sm:$0xff] %vm1942_vm13, %v2326_v46  ;;  %v2305_v62 = vpop.f32.mrf.mxu3 }
 0x387   : > { %v2256_v48 = vpop.f32.mrf.mxu2 }
 0x388   : > { %v2306_v47 = vadd.f32 %v2305_v62, %v2256_v48 }
 0x38a   : > { %v2327_v18 = vadd.f32 %v2306_v47, %v2213_v26 }
 0x38c   : > { %2343 = vst.msk [vmem:[#allocation5 + $0x60] sm:$0xff] %vm1942_vm13, %v2327_v18  ;;  %v2307_v34 = vpop.f32.mrf.mxu3 }
 0x38f   : > { %v2258_v63 = vpop.f32.mrf.mxu2 }
 0x390   : > { %v2308_v21 = vadd.f32 %v2307_v34, %v2258_v63 }
 0x392   : > { %v2328_v17 = vadd.f32 %v2308_v21, %v2214_v57 }
 0x394   : > { %2344 = vst.msk [vmem:[#allocation5 + $0x68] sm:$0xff] %vm1942_vm13, %v2328_v17  ;;  %v2310_v7 = vpop.f32.mrf.mxu3 }
 0x397   : > { %v2261_v56 = vpop.f32.mrf.mxu2 }
 0x398   : > { %v2311_v49 = vadd.f32 %v2310_v7, %v2261_v56 }
 0x39a   : > { %v2329_v24 = vadd.f32 %v2311_v49, %v2215_v36 }
 0x39c   : > { %2345 = vst.msk [vmem:[#allocation5 + $0x70] sm:$0xff] %vm1942_vm13, %v2329_v24  ;;  %v2312_v54 = vpop.f32.mrf.mxu3 }
 0x39f   : > { %v2263_v44 = vpop.f32.mrf.mxu2 }
 0x3a0   : > { %v2313_v20 = vadd.f32 %v2312_v54, %v2263_v44  ;;  %2367 = sbr.rel (%p4261_p1) target bundleno = 1996 (0x7cc), region = 106 }
 0x3a2   : > { %v2330_v14 = vadd.f32 %v2313_v20, %v2216_v59 }
 0x3a4   : > { %2346 = vst.msk [vmem:[#allocation5 + $0x78] sm:$0xff] %vm1942_vm13, %v2330_v14 }
 0x3a5   : > { %v2443_v37 = vld [vmem:[#allocation2 + $0x20] sm:$0xff]  ;;  %v2441_v32 = vld [vmem:[#allocation2 + $0x10] sm:$0xff]  ;;  %v4819_v43 = vmov 0   ;;  %v2444_v38 = vld [vmem:[#allocation2 + $0x28] sm:$0xff]  ;;  %s2807_s17 = sld [smem:[#allocation6]] }
 0x3a6   : > { %v2439_v50 = vld [vmem:[#allocation2] sm:$0xff]  ;;  %4466 = vset.pattern.permute.xlu2 %v4819_v43  ;;  %4465 = vset.pattern.permute.xlu1 %v4819_v43  ;;  %v2442_v42 = vld [vmem:[#allocation2 + $0x18] sm:$0xff]  ;;  %v2440_v2 = vld [vmem:[#allocation2 + $0x8] sm:$0xff] }
 0x3a7   : > { %4464 = vset.pattern.permute.xlu0 %v4819_v43  ;;  %2477 = vperm.xlu2 %4466, %v2443_v37   ;;  %v2447_v25 = vld [vmem:[#allocation2 + $0x40] sm:$0xff]  ;;  %v2446_v3 = vld [vmem:[#allocation2 + $0x38] sm:$0xff]  ;;  %v2445_v51 = vld [vmem:[#allocation2 + $0x30] sm:$0xff] }
 0x3a8   : > { %2467 = vperm.xlu1 %4465, %v2441_v32   ;;  %2457 = vperm.xlu0 %4464, %v2439_v50   ;;  %v2450_v4 = vld [vmem:[#allocation2 + $0x58] sm:$0xff]  ;;  %v2449_v13 = vld [vmem:[#allocation2 + $0x50] sm:$0xff]  ;;  %v2448_v23 = vld [vmem:[#allocation2 + $0x48] sm:$0xff] }
 0x3a9   : > { %v2453_v40 = vld [vmem:[#allocation2 + $0x70] sm:$0xff]  ;;  %v2452_v61 = vld [vmem:[#allocation2 + $0x68] sm:$0xff]  ;;  %v2451_v8 = vld [vmem:[#allocation2 + $0x60] sm:$0xff] }
 0x3aa   : > { %v2680_v0 = vld [vmem:[%s4950_s15 + $0x8] sm:$0xff]  ;;  %v2679_v33 = vld [vmem:[%s4950_s15] sm:$0xff]  ;;  %v2454_v58 = vld [vmem:[#allocation2 + $0x78] sm:$0xff] }
 0x3ab   : > { %v2683_v53 = vld [vmem:[%s4950_s15 + $0x20] sm:$0xff]  ;;  %v2682_v27 = vld [vmem:[%s4950_s15 + $0x18] sm:$0xff]  ;;  %v2681_v28 = vld [vmem:[%s4950_s15 + $0x10] sm:$0xff]  ;;  %v6253_v35 = vstv %s2807_s17 }
 0x3ac   : > { %v2686_v1 = vld [vmem:[%s4950_s15 + $0x38] sm:$0xff]  ;;  %v2685_v31 = vld [vmem:[%s4950_s15 + $0x30] sm:$0xff]  ;;  %v2684_v15 = vld [vmem:[%s4950_s15 + $0x28] sm:$0xff] }
 0x3ad   : > { %v2689_v22 = vld [vmem:[%s4950_s15 + $0x50] sm:$0xff]  ;;  %v2688_v6 = vld [vmem:[%s4950_s15 + $0x48] sm:$0xff]  ;;  %v2687_v52 = vld [vmem:[%s4950_s15 + $0x40] sm:$0xff] }
 0x3ae   : > { %v2692_v12 = vld [vmem:[%s4950_s15 + $0x68] sm:$0xff]  ;;  %v2691_v16 = vld [vmem:[%s4950_s15 + $0x60] sm:$0xff]  ;;  %v2690_v45 = vld [vmem:[%s4950_s15 + $0x58] sm:$0xff] }
 0x3af   : > { %2482 = vperm.xlu2 %4466, %v2444_v38   ;;  %v2694_v55 = vld [vmem:[%s4950_s15 + $0x78] sm:$0xff]  ;;  %v2693_v30 = vld [vmem:[%s4950_s15 + $0x70] sm:$0xff]  ;;  %v2791_v5 = vld [vmem:[%s4960_s25] sm:$0xff] }
 0x3b0   : > { %2472 = vperm.xlu1 %4465, %v2442_v42   ;;  %2462 = vperm.xlu0 %4464, %v2440_v2   ;;  %v2809_v29 = vmul.f32 %v6253_v35, %v2791_v5  ;;  %v6259_v41 = vld [vmem:[%s7352_s8] ss:$0 sm:$0xff]  ;;  %v2794_v60 = vld [vmem:[%s4960_s25 + $0x18] sm:$0xff]  ;;  %v2793_v9 = vld [vmem:[%s4960_s25 + $0x10] sm:$0xff] }
 0x3b1   : > { %v2792_v11 = vld [vmem:[%s4960_s25 + $0x8] sm:$0xff]  ;;  %v2812_v46 = vmul.f32 %v6253_v35, %v2794_v60  ;;  %v2811_v62 = vmul.f32 %v6253_v35, %v2793_v9  ;;  %v2795_v47 = vld [vmem:[%s4960_s25 + $0x20] sm:$0xff]  ;;  %v2797_v57 = vld [vmem:[%s4960_s25 + $0x30] sm:$0xff] }
 0x3b2   : > { %v6262_v39 = vadd.f32 %v6259_v41, %v2809_v29  ;;  %v2810_v26 = vmul.f32 %v6253_v35, %v2792_v11  ;;  %v2796_v63 = vld [vmem:[%s4960_s25 + $0x28] sm:$0xff]  ;;  %v2813_v17 = vmul.f32 %v6253_v35, %v2795_v47  ;;  %v2815_v56 = vmul.f32 %v6253_v35, %v2797_v57  ;;  %v2798_v54 = vld [vmem:[%s4960_s25 + $0x38] sm:$0xff]  ;;  %v2799_v14 = vld [vmem:[%s4960_s25 + $0x40] sm:$0xff] }
 0x3b3   : > { %v6273_v48 = vadd.f32 %v6259_v41, %v2812_v46  ;;  %v6277_v18 = vadd.f32 %v6259_v41, %v2811_v62  ;;  %v2814_v49 = vmul.f32 %v6253_v35, %v2796_v63  ;;  %v2800_v20 = vld [vmem:[%s4960_s25 + $0x48] sm:$0xff]  ;;  %v2816_v32 = vmul.f32 %v6253_v35, %v2798_v54 }
 0x3b4   : > { %v2844_v19 = vsel %vm1942_vm13, %v6262_v39, -inf  ;;  %v6280_v34 = vadd.f32 %v6259_v41, %v2810_v26  ;;  %v6294_v24 = vadd.f32 %v6259_v41, %v2813_v17  ;;  %v6298_v59 = vadd.f32 %v6259_v41, %v2815_v56 }
 0x3b5   : > { %v2853_v21 = vsel %vm1942_vm13, %v6273_v48, -inf  ;;  %v2850_v7 = vsel %vm1942_vm13, %v6277_v18, -inf  ;;  %v6301_v44 = vadd.f32 %v6259_v41, %v2814_v49  ;;  %v2818_v38 = vmul.f32 %v6253_v35, %v2800_v20 }
 0x3b6   : > { %v2847_v36 = vsel %vm1942_vm13, %v6280_v34, -inf  ;;  %v2856_v37 = vsel %vm1942_vm13, %v6294_v24, -inf  ;;  %v2862_v50 = vsel %vm1942_vm13, %v6298_v59, -inf  ;;  %v2817_v42 = vmul.f32 %v6253_v35, %v2799_v14 }
 0x3b7   : > { %2497 = vperm.xlu2 %4466, %v2447_v25   ;;  %v2859_v43 = vsel %vm1942_vm13, %v6301_v44, -inf }
 0x3b8   : > { %2492 = vperm.xlu1 %4465, %v2446_v3   ;;  %2487 = vperm.xlu0 %4464, %v2445_v51   ;;  %v6321_v51 = vadd.f32 %v6259_v41, %v2816_v32 }
 0x3bf   : > { %2512 = vperm.xlu2 %4466, %v2450_v4   ;;  %v2801_v4 = vld [vmem:[%s4960_s25 + $0x50] sm:$0xff] }
 0x3c0   : > { %2507 = vperm.xlu1 %4465, %v2449_v13   ;;  %2502 = vperm.xlu0 %4464, %v2448_v23   ;;  %v6325_v13 = vadd.f32 %v6259_v41, %v2818_v38  ;;  %v6328_v23 = vadd.f32 %v6259_v41, %v2817_v42 }
 0x3c7   : > { %2527 = vperm.xlu2 %4466, %v2453_v40   ;;  %v2803_v40 = vld [vmem:[%s4960_s25 + $0x60] sm:$0xff] }
 0x3c8   : > { %2522 = vperm.xlu1 %4465, %v2452_v61   ;;  %2517 = vperm.xlu0 %4464, %v2451_v8   ;;  %v2802_v61 = vld [vmem:[%s4960_s25 + $0x58] sm:$0xff]  ;;  %v2865_v8 = vsel %vm1942_vm13, %v6321_v51, -inf }
 0x3cf   : > { %2699 = vperm.xlu2 %4466, %v2680_v0   ;;  %v2819_v0 = vmul.f32 %v6253_v35, %v2801_v4 }
 0x3d0   : > { %2696 = vperm.xlu1 %4465, %v2679_v33   ;;  %2532 = vperm.xlu0 %4464, %v2454_v58   ;;  %v2871_v33 = vsel %vm1942_vm13, %v6325_v13, -inf  ;;  %v2868_v58 = vsel %vm1942_vm13, %v6328_v23, -inf }
 0x3d7   : > { %2708 = vperm.xlu2 %4466, %v2683_v53   ;;  %v2821_v53 = vmul.f32 %v6253_v35, %v2803_v40 }
 0x3d8   : > { %2705 = vperm.xlu1 %4465, %v2682_v27   ;;  %2702 = vperm.xlu0 %4464, %v2681_v28   ;;  %v2820_v27 = vmul.f32 %v6253_v35, %v2802_v61  ;;  %v6342_v28 = vadd.f32 %v6259_v41, %v2819_v0 }
 0x3df   : > { %2717 = vperm.xlu2 %4466, %v2686_v1  }
 0x3e0   : > { %2714 = vperm.xlu1 %4465, %v2685_v31   ;;  %2711 = vperm.xlu0 %4464, %v2684_v15   ;;  %v2804_v31 = vld [vmem:[%s4960_s25 + $0x68] sm:$0xff] }
 0x3e7   : > { %2726 = vperm.xlu2 %4466, %v2689_v22  }
 0x3e8   : > { %2723 = vperm.xlu1 %4465, %v2688_v6   ;;  %2720 = vperm.xlu0 %4464, %v2687_v52   ;;  %v6352_v6 = vadd.f32 %v6259_v41, %v2821_v53  ;;  %v6355_v52 = vadd.f32 %v6259_v41, %v2820_v27 }
 0x3ea   : > { %v2877_v5 = vsel %vm1942_vm13, %v6355_v52, -inf }
 0x3ef   : > { %2735 = vperm.xlu2 %4466, %v2692_v12   ;;  %v2806_v12 = vld [vmem:[%s4960_s25 + $0x78] sm:$0xff] }
 0x3f0   : > { %2732 = vperm.xlu1 %4465, %v2691_v16   ;;  %2729 = vperm.xlu0 %4464, %v2690_v45   ;;  %v2805_v16 = vld [vmem:[%s4960_s25 + $0x70] sm:$0xff]  ;;  %v2874_v45 = vsel %vm1942_vm13, %v6342_v28, -inf  ;;  %v2824_v29 = vmul.f32 %v6253_v35, %v2806_v12 }
 0x3f1   : > { %v2823_v60 = vmul.f32 %v6253_v35, %v2805_v16 }
 0x3f2   : > { %v6372_v11 = vadd.f32 %v6259_v41, %v2824_v29 }
 0x3f4   : > { %v2889_v47 = vsel %vm1942_vm13, %v6372_v11, -inf }
 0x3f8   : > { %2741 = vperm.xlu1 %4465, %v2694_v55   ;;  %2738 = vperm.xlu0 %4464, %v2693_v30   ;;  %v2822_v55 = vmul.f32 %v6253_v35, %v2804_v31  ;;  %v2880_v30 = vsel %vm1942_vm13, %v6352_v6, -inf }
 0x3fa   : > { %v6369_v9 = vadd.f32 %v6259_v41, %v2822_v55 }
 0x3fc   : > { %v2883_v35 = vsel %vm1942_vm13, %v6369_v9, -inf }
 0x401   : > { %v6314_v2 = vpop.permute.xlu2 %2477 }
 0x409   : > { %v6344_v1 = vpop.permute.xlu2 %2482 }
 0x411   : > { %v6377_v46 = vpop.permute.xlu2 %2497 }
 0x418   : > { %2845 = vmax.xlane.f32.xlu2 %v2844_v19  ;;  %v6375_v19 = vadd.f32 %v6259_v41, %v2823_v60 }
 0x419   : > { %v6389_v63 = vpop.permute.xlu2 %2512 }
 0x41a   : > { %v6316_v25 = vpop.permute.xlu1 %2467  ;;  %v6318_v3 = vpop.permute.xlu0 %2457  ;;  %v2886_v57 = vsel %vm1942_vm13, %v6375_v19, -inf }
 0x420   : > { %2854 = vmax.xlane.f32.xlu2 %v2853_v21 }
 0x422   : > { %2851 = vmax.xlane.f32.xlu1 %v2850_v7  ;;  %2848 = vmax.xlane.f32.xlu0 %v2847_v36  ;;  %v6347_v15 = vpop.permute.xlu1 %2472  ;;  %v6349_v22 = vpop.permute.xlu0 %2462 }
 0x423   : > { %v6395_v7 = vpop.permute.xlu2 %2527 }
 0x428   : > { %2857 = vmax.xlane.f32.xlu2 %v2856_v37 }
 0x42a   : > { %2863 = vmax.xlane.f32.xlu1 %v2862_v50  ;;  %2860 = vmax.xlane.f32.xlu0 %v2859_v43  ;;  %v6379_v62 = vpop.permute.xlu1 %2492  ;;  %v6381_v26 = vpop.permute.xlu0 %2487 }
 0x42b   : > { %v6401_v49 = vpop.permute.xlu2 %2699 }
 0x42c   : > { %vm2744_vm4 = vcmp.eq.s32.totalorder %v6401_v49, %v5111_v10 }
 0x430   : > { %2866 = vmax.xlane.f32.xlu2 %v2865_v8 }
 0x432   : > { %2872 = vmax.xlane.f32.xlu1 %v2871_v33  ;;  %2869 = vmax.xlane.f32.xlu0 %v2868_v58  ;;  %v6391_v21 = vpop.permute.xlu1 %2507  ;;  %v6393_v17 = vpop.permute.xlu0 %2502 }
 0x433   : > { %v6407_v14 = vpop.permute.xlu2 %2708 }
 0x434   : > { %vm2747_vm0 = vcmp.eq.s32.totalorder %v6407_v14, %v5111_v10 }
 0x438   : > { %2875 = vmax.xlane.f32.xlu2 %v2874_v45 }
 0x43a   : > { %2881 = vmax.xlane.f32.xlu1 %v2880_v30  ;;  %2878 = vmax.xlane.f32.xlu0 %v2877_v5  ;;  %v6397_v36 = vpop.permute.xlu1 %2522  ;;  %v6399_v56 = vpop.permute.xlu0 %2517 }
 0x43b   : > { %v6413_v50 = vpop.permute.xlu2 %2717 }
 0x43c   : > { %vm2750_vm11 = vcmp.eq.s32.totalorder %v6413_v50, %v5111_v10 }
 0x440   : > { %2884 = vmax.xlane.f32.xlu2 %v2883_v35 }
 0x442   : > { %2890 = vmax.xlane.f32.xlu1 %v2889_v47  ;;  %2887 = vmax.xlane.f32.xlu0 %v2886_v57  ;;  %v6403_v54 = vpop.permute.xlu1 %2696  ;;  %v6405_v20 = vpop.permute.xlu0 %2532 }
 0x443   : > { %v6419_v42 = vpop.permute.xlu2 %2726  ;;  %vm2743_vm2 = vcmp.eq.s32.totalorder %v6403_v54, %v5111_v10 }
 0x444   : > { %vm2753_vm12 = vcmp.eq.s32.totalorder %v6419_v42, %v5111_v10 }
 0x44a   : > { %v6409_v37 = vpop.permute.xlu1 %2705  ;;  %v6411_v32 = vpop.permute.xlu0 %2702 }
 0x44b   : > { %v6425_v61 = vpop.permute.xlu2 %2735  ;;  %vm2745_vm14 = vcmp.eq.s32.totalorder %v6411_v32, %v5111_v10  ;;  %vm2746_vm5 = vcmp.eq.s32.totalorder %v6409_v37, %v5111_v10 }
 0x44c   : > { %vm2756_vm10 = vcmp.eq.s32.totalorder %v6425_v61, %v5111_v10 }
 0x452   : > { %v6415_v43 = vpop.permute.xlu1 %2714  ;;  %v6417_v38 = vpop.permute.xlu0 %2711 }
 0x453   : > { %vm2748_vm9 = vcmp.eq.s32.totalorder %v6417_v38, %v5111_v10  ;;  %vm2749_vm1 = vcmp.eq.s32.totalorder %v6415_v43, %v5111_v10 }
 0x45a   : > { %v6421_v4 = vpop.permute.xlu1 %2723  ;;  %v6423_v40 = vpop.permute.xlu0 %2720 }
 0x45b   : > { %vm2751_vm8 = vcmp.eq.s32.totalorder %v6423_v40, %v5111_v10  ;;  %v2371_v40 = vld [vmem:[#allocation3 + $0x10] sm:$0xff]  ;;  %vm2752_vm15 = vcmp.eq.s32.totalorder %v6421_v4, %v5111_v10 }
 0x462   : > { %v6427_v8 = vpop.permute.xlu1 %2732  ;;  %v6429_v0 = vpop.permute.xlu0 %2729 }
 0x463   : > { %vm2754_vm6 = vcmp.eq.s32.totalorder %v6429_v0, %v5111_v10  ;;  %v2374_v0 = vld [vmem:[#allocation3 + $0x28] sm:$0xff]  ;;  %vm2755_vm3 = vcmp.eq.s32.totalorder %v6427_v8, %v5111_v10 }
 0x46a   : > { %v6435_v53 = vpop.permute.xlu1 %2741  ;;  %v6437_v27 = vpop.permute.xlu0 %2738 }
 0x46b   : > { %vm2757_vm7 = vcmp.eq.s32.totalorder %v6437_v27, %v5111_v10 }
 0x48b   : > { %v6431_v33 = vpop.xlane.xlu2 %2845 }
 0x48c   : > { %7611 = vst [vmem:[#allocation45_spill] sm:$0xff] %v6431_v33  ;;  %v2892_v58 = vsub.f32 %v6262_v39, %v6431_v33 }
 0x48e   : > { %v2908_v31 = vmul.f32 1.442695, %v2892_v58 }
 0x490   : > { %4468 = vpow2.f32 %v2908_v31 }
 0x493   : > { %v6439_v12 = vpop.xlane.xlu2 %2854 }
 0x494   : > { %7612 = vst [vmem:[#allocation46_spill] sm:$0xff] %v6439_v12  ;;  %v2895_v16 = vsub.f32 %v6273_v48, %v6439_v12 }
 0x495   : > { %v6443_v45 = vpop.xlane.xlu1 %2851  ;;  %v6445_v55 = vpop.xlane.xlu0 %2848 }
 0x496   : > { %7613 = vst [vmem:[#allocation47_spill] sm:$0xff] %v6443_v45  ;;  %v4469_v30 = vpop.eup %4468  ;;  %v2914_v5 = vmul.f32 1.442695, %v2895_v16  ;;  %v2894_v29 = vsub.f32 %v6277_v18, %v6443_v45  ;;  %v2893_v60 = vsub.f32 %v6280_v34, %v6445_v55 }
 0x497   : > { %7614 = vst [vmem:[#allocation48_spill] sm:$0xff] %v6445_v55  ;;  %v2940_v35 = vsel %vm1942_vm13, %v4469_v30, 0.0 }
 0x498   : > { %v2912_v47 = vmul.f32 1.442695, %v2894_v29  ;;  %v2910_v57 = vmul.f32 1.442695, %v2893_v60  ;;  %2941 = vadd.xlane.f32.xlu2 %v2940_v35  ;;  %4470 = vpow2.f32 %v2914_v5 }
 0x49a   : > { %4472 = vpow2.f32 %v2912_v47 }
 0x49b   : > { %v6452_v58 = vpop.xlane.xlu2 %2857  ;;  %4474 = vpow2.f32 %v2910_v57 }
 0x49c   : > { %7615 = vst [vmem:[#allocation49_spill] sm:$0xff] %v6452_v58  ;;  %v2896_v31 = vsub.f32 %v6294_v24, %v6452_v58 }
 0x49d   : > { %v6456_v16 = vpop.xlane.xlu1 %2863  ;;  %v6458_v12 = vpop.xlane.xlu0 %2860 }
 0x49e   : > { %7616 = vst [vmem:[#allocation50_spill] sm:$0xff] %v6456_v16  ;;  %v4471_v45 = vpop.eup %4470  ;;  %v2898_v33 = vsub.f32 %v6298_v59, %v6456_v16  ;;  %v2897_v30 = vsub.f32 %v6301_v44, %v6458_v12  ;;  %v2916_v29 = vmul.f32 1.442695, %v2896_v31 }
 0x49f   : > { %7617 = vst [vmem:[#allocation51_spill] sm:$0xff] %v6458_v12  ;;  %v2949_v5 = vsel %vm1942_vm13, %v4471_v45, 0.0 }
 0x4a0   : > { %v4473_v60 = vpop.eup %4472  ;;  %v2920_v35 = vmul.f32 1.442695, %v2898_v33  ;;  %v2918_v47 = vmul.f32 1.442695, %v2897_v30  ;;  %2950 = vadd.xlane.f32.xlu2 %v2949_v5  ;;  %4476 = vpow2.f32 %v2916_v29 }
 0x4a1   : > { %v4475_v57 = vpop.eup %4474  ;;  %v2946_v58 = vsel %vm1942_vm13, %v4473_v60, 0.0 }
 0x4a2   : > { %2947 = vadd.xlane.f32.xlu1 %v2946_v58  ;;  %v2943_v55 = vsel %vm1942_vm13, %v4475_v57, 0.0  ;;  %4478 = vpow2.f32 %v2918_v47 }
 0x4a3   : > { %2944 = vadd.xlane.f32.xlu0 %v2943_v55  ;;  %v6467_v16 = vpop.xlane.xlu2 %2866  ;;  %4480 = vpow2.f32 %v2920_v35 }
 0x4a4   : > { %7618 = vst [vmem:[#allocation52_spill] sm:$0xff] %v6467_v16  ;;  %v2899_v31 = vsub.f32 %v6321_v51, %v6467_v16 }
 0x4a5   : > { %v6471_v45 = vpop.xlane.xlu1 %2872  ;;  %v6473_v33 = vpop.xlane.xlu0 %2869 }
 0x4a6   : > { %7619 = vst [vmem:[#allocation53_spill] sm:$0xff] %v6471_v45  ;;  %v4477_v30 = vpop.eup %4476  ;;  %v2901_v29 = vsub.f32 %v6325_v13, %v6471_v45  ;;  %v2900_v58 = vsub.f32 %v6328_v23, %v6473_v33  ;;  %v2922_v5 = vmul.f32 1.442695, %v2899_v31 }
 0x4a7   : > { %7620 = vst [vmem:[#allocation54_spill] sm:$0xff] %v6473_v33  ;;  %v2952_v35 = vsel %vm1942_vm13, %v4477_v30, 0.0 }
 0x4a8   : > { %v4479_v60 = vpop.eup %4478  ;;  %v2926_v55 = vmul.f32 1.442695, %v2901_v29  ;;  %v2924_v47 = vmul.f32 1.442695, %v2900_v58  ;;  %4482 = vpow2.f32 %v2922_v5 }
 0x4a9   : > { %v4481_v57 = vpop.eup %4480  ;;  %v2955_v16 = vsel %vm1942_vm13, %v4479_v60, 0.0 }
 0x4aa   : > { %2956 = vadd.xlane.f32.xlu1 %v2955_v16  ;;  %v2958_v12 = vsel %vm1942_vm13, %v4481_v57, 0.0  ;;  %4484 = vpow2.f32 %v2924_v47 }
 0x4ab   : > { %2959 = vadd.xlane.f32.xlu2 %v2958_v12  ;;  %2953 = vadd.xlane.f32.xlu0 %v2952_v35  ;;  %v6482_v45 = vpop.xlane.xlu2 %2875  ;;  %4486 = vpow2.f32 %v2926_v55 }
 0x4ac   : > { %7621 = vst [vmem:[#allocation55_spill] sm:$0xff] %v6482_v45  ;;  %v2902_v31 = vsub.f32 %v6342_v28, %v6482_v45 }
 0x4ad   : > { %v6486_v29 = vpop.xlane.xlu1 %2881  ;;  %v6488_v58 = vpop.xlane.xlu0 %2878 }
 0x4ae   : > { %7622 = vst [vmem:[#allocation56_spill] sm:$0xff] %v6486_v29  ;;  %v4483_v30 = vpop.eup %4482  ;;  %v2904_v5 = vsub.f32 %v6352_v6, %v6486_v29  ;;  %v2903_v16 = vsub.f32 %v6355_v52, %v6488_v58  ;;  %v2928_v60 = vmul.f32 1.442695, %v2902_v31 }
 0x4af   : > { %7623 = vst [vmem:[#allocation57_spill] sm:$0xff] %v6488_v58  ;;  %v2961_v55 = vsel %vm1942_vm13, %v4483_v30, 0.0 }
 0x4b0   : > { %v4485_v12 = vpop.eup %4484  ;;  %v2932_v47 = vmul.f32 1.442695, %v2904_v5  ;;  %v2930_v35 = vmul.f32 1.442695, %v2903_v16  ;;  %4488 = vpow2.f32 %v2928_v60 }
 0x4b1   : > { %v4487_v57 = vpop.eup %4486  ;;  %v2964_v45 = vsel %vm1942_vm13, %v4485_v12, 0.0 }
 0x4b2   : > { %2965 = vadd.xlane.f32.xlu1 %v2964_v45  ;;  %v2967_v33 = vsel %vm1942_vm13, %v4487_v57, 0.0  ;;  %4490 = vpow2.f32 %v2930_v35 }
 0x4b3   : > { %2968 = vadd.xlane.f32.xlu2 %v2967_v33  ;;  %2962 = vadd.xlane.f32.xlu0 %v2961_v55  ;;  %v6497_v29 = vpop.xlane.xlu2 %2884  ;;  %4492 = vpow2.f32 %v2932_v47 }
 0x4b4   : > { %7624 = vst [vmem:[#allocation58_spill] sm:$0xff] %v6497_v29  ;;  %v2905_v31 = vsub.f32 %v6369_v9, %v6497_v29 }
 0x4b5   : > { %v6501_v5 = vpop.xlane.xlu1 %2890  ;;  %v6503_v16 = vpop.xlane.xlu0 %2887 }
 0x4b6   : > { %7625 = vst [vmem:[#allocation59_spill] sm:$0xff] %v6501_v5  ;;  %v4489_v30 = vpop.eup %4488  ;;  %v2907_v60 = vsub.f32 %v6372_v11, %v6501_v5  ;;  %v2906_v45 = vsub.f32 %v6375_v19, %v6503_v16  ;;  %v2934_v12 = vmul.f32 1.442695, %v2905_v31 }
 0x4b7   : > { %v2970_v47 = vsel %vm1942_vm13, %v4489_v30, 0.0 }
 0x4b8   : > { %v4491_v33 = vpop.eup %4490  ;;  %v2938_v35 = vmul.f32 1.442695, %v2907_v60  ;;  %v2936_v55 = vmul.f32 1.442695, %v2906_v45  ;;  %4494 = vpow2.f32 %v2934_v12  ;;  %v4820_v45 = vmov 0.0  }
 0x4b9   : > { %v4493_v57 = vpop.eup %4492  ;;  %v2973_v29 = vsel %vm1942_vm13, %v4491_v33, 0.0  ;;  %v6525_v49 = vsel %vm2743_vm2, 1.0, %v4820_v45  ;;  %v6528_v54 = vsel %vm2745_vm14, 1.0, %v4820_v45  ;;  %v6552_v14 = vsel %vm2748_vm9, 1.0, %v4820_v45 }
 0x4ba   : > { %2974 = vadd.xlane.f32.xlu1 %v2973_v29  ;;  %v2976_v58 = vsel %vm1942_vm13, %v4493_v57, 0.0  ;;  %4496 = vpow2.f32 %v2936_v55  ;;  %v3036_v33 = vmul.f32 %v6525_v49, %v6262_v39  ;;  %v6544_v55 = vsel %vm2747_vm0, 1.0, %v4820_v45  ;;  %7627 = vst [vmem:[#allocation61_spill] sm:$0xff] %v6552_v14 }
 0x4bb   : > { %2977 = vadd.xlane.f32.xlu2 %v2976_v58  ;;  %2971 = vadd.xlane.f32.xlu0 %v2970_v47  ;;  %4498 = vpow2.f32 %v2938_v35  ;;  %v6521_v58 = vsel %vm2744_vm4, 1.0, %v4820_v45  ;;  %7626 = vst [vmem:[#allocation60_spill] sm:$0xff] %v6544_v55  ;;  %v6549_v39 = vsel %vm2746_vm5, 1.0, %v4820_v45  ;;  %v3040_v37 = vmul.f32 %v6544_v55, %v6294_v24 }
 0x4bc   : > { %v3037_v32 = vmul.f32 %v6521_v58, %v6280_v34  ;;  %v3052_v34 = vsel %vm1942_vm13, %v3036_v33, 0.0  ;;  %v3041_v38 = vmul.f32 %v6552_v14, %v6301_v44  ;;  %v3039_v47 = vmul.f32 %v6549_v39, %v6273_v48  ;;  %v2417_v48 = vld [vmem:[%s7353_s9] sm:$0x1]  ;;  %v2372_v33 = vld [vmem:[#allocation3 + $0x18] sm:$0xff] }
 0x4bd   : > { %v3064_v57 = vsel %vm1942_vm13, %v3040_v37, 0.0  ;;  %v6576_v50 = vsel %vm2749_vm1, 1.0, %v4820_v45  ;;  %v6579_v43 = vsel %vm2751_vm8, 1.0, %v4820_v45  ;;  %4500 = vlog2.f32 %v2417_v48  ;;  %v2373_v48 = vld [vmem:[#allocation3 + $0x20] sm:$0xff] }
 0x4be   : > { %v4495_v5 = vpop.eup %4494  ;;  %v3055_v35 = vsel %vm1942_vm13, %v3037_v32, 0.0  ;;  %v3067_v24 = vsel %vm1942_vm13, %v3041_v38, 0.0  ;;  %v3061_v44 = vsel %vm1942_vm13, %v3039_v47, 0.0  ;;  %7629 = vst [vmem:[#allocation63_spill] sm:$0xff] %v6576_v50  ;;  %4502 = vlog2.f32 %v2371_v40 }
 0x4bf   : > { %v2979_v30 = vsel %vm1942_vm13, %v4495_v5, 0.0  ;;  %v3038_v5 = vmul.f32 %v6528_v54, %v6277_v18  ;;  %7630 = vst [vmem:[#allocation64_spill] sm:$0xff] %v6579_v43  ;;  %v6595_v32 = vsel %vm2753_vm12, 1.0, %v4820_v45  ;;  %v6600_v42 = vsel %vm2752_vm15, 1.0, %v4820_v45 }
 0x4c0   : > { %v4497_v31 = vpop.eup %4496  ;;  %7631 = vst [vmem:[#allocation65_spill] sm:$0xff] %v6595_v32  ;;  %v3045_v38 = vmul.f32 %v6600_v42, %v6325_v13  ;;  %v6619_v13 = vsel %vm2756_vm10, 1.0, %v4820_v45  ;;  %v6626_v8 = vsel %vm2755_vm3, 1.0, %v4820_v45  ;;  %v6629_v27 = vsel %vm2757_vm7, 1.0, %v4820_v45 }
 0x4c1   : > { %v4499_v29 = vpop.eup %4498  ;;  %v2982_v60 = vsel %vm1942_vm13, %v4497_v31, 0.0  ;;  %v3058_v18 = vsel %vm1942_vm13, %v3038_v5, 0.0  ;;  %v6568_v31 = vsel %vm2750_vm11, 1.0, %v4820_v45  ;;  %7632 = vst [vmem:[#allocation66_spill] sm:$0xff] %v6600_v42  ;;  %v6603_v5 = vsel %vm2754_vm6, 1.0, %v4820_v45  ;;  %v2611_v42 = vld [vmem:[#allocation5 + $0x60] sm:$0xff] }
 0x4c2   : > { %2983 = vadd.xlane.f32.xlu1 %v2982_v60  ;;  %v2985_v12 = vsel %vm1942_vm13, %v4499_v29, 0.0  ;;  %7628 = vst [vmem:[#allocation62_spill] sm:$0xff] %v6568_v31  ;;  %v2369_v29 = vld [vmem:[#allocation3] sm:$0xff]  ;;  %v3044_v60 = vmul.f32 %v6579_v43, %v6328_v23  ;;  %v3047_v37 = vmul.f32 %v6603_v5, %v6355_v52  ;;  %v3079_v61 = vsel %vm1942_vm13, %v3045_v38, 0.0 }
 0x4c3   : > { %2986 = vadd.xlane.f32.xlu2 %v2985_v12  ;;  %2980 = vadd.xlane.f32.xlu0 %v2979_v30  ;;  %v3043_v30 = vmul.f32 %v6568_v31, %v6321_v51  ;;  %v3042_v12 = vmul.f32 %v6576_v50, %v6298_v59  ;;  %4504 = vlog2.f32 %v2369_v29  ;;  %7633 = vst [vmem:[#allocation67_spill] sm:$0xff] %v6603_v5  ;;  %v4501_v4 = vpop.eup %4500  ;;  %v2608_v5 = vld [vmem:[#allocation5 + $0x48] sm:$0xff]  ;;  %v2614_v31 = vld [vmem:[#allocation5 + $0x78] sm:$0xff]  ;;  %vm7646_vm2 = vcmask 7168  }
 0x4c4   : > { %v3076_v23 = vsel %vm1942_vm13, %v3044_v60, 0.0  ;;  %4506 = vlog2.f32 %v2374_v0  ;;  %7634 = vst [vmem:[#allocation68_spill] sm:$0xff] %v6619_v13  ;;  %v3048_v0 = vmul.f32 %v6626_v8, %v6352_v6  ;;  %vm2758_vm4 = vcmp.eq.s32.totalorder %v6435_v53, %v5111_v10  ;;  %vm7647_vm14 = vmmov %vm7646_vm2 }
 0x4c5   : > { %v3073_v51 = vsel %vm1942_vm13, %v3043_v30, 0.0  ;;  %v3070_v59 = vsel %vm1942_vm13, %v3042_v12, 0.0  ;;  %4508 = vlog2.f32 %v2372_v33  ;;  %7635 = vst [vmem:[#allocation69_spill] sm:$0xff] %v6626_v8  ;;  %v2377_v30 = vld [vmem:[#allocation3 + $0x40] sm:$0xff]  ;;  %v2375_v12 = vld [vmem:[#allocation3 + $0x30] sm:$0xff]  ;;  %vm7651_vm0 = vmmov %vm7646_vm2 }
 0x4c6   : > { %7636 = vst [vmem:[#allocation70_spill] sm:$0xff] %v6629_v27  ;;  %v3088_v6 = vsel %vm1942_vm13, %v3048_v0, 0.0  ;;  %vm7652_vm5 = vmmov %vm7651_vm0 }
 0x4c7   : > { %vm7654_vm9 = vmmov %vm7651_vm0 }
 0x4c8   : > { %vm7657_vm11 = vmmov %vm7651_vm0 }
 0x4c9   : > { %vm7658_vm1 = vmmov %vm7651_vm0 }
 0x4ca   : > { %3056 = vadd.xlane.f32.xlu1 %v3055_v35  ;;  %v3046_v35 = vmul.f32 %v6595_v32, %v6342_v28  ;;  %v2563_v32 = vld [vmem:[#allocation4 + $0x60] sm:$0xff]  ;;  %vm7660_vm8 = vmmov %vm7651_vm0 }
 0x4cb   : > { %3059 = vadd.xlane.f32.xlu2 %v3058_v18  ;;  %3053 = vadd.xlane.f32.xlu0 %v3052_v34  ;;  %v4503_v18 = vpop.eup %4502  ;;  %v2370_v34 = vld [vmem:[#allocation3 + $0x8] sm:$0xff]  ;;  %vm7663_vm12 = vmmov %vm7651_vm0 }
 0x4cc   : > { %v4505_v47 = vpop.eup %4504  ;;  %v2390_v28 = vmul.f32 0.6931472, %v4503_v18  ;;  %4510 = vlog2.f32 %v2370_v34  ;;  %v3082_v52 = vsel %vm1942_vm13, %v3046_v35, 0.0  ;;  %vm7664_vm15 = vmmov %vm7651_vm0 }
 0x4cd   : > { %v4507_v29 = vpop.eup %4506  ;;  %4512 = vlog2.f32 %v2373_v48  ;;  %vm7666_vm6 = vmmov %vm7651_vm0 }
 0x4ce   : > { %4514 = vlog2.f32 %v2377_v30  ;;  %v2396_v35 = vmul.f32 0.6931472, %v4507_v29  ;;  %v2378_v29 = vld [vmem:[#allocation3 + $0x48] sm:$0xff]  ;;  %vm7669_vm10 = vmmov %vm7651_vm0 }
 0x4cf   : > { %4516 = vlog2.f32 %v2375_v12  ;;  %vm7670_vm3 = vmmov %vm7651_vm0 }
 0x4d0   : > { %vm7671_vm7 = vmmov %vm7651_vm0 }
 0x4d2   : > { %3065 = vadd.xlane.f32.xlu1 %v3064_v57  ;;  %v2419_v57 = vmul.f32 0.6931472, %v4501_v4  ;;  %v3050_v4 = vmul.f32 %v6629_v27, %v6375_v19 }
 0x4d3   : > { %3068 = vadd.xlane.f32.xlu2 %v3067_v24  ;;  %3062 = vadd.xlane.f32.xlu0 %v3061_v44  ;;  %v2386_v24 = vmul.f32 0.6931472, %v4505_v47  ;;  %v3085_v44 = vsel %vm1942_vm13, %v3047_v37, 0.0  ;;  %v6647_v47 = vsel %vm2758_vm4, 1.0, %v4820_v45  ;;  %vm7673_vm4 = vmmov %vm7651_vm0 }
 0x4d4   : > { %v6623_v40 = vperm.slane %v2419_v57, 0  ;;  %v3094_v19 = vsel %vm1942_vm13, %v3050_v4, 0.0  ;;  %7637 = vst [vmem:[#allocation71_spill] sm:$0xff] %v6647_v47  ;;  %v2380_v57 = vld [vmem:[#allocation3 + $0x58] sm:$0xff] }
 0x4d5   : > { %4518 = vlog2.f32 %v2380_v57  ;;  %v2381_v57 = vld [vmem:[#allocation3 + $0x60] sm:$0xff] }
 0x4d6   : > { %v2425_v60 = vsub.f32 %v2390_v28, %v6623_v40 }
 0x4d8   : > { %v2537_v18 = vadd.f32 %v6316_v25, %v2425_v60  ;;  %v3051_v60 = vmul.f32 %v6647_v47, %v6372_v11 }
 0x4da   : > { %3074 = vadd.xlane.f32.xlu1 %v3073_v51  ;;  %v3049_v51 = vmul.f32 %v6619_v13, %v6369_v9  ;;  %v3097_v11 = vsel %vm1942_vm13, %v3051_v60, 0.0 }
 0x4db   : > { %3077 = vadd.xlane.f32.xlu2 %v3076_v23  ;;  %3071 = vadd.xlane.f32.xlu0 %v3070_v59  ;;  %v4509_v23 = vpop.eup %4508  ;;  %v2423_v59 = vsub.f32 %v2386_v24, %v6623_v40  ;;  %v2376_v24 = vld [vmem:[#allocation3 + $0x38] sm:$0xff] }
 0x4dc   : > { %v4511_v33 = vpop.eup %4510  ;;  %v2392_v9 = vmul.f32 0.6931472, %v4509_v23  ;;  %v3091_v34 = vsel %vm1942_vm13, %v3049_v51, 0.0  ;;  %4520 = vlog2.f32 %v2376_v24 }
 0x4dd   : > { %v2535_v37 = vadd.f32 %v6318_v3, %v2423_v59  ;;  %v2388_v38 = vmul.f32 0.6931472, %v4511_v33  ;;  %v4513_v53 = vpop.eup %4512  ;;  %4522 = vlog2.f32 %v2378_v29 }
 0x4de   : > { %v4515_v28 = vpop.eup %4514  ;;  %v2426_v48 = vsub.f32 %v2392_v9, %v6623_v40  ;;  %v2394_v12 = vmul.f32 0.6931472, %v4513_v53  ;;  %v2383_v9 = vld [vmem:[#allocation3 + $0x70] sm:$0xff] }
 0x4df   : > { %v2424_v30 = vsub.f32 %v2388_v38, %v6623_v40  ;;  %v6656_v45 = vadd.f32 %v6259_v41, %v2535_v37  ;;  %v2402_v51 = vmul.f32 0.6931472, %v4515_v28  ;;  %v2379_v38 = vld [vmem:[#allocation3 + $0x50] sm:$0xff]  ;;  %4524 = vlog2.f32 %v2383_v9 }
 0x4e0   : > { %v2538_v0 = vadd.f32 %v6347_v15, %v2426_v48  ;;  %4526 = vlog2.f32 %v2379_v38 }
 0x4e1   : > { %v2536_v33 = vadd.f32 %v6349_v22, %v2424_v30  ;;  %v2431_v37 = vsub.f32 %v2402_v51, %v6623_v40  ;;  %4528 = vlog2.f32 %v2381_v57 }
 0x4e2   : > { %3083 = vadd.xlane.f32.xlu1 %v3082_v52  ;;  %v2428_v52 = vsub.f32 %v2396_v35, %v6623_v40  ;;  %v3172_v35 = vsel %vm1942_vm13, %v6656_v45, -inf  ;;  %v6675_v28 = vadd.f32 %v6259_v41, %v2538_v0 }
 0x4e3   : > { %3086 = vadd.xlane.f32.xlu2 %v3085_v44  ;;  %3080 = vadd.xlane.f32.xlu0 %v3079_v61  ;;  %v6651_v44 = vadd.f32 %v6259_v41, %v2537_v18  ;;  %v4517_v61 = vpop.eup %4516  ;;  %v2427_v18 = vsub.f32 %v2394_v12, %v6623_v40  ;;  %v2543_v30 = vadd.f32 %v6377_v46, %v2431_v37 }
 0x4e4   : > { %v2540_v23 = vadd.f32 %v6344_v1, %v2428_v52  ;;  %v2398_v59 = vmul.f32 0.6931472, %v4517_v61  ;;  %v6678_v52 = vadd.f32 %v6259_v41, %v2536_v33 }
 0x4e5   : > { %v3178_v4 = vsel %vm1942_vm13, %v6651_v44, -inf  ;;  %v2539_v61 = vadd.f32 %v6314_v2, %v2427_v18 }
 0x4e6   : > { %v2429_v53 = vsub.f32 %v2398_v59, %v6623_v40  ;;  %v3175_v59 = vsel %vm1942_vm13, %v6678_v52, -inf }
 0x4e7   : > { %v6694_v18 = vadd.f32 %v6259_v41, %v2539_v61 }
 0x4e8   : > { %v2541_v12 = vadd.f32 %v6381_v26, %v2429_v53 }
 0x4e9   : > { %v3184_v61 = vsel %vm1942_vm13, %v6694_v18, -inf }
 0x4ea   : > { %3092 = vadd.xlane.f32.xlu1 %v3091_v34  ;;  %v4519_v34 = vpop.eup %4518  ;;  %v6699_v38 = vadd.f32 %v6259_v41, %v2541_v12 }
 0x4eb   : > { %3095 = vadd.xlane.f32.xlu2 %v3094_v19  ;;  %3089 = vadd.xlane.f32.xlu0 %v3088_v6  ;;  %v6671_v19 = vadd.f32 %v6259_v41, %v2540_v23  ;;  %v4521_v6 = vpop.eup %4520  ;;  %v2408_v48 = vmul.f32 0.6931472, %v4519_v34  ;;  %v3181_v23 = vsel %vm1942_vm13, %v6675_v28, -inf }
 0x4ec   : > { %v4523_v24 = vpop.eup %4522  ;;  %v2400_v29 = vmul.f32 0.6931472, %v4521_v6  ;;  %v3190_v12 = vsel %vm1942_vm13, %v6699_v38, -inf }
 0x4ed   : > { %v3187_v60 = vsel %vm1942_vm13, %v6671_v19, -inf  ;;  %v2404_v51 = vmul.f32 0.6931472, %v4523_v24  ;;  %v4525_v0 = vpop.eup %4524  ;;  %v2434_v33 = vsub.f32 %v2408_v48, %v6623_v40 }
 0x4ee   : > { %v4527_v9 = vpop.eup %4526  ;;  %v2430_v34 = vsub.f32 %v2400_v29, %v6623_v40  ;;  %v2414_v53 = vmul.f32 0.6931472, %v4525_v0 }
 0x4ef   : > { %v2432_v37 = vsub.f32 %v2404_v51, %v6623_v40  ;;  %v4529_v6 = vpop.eup %4528  ;;  %v2546_v57 = vadd.f32 %v6389_v63, %v2434_v33  ;;  %v2406_v24 = vmul.f32 0.6931472, %v4527_v9  ;;  %v2551_v51 = vld [vmem:[#allocation4] sm:$0xff] }
 0x4f1   : > { %v2544_v29 = vadd.f32 %v6393_v17, %v2432_v37  ;;  %v6712_v0 = vadd.f32 %v6259_v41, %v2546_v57 }
 0x4f2   : > { %3179 = vmax.xlane.f32.xlu1 %v3178_v4  ;;  %v2382_v4 = vld [vmem:[#allocation3 + $0x68] sm:$0xff] }
 0x4f3   : > { %3173 = vmax.xlane.f32.xlu2 %v3172_v35  ;;  %3098 = vadd.xlane.f32.xlu0 %v3097_v11  ;;  %v2384_v35 = vld [vmem:[#allocation3 + $0x78] sm:$0xff]  ;;  %v6691_v11 = vadd.f32 %v6259_v41, %v2543_v30  ;;  %4530 = vlog2.f32 %v2382_v4  ;;  %v2542_v30 = vadd.f32 %v6379_v62, %v2430_v34  ;;  %v2437_v4 = vsub.f32 %v2414_v53, %v6623_v40 }
 0x4f4   : > { %4532 = vlog2.f32 %v2384_v35  ;;  %7638 = vst [vmem:[#allocation72_spill] sm:$0xff] %v6712_v0  ;;  %v2433_v35 = vsub.f32 %v2406_v24, %v6623_v40  ;;  %v6717_v34 = vadd.f32 %v6259_v41, %v2544_v29  ;;  %v3205_v57 = vsel %vm1942_vm13, %v6712_v0, -inf }
 0x4f5   : > { %v3196_v48 = vsel %vm1942_vm13, %v6691_v11, -inf  ;;  %v6720_v37 = vadd.f32 %v6259_v41, %v2542_v30  ;;  %4534 = vlog2.f32 %v2551_v51  ;;  %v2554_v51 = vld [vmem:[#allocation4 + $0x18] sm:$0xff] }
 0x4f6   : > { %v3199_v29 = vsel %vm1942_vm13, %v6717_v34, -inf }
 0x4f7   : > { %v3193_v30 = vsel %vm1942_vm13, %v6720_v37, -inf }
 0x4fa   : > { %3188 = vmax.xlane.f32.xlu1 %v3187_v60  ;;  %v2410_v60 = vmul.f32 0.6931472, %v4529_v6  ;;  %v2549_v6 = vadd.f32 %v6395_v7, %v2437_v4  ;;  %v2602_v4 = vld [vmem:[#allocation5 + $0x18] sm:$0xff] }
 0x4fb   : > { %3182 = vmax.xlane.f32.xlu2 %v3181_v23  ;;  %3176 = vmax.xlane.f32.xlu0 %v3175_v59  ;;  %v4531_v23 = vpop.eup %4530  ;;  %v2599_v59 = vld [vmem:[#allocation5] sm:$0xff] }
 0x4fc   : > { %v4533_v33 = vpop.eup %4532  ;;  %v2435_v9 = vsub.f32 %v2410_v60, %v6623_v40  ;;  %4536 = vlog2.f32 %v2599_v59 }
 0x4fd   : > { %v2416_v53 = vmul.f32 0.6931472, %v4533_v33  ;;  %4538 = vlog2.f32 %v2554_v51 }
 0x4fe   : > { %v2547_v24 = vadd.f32 %v6399_v56, %v2435_v9  ;;  %4540 = vlog2.f32 %v2602_v4 }
 0x500   : > { %v6739_v9 = vadd.f32 %v6259_v41, %v2547_v24 }
 0x502   : > { %3197 = vmax.xlane.f32.xlu1 %v3196_v48  ;;  %v2412_v48 = vmul.f32 0.6931472, %v4531_v23  ;;  %v6734_v23 = vadd.f32 %v6259_v41, %v2549_v6  ;;  %7640 = vst [vmem:[#allocation74_spill] sm:$0xff] %v6739_v9 }
 0x503   : > { %3191 = vmax.xlane.f32.xlu2 %v3190_v12  ;;  %3185 = vmax.xlane.f32.xlu0 %v3184_v61  ;;  %v2545_v61 = vadd.f32 %v6391_v21, %v2433_v35  ;;  %v4535_v12 = vpop.eup %4534  ;;  %v2438_v35 = vsub.f32 %v2416_v53, %v6623_v40 }
 0x504   : > { %7639 = vst [vmem:[#allocation73_spill] sm:$0xff] %v6734_v23  ;;  %v4537_v59 = vpop.eup %4536  ;;  %v2436_v33 = vsub.f32 %v2412_v48, %v6623_v40  ;;  %v3214_v6 = vsel %vm1942_vm13, %v6734_v23, -inf  ;;  %v3208_v40 = vsel %vm1942_vm13, %v6739_v9, -inf }
 0x505   : > { %v2550_v47 = vadd.f32 %v6405_v20, %v2438_v35 }
 0x506   : > { %v2548_v10 = vadd.f32 %v6397_v36, %v2436_v33 }
 0x507   : > { %v6757_v33 = vadd.f32 %v6259_v41, %v2550_v47  ;;  %v2560_v47 = vld [vmem:[#allocation4 + $0x48] sm:$0xff] }
 0x508   : > { %v6760_v35 = vadd.f32 %v6259_v41, %v2548_v10 }
 0x509   : > { %7642 = vst [vmem:[#allocation76_spill] sm:$0xff] %v6757_v33  ;;  %v3217_v13 = vsel %vm1942_vm13, %v6757_v33, -inf }
 0x50a   : > { %3206 = vmax.xlane.f32.xlu1 %v3205_v57  ;;  %v6742_v57 = vadd.f32 %v6259_v41, %v2545_v61  ;;  %v2557_v61 = vld [vmem:[#allocation4 + $0x30] sm:$0xff]  ;;  %7643 = vst [vmem:[#allocation77_spill] sm:$0xff] %v6760_v35 }
 0x50b   : > { %3200 = vmax.xlane.f32.xlu2 %v3199_v29  ;;  %3194 = vmax.xlane.f32.xlu0 %v3193_v30  ;;  %v6731_v60 = vpop.xlane.xlu2 %2941  ;;  %v2568_v29 = vmul.f32 0.6931472, %v4535_v12  ;;  %v2616_v30 = vmul.f32 0.6931472, %v4537_v59  ;;  %v4539_v12 = vpop.eup %4538  ;;  %v2605_v59 = vld [vmem:[#allocation5 + $0x30] sm:$0xff]  ;;  %4542 = vlog2.f32 %v2557_v61 }
 0x50c   : > { %7641 = vst [vmem:[#allocation75_spill] sm:$0xff] %v6742_v57  ;;  %v3202_v48 = vsel %vm1942_vm13, %v6742_v57, -inf  ;;  %v2574_v27 = vmul.f32 0.6931472, %v4539_v12  ;;  %4544 = vlog2.f32 %v2605_v59 }
 0x50d   : > { %v2647_v51 = vsub.f32 %v2568_v29, %v2616_v30  ;;  %v3211_v29 = vsel %vm1942_vm13, %v6760_v35, -inf  ;;  %4546 = vlog2.f32 %v2560_v47 }
 0x50e   : > { %4548 = vlog2.f32 %v2608_v5 }
 0x50f   : > { %4550 = vlog2.f32 %v2563_v32 }
 0x510   : > { %4552 = vlog2.f32 %v2611_v42 }
 0x512   : > { %3215 = vmax.xlane.f32.xlu1 %v3214_v6  ;;  %v4541_v6 = vpop.eup %4540 }
 0x513   : > { %3209 = vmax.xlane.f32.xlu2 %v3208_v40  ;;  %3203 = vmax.xlane.f32.xlu0 %v3202_v48  ;;  %v6752_v53 = vpop.xlane.xlu2 %2950  ;;  %v2663_v40 = vadd.f32 %v2647_v51, %v6318_v3  ;;  %v2622_v48 = vmul.f32 0.6931472, %v4541_v6  ;;  %v4543_v10 = vpop.eup %4542 }
 0x514   : > { %v4545_v51 = vpop.eup %4544  ;;  %v2580_v6 = vmul.f32 0.6931472, %v4543_v10 }
 0x515   : > { %v6754_v24 = vpop.xlane.xlu1 %2947  ;;  %v2650_v8 = vsub.f32 %v2574_v27, %v2622_v48  ;;  %v6772_v3 = vadd.f32 %v6259_v41, %v2663_v40  ;;  %v4547_v48 = vpop.eup %4546 }
 0x516   : > { %v2945_v4 = vpop.xlane.xlu0 %2944  ;;  %v2586_v47 = vmul.f32 0.6931472, %v4547_v48 }
 0x517   : > { %v2666_v59 = vadd.f32 %v2650_v8, %v6347_v15  ;;  %v4549_v15 = vpop.eup %4548 }
 0x518   : > { %v2634_v10 = vmul.f32 0.6931472, %v4549_v15 }
 0x519   : > { %v6784_v5 = vadd.f32 %v6259_v41, %v2666_v59 }
 0x51a   : > { %v2656_v23 = vsub.f32 %v2586_v47, %v2634_v10 }
 0x51b   : > { %3218 = vmax.xlane.f32.xlu2 %v3217_v13  ;;  %3212 = vmax.xlane.f32.xlu0 %v3211_v29  ;;  %v2628_v13 = vmul.f32 0.6931472, %v4545_v51  ;;  %v3500_v29 = vsel %vm1942_vm13, %v6772_v3, -inf  ;;  %v3509_v51 = vsel %vm1942_vm13, %v6784_v5, -inf }
 0x51d   : > { %v6767_v30 = vpop.xlane.xlu1 %2956  ;;  %v2653_v33 = vsub.f32 %v2580_v6, %v2628_v13  ;;  %v4551_v13 = vpop.eup %4550 }
 0x51e   : > { %v2954_v61 = vpop.xlane.xlu0 %2953  ;;  %v6769_v12 = vpop.xlane.xlu2 %2959  ;;  %v2592_v48 = vmul.f32 0.6931472, %v4551_v13 }
 0x51f   : > { %v2669_v8 = vadd.f32 %v2653_v33, %v6381_v26  ;;  %v6798_v26 = vld [vmem:[%s7352_s8] ss:$0 sm:$0xff]  ;;  %v4553_v42 = vpop.eup %4552  ;;  %v2672_v33 = vadd.f32 %v2656_v23, %v6393_v17 }
 0x520   : > { %v2640_v15 = vmul.f32 0.6931472, %v4553_v42 }
 0x521   : > { %v6801_v32 = vadd.f32 %v6798_v26, %v2669_v8  ;;  %v6815_v17 = vadd.f32 %v6798_v26, %v2672_v33 }
 0x522   : > { %v2659_v35 = vsub.f32 %v2592_v48, %v2640_v15  ;;  %v7644_v15 = vld [vmem:[#allocation48_spill] sm:$0xff] }
 0x523   : > { %3501 = vmax.xlane.f32.xlu2 %v3500_v29  ;;  %v2566_v29 = vld [vmem:[#allocation4 + $0x78] sm:$0xff]  ;;  %v3518_v47 = vsel %vm1942_vm13, %v6801_v32, -inf  ;;  %v3527_v48 = vsel %vm1942_vm13, %v6815_v17, -inf }
 0x524   : > { %4554 = vlog2.f32 %v2566_v29 }
 0x525   : > { %v6777_v27 = vpop.xlane.xlu1 %2965  ;;  %4556 = vlog2.f32 %v2945_v4 }
 0x526   : > { %v6779_v43 = vpop.xlane.xlu0 %2962  ;;  %v6781_v40 = vpop.xlane.xlu2 %2968  ;;  %4558 = vlog2.f32 %v6731_v60 }
 0x527   : > { %4560 = vlog2.f32 %v2614_v31 }
 0x528   : > { %4562 = vlog2.f32 %v6754_v24  ;;  %v2675_v24 = vadd.f32 %v2659_v35, %v6399_v56 }
 0x529   : > { %4564 = vlog2.f32 %v6752_v53  ;;  %v7645_v53 = vld [vmem:[#allocation45_spill] sm:$0xff] }
 0x52a   : > { %v4555_v10 = vpop.eup %4554  ;;  %4566 = vlog2.f32 %v2954_v61  ;;  %v6825_v35 = vadd.f32 %v6798_v26, %v2675_v24 }
 0x52b   : > { %3510 = vmax.xlane.f32.xlu2 %v3509_v51  ;;  %v4557_v51 = vpop.eup %4556  ;;  %4568 = vlog2.f32 %v6767_v30 }
 0x52c   : > { %v4559_v8 = vpop.eup %4558  ;;  %v2991_v23 = vmul.f32 0.6931472, %v4557_v51  ;;  %4570 = vlog2.f32 %v6769_v12  ;;  %v3536_v24 = vsel %vm1942_vm13, %v6825_v35, -inf }
 0x52d   : > { %v6789_v6 = vpop.xlane.xlu1 %2974  ;;  %v4561_v31 = vpop.eup %4560  ;;  %v2989_v13 = vmul.f32 0.6931472, %v4559_v8  ;;  %4572 = vlog2.f32 %v6779_v43 }
 0x52e   : > { %v6791_v41 = vpop.xlane.xlu0 %2971  ;;  %v6793_v59 = vpop.xlane.xlu2 %2977  ;;  %v2646_v9 = vmul.f32 0.6931472, %v4561_v31  ;;  %v3021_v33 = vadd.f32 %v2991_v23, %v7644_v15  ;;  %4574 = vlog2.f32 %v6777_v27 }
 0x52f   : > { %v4563_v42 = vpop.eup %4562  ;;  %v3020_v51 = vadd.f32 %v2989_v13, %v7645_v53  ;;  %v7648_v13 = vld [vmem:[#allocation47_spill] sm:$0xff]  ;;  %4576 = vlog2.f32 %v6781_v40 }
 0x530   : > { %v4565_v50 = vpop.eup %4564  ;;  %v2993_v14 = vmul.f32 0.6931472, %v4563_v42  ;;  %4578 = vlog2.f32 %v6791_v41 }
 0x531   : > { %v4567_v61 = vpop.eup %4566  ;;  %v2995_v31 = vmul.f32 0.6931472, %v4565_v50  ;;  %v7649_v50 = vld [vmem:[#allocation49_spill] sm:$0xff]  ;;  %4580 = vlog2.f32 %v6789_v6 }
 0x532   : > { %v2997_v23 = vmul.f32 0.6931472, %v4567_v61  ;;  %4582 = vlog2.f32 %v6793_v59 }
 0x533   : > { %3519 = vmax.xlane.f32.xlu2 %v3518_v47  ;;  %v2598_v47 = vmul.f32 0.6931472, %v4555_v10 }
 0x534   : > { %v3024_v12 = vadd.f32 %v2997_v23, %v7649_v50 }
 0x535   : > { %v6808_v29 = vpop.xlane.xlu1 %2983  ;;  %v2662_v8 = vsub.f32 %v2598_v47, %v2646_v9  ;;  %v4569_v9 = vpop.eup %4568 }
 0x536   : > { %v6810_v4 = vpop.xlane.xlu0 %2980  ;;  %v6812_v60 = vpop.xlane.xlu2 %2986 }
 0x537   : > { %v4571_v43 = vpop.eup %4570  ;;  %4584 = vlog2.f32 %v6810_v4 }
 0x538   : > { %4586 = vlog2.f32 %v6808_v29 }
 0x539   : > { %4588 = vlog2.f32 %v6812_v60 }
 0x53b   : > { %3528 = vmax.xlane.f32.xlu2 %v3527_v48  ;;  %v3022_v48 = vadd.f32 %v2993_v14, %v7648_v13 }
 0x53d   : > { %v3057_v0 = vpop.xlane.xlu1 %3056 }
 0x53e   : > { %v3101_v55 = vsub.f32 %v3021_v33, %v3057_v0  ;;  %v3054_v57 = vpop.xlane.xlu0 %3053  ;;  %v3060_v56 = vpop.xlane.xlu2 %3059  ;;  %v2678_v0 = vadd.f32 %v2662_v8, %v6405_v20  ;;  %v7650_v33 = vld [vmem:[#allocation46_spill] sm:$0xff] }
 0x53f   : > { %v3100_v10 = vsub.f32 %v3020_v51, %v3054_v57  ;;  %v3102_v15 = vsub.f32 %v3022_v48, %v3060_v56  ;;  %v2999_v57 = vmul.f32 0.6931472, %v4569_v9  ;;  %v3023_v53 = vadd.f32 %v2995_v31, %v7650_v33  ;;  %v4573_v51 = vpop.eup %4572  ;;  %v7653_v31 = vld [vmem:[#allocation51_spill] sm:$0xff] }
 0x540   : > { %v3117_v30 = vsel %vm7646_vm2, %v3101_v55, 0.0  ;;  %v6839_v20 = vadd.f32 %v6798_v26, %v2678_v0  ;;  %v4575_v48 = vpop.eup %4574  ;;  %vm7674_vm2 = vmmov %vm7651_vm0 }
 0x541   : > { %v3116_v42 = vsel %vm7647_vm14, %v3100_v10, 0.0  ;;  %v3119_v8 = vsel %vm7651_vm0, %v3102_v15, 0.0  ;;  %v3025_v13 = vadd.f32 %v2999_v57, %v7653_v31  ;;  %v4577_v41 = vpop.eup %4576  ;;  %vm7701_vm14 = vmmov %vm7651_vm0 }
 0x542   : > { %v3118_v47 = vadd.f32 %v3117_v30, %v3116_v42  ;;  %v3001_v30 = vmul.f32 0.6931472, %v4571_v43  ;;  %v3003_v42 = vmul.f32 0.6931472, %v4573_v51  ;;  %v3545_v0 = vsel %vm1942_vm13, %v6839_v20, -inf  ;;  %v4579_v57 = vpop.eup %4578 }
 0x543   : > { %3537 = vmax.xlane.f32.xlu2 %v3536_v24  ;;  %v4581_v31 = vpop.eup %4580 }
 0x544   : > { %v3120_v27 = vadd.f32 %v3119_v8, %v3118_v47  ;;  %v3005_v47 = vmul.f32 0.6931472, %v4575_v48 }
 0x545   : > { %v3066_v55 = vpop.xlane.xlu1 %3065 }
 0x546   : > { %v3063_v14 = vpop.xlane.xlu0 %3062  ;;  %v3069_v61 = vpop.xlane.xlu2 %3068  ;;  %v3104_v56 = vsub.f32 %v3024_v12, %v3066_v55  ;;  %v7655_v55 = vld [vmem:[#allocation52_spill] sm:$0xff]  ;;  %v7656_v12 = vld [vmem:[#allocation50_spill] sm:$0xff] }
 0x547   : > { %v3103_v10 = vsub.f32 %v3023_v53, %v3063_v14  ;;  %v3105_v24 = vsub.f32 %v3025_v13, %v3069_v61  ;;  %v3027_v50 = vadd.f32 %v3003_v42, %v7655_v55  ;;  %v3026_v33 = vadd.f32 %v3001_v30, %v7656_v12 }
 0x548   : > { %v3123_v40 = vsel %vm7654_vm9, %v3104_v56, 0.0  ;;  %v3007_v56 = vmul.f32 0.6931472, %v4577_v41  ;;  %vm7704_vm9 = vmmov %vm7651_vm0 }
 0x549   : > { %v3121_v23 = vsel %vm7652_vm5, %v3103_v10, 0.0  ;;  %v3125_v14 = vsel %vm7657_vm11, %v3105_v24, 0.0  ;;  %v3009_v10 = vmul.f32 0.6931472, %v4579_v57  ;;  %v7661_v24 = vld [vmem:[#allocation55_spill] sm:$0xff]  ;;  %vm7703_vm5 = vmmov %vm7651_vm0 }
 0x54a   : > { %v3122_v9 = vadd.f32 %v3121_v23, %v3120_v27  ;;  %v7659_v23 = vld [vmem:[#allocation54_spill] sm:$0xff]  ;;  %vm7705_vm11 = vmmov %vm7651_vm0 }
 0x54b   : > { %3546 = vmax.xlane.f32.xlu2 %v3545_v0  ;;  %v3028_v42 = vadd.f32 %v3005_v47, %v7659_v23  ;;  %v3011_v0 = vmul.f32 0.6931472, %v4581_v31  ;;  %v3030_v4 = vadd.f32 %v3009_v10, %v7661_v24  ;;  %v2552_v23 = vld [vmem:[#allocation4 + $0x8] sm:$0xff] }
 0x54c   : > { %v3124_v15 = vadd.f32 %v3123_v40, %v3122_v9  ;;  %v4583_v9 = vpop.eup %4582  ;;  %4590 = vlog2.f32 %v2552_v23 }
 0x54d   : > { %v3075_v43 = vpop.xlane.xlu1 %3074 }
 0x54e   : > { %v3072_v53 = vpop.xlane.xlu0 %3071  ;;  %v3078_v51 = vpop.xlane.xlu2 %3077  ;;  %v3107_v8 = vsub.f32 %v3027_v50, %v3075_v43  ;;  %v3126_v6 = vadd.f32 %v3125_v14, %v3124_v15  ;;  %v7662_v15 = vld [vmem:[#allocation53_spill] sm:$0xff] }
 0x54f   : > { %v3106_v61 = vsub.f32 %v3026_v33, %v3072_v53  ;;  %v3108_v48 = vsub.f32 %v3028_v42, %v3078_v51  ;;  %v3029_v41 = vadd.f32 %v3007_v56, %v7662_v15  ;;  %v4585_v43 = vpop.eup %4584  ;;  %v3013_v53 = vmul.f32 0.6931472, %v4583_v9  ;;  %v7665_v14 = vld [vmem:[#allocation57_spill] sm:$0xff]  ;;  %v2600_v9 = vld [vmem:[#allocation5 + $0x8] sm:$0xff] }
 0x550   : > { %v3129_v13 = vsel %vm7660_vm8, %v3107_v8, 0.0  ;;  %v3015_v29 = vmul.f32 0.6931472, %v4585_v43  ;;  %v3031_v8 = vadd.f32 %v3011_v0, %v7665_v14  ;;  %4592 = vlog2.f32 %v2600_v9  ;;  %v7672_v14 = vld [vmem:[#allocation59_spill] sm:$0xff]  ;;  %vm7711_vm8 = vmmov %vm7651_vm0 }
 0x551   : > { %v3127_v27 = vsel %vm7658_vm1, %v3106_v61, 0.0  ;;  %v3131_v47 = vsel %vm7663_vm12, %v3108_v48, 0.0  ;;  %v4587_v61 = vpop.eup %4586  ;;  %v7668_v48 = vld [vmem:[#allocation56_spill] sm:$0xff]  ;;  %vm7708_vm1 = vmmov %vm7651_vm0 }
 0x552   : > { %v3128_v30 = vadd.f32 %v3127_v27, %v3126_v6  ;;  %v3017_v42 = vmul.f32 0.6931472, %v4587_v61  ;;  %v3032_v60 = vadd.f32 %v3013_v53, %v7668_v48  ;;  %v2603_v53 = vld [vmem:[#allocation5 + $0x20] sm:$0xff]  ;;  %vm7712_vm12 = vmmov %vm7651_vm0 }
 0x554   : > { %v3130_v59 = vadd.f32 %v3129_v13, %v3128_v30  ;;  %v7667_v30 = vld [vmem:[#allocation58_spill] sm:$0xff] }
 0x555   : > { %v3084_v40 = vpop.xlane.xlu1 %3083  ;;  %v3033_v13 = vadd.f32 %v3015_v29, %v7667_v30 }
 0x556   : > { %v3081_v55 = vpop.xlane.xlu0 %3080  ;;  %v3087_v50 = vpop.xlane.xlu2 %3086  ;;  %v3110_v12 = vsub.f32 %v3030_v4, %v3084_v40  ;;  %v3132_v57 = vadd.f32 %v3131_v47, %v3130_v59 }
 0x557   : > { %v3109_v33 = vsub.f32 %v3029_v41, %v3081_v55  ;;  %v3111_v10 = vsub.f32 %v3031_v8, %v3087_v50  ;;  %v4589_v59 = vpop.eup %4588  ;;  %v3034_v50 = vadd.f32 %v3017_v42, %v6503_v16 }
 0x558   : > { %v3135_v56 = vsel %vm7666_vm6, %v3110_v12, 0.0  ;;  %v3019_v43 = vmul.f32 0.6931472, %v4589_v59  ;;  %v2555_v12 = vld [vmem:[#allocation4 + $0x20] sm:$0xff]  ;;  %v4591_v61 = vpop.eup %4590  ;;  %vm7715_vm6 = vmmov %vm7651_vm0 }
 0x559   : > { %v3133_v51 = vsel %vm7664_vm15, %v3109_v33, 0.0  ;;  %v3137_v4 = vsel %vm7669_vm10, %v3111_v10, 0.0  ;;  %4594 = vlog2.f32 %v2555_v12  ;;  %v2570_v48 = vmul.f32 0.6931472, %v4591_v61  ;;  %v2604_v61 = vld [vmem:[#allocation5 + $0x28] sm:$0xff]  ;;  %vm7714_vm15 = vmmov %vm7651_vm0 }
 0x55a   : > { %v3134_v6 = vadd.f32 %v3133_v51, %v3132_v57  ;;  %v2553_v51 = vld [vmem:[#allocation4 + $0x10] sm:$0xff]  ;;  %v3035_v8 = vadd.f32 %v3019_v43, %v7672_v14  ;;  %4596 = vlog2.f32 %v2603_v53  ;;  %vm7718_vm10 = vmmov %vm7651_vm0 }
 0x55b   : > { %4598 = vlog2.f32 %v2553_v51 }
 0x55c   : > { %v3136_v27 = vadd.f32 %v3135_v56, %v3134_v6  ;;  %v2601_v6 = vld [vmem:[#allocation5 + $0x10] sm:$0xff] }
 0x55d   : > { %v3093_v31 = vpop.xlane.xlu1 %3092  ;;  %4600 = vlog2.f32 %v2601_v6 }
 0x55e   : > { %v3090_v40 = vpop.xlane.xlu0 %3089  ;;  %v3096_v24 = vpop.xlane.xlu2 %3095  ;;  %v3113_v0 = vsub.f32 %v3033_v13, %v3093_v31  ;;  %v3138_v41 = vadd.f32 %v3137_v4, %v3136_v27 }
 0x55f   : > { %v3112_v15 = vsub.f32 %v3032_v60, %v3090_v40  ;;  %v3114_v57 = vsub.f32 %v3034_v50, %v3096_v24  ;;  %v4593_v27 = vpop.eup %4592  ;;  %v2558_v24 = vld [vmem:[#allocation4 + $0x38] sm:$0xff] }
 0x560   : > { %v3141_v33 = vsel %vm7671_vm7, %v3113_v0, 0.0  ;;  %v2618_v60 = vmul.f32 0.6931472, %v4593_v27  ;;  %v4595_v9 = vpop.eup %4594  ;;  %vm7721_vm7 = vmmov %vm7651_vm0 }
 0x561   : > { %v3139_v55 = vsel %vm7670_vm3, %v3112_v15, 0.0  ;;  %v3143_v16 = vsel %vm7673_vm4, %v3114_v57, 0.0  ;;  %v4597_v40 = vpop.eup %4596  ;;  %v2606_v15 = vld [vmem:[#allocation5 + $0x38] sm:$0xff]  ;;  %v2576_v12 = vmul.f32 0.6931472, %v4595_v9  ;;  %vm7719_vm3 = vmmov %vm7651_vm0 }
 0x562   : > { %v3140_v47 = vadd.f32 %v3139_v55, %v3138_v41  ;;  %v4599_v4 = vpop.eup %4598  ;;  %v2648_v0 = vsub.f32 %v2570_v48, %v2618_v60  ;;  %vm7722_vm4 = vmmov %vm7651_vm0 }
 0x563   : > { %v4601_v55 = vpop.eup %4600  ;;  %v2572_v53 = vmul.f32 0.6931472, %v4599_v4  ;;  %v2559_v4 = vld [vmem:[#allocation4 + $0x40] sm:$0xff] }
 0x564   : > { %v3142_v29 = vadd.f32 %v3141_v33, %v3140_v47  ;;  %v2624_v33 = vmul.f32 0.6931472, %v4597_v40  ;;  %v2664_v51 = vadd.f32 %v2648_v0, %v6349_v22 }
 0x566   : > { %v3099_v56 = vpop.xlane.xlu0 %3098  ;;  %v6873_v10 = vpop.xlane.xlu2 %3173  ;;  %v3144_v31 = vadd.f32 %v3143_v16, %v3142_v29  ;;  %v2620_v29 = vmul.f32 0.6931472, %v4601_v55  ;;  %v2651_v6 = vsub.f32 %v2576_v12, %v2624_v33 }
 0x567   : > { %v3115_v23 = vsub.f32 %v3035_v8, %v3099_v56  ;;  %v3220_v42 = vsub.f32 %v6656_v45, %v6873_v10  ;;  %v2556_v8 = vld [vmem:[#allocation4 + $0x28] sm:$0xff]  ;;  %v2561_v56 = vld [vmem:[#allocation4 + $0x50] sm:$0xff] }
 0x568   : > { %v2649_v16 = vsub.f32 %v2572_v53, %v2620_v29 }
 0x569   : > { %v3145_v30 = vsel %vm7674_vm2, %v3115_v23, 0.0  ;;  %v3236_v13 = vmul.f32 1.442695, %v3220_v42  ;;  %v2609_v23 = vld [vmem:[#allocation5 + $0x50] sm:$0xff]  ;;  %vm7723_vm2 = vmmov %vm7651_vm0 }
 0x56a   : > { %v6879_v59 = vadd.f32 %v3145_v30, %v3144_v31  ;;  %v6892_v31 = vadd.f32 %v6798_v26, %v2664_v51  ;;  %v2665_v60 = vadd.f32 %v2649_v16, %v6316_v25  ;;  %v2612_v25 = vld [vmem:[#allocation5 + $0x68] sm:$0xff]  ;;  %v2562_v16 = vld [vmem:[#allocation4 + $0x58] sm:$0xff] }
 0x56b   : > { %4602 = vpow2.f32 %v3236_v13  ;;  %v2667_v13 = vadd.f32 %v2651_v6, %v6314_v2 }
 0x56c   : > { %4604 = vlog2.f32 %v2558_v24  ;;  %v3503_v24 = vsel %vm1942_vm13, %v6892_v31, -inf  ;;  %v6903_v33 = vadd.f32 %v6798_v26, %v2665_v60 }
 0x56d   : > { %4606 = vlog2.f32 %v2606_v15  ;;  %v2607_v15 = vld [vmem:[#allocation5 + $0x40] sm:$0xff] }
 0x56e   : > { %v6881_v41 = vpop.xlane.xlu0 %3176  ;;  %v6883_v43 = vpop.xlane.xlu2 %3182 }
 0x56f   : > { %7675 = vst [vmem:[#allocation48_spill] sm:$0xff] %v6883_v43  ;;  %v3221_v50 = vsub.f32 %v6678_v52, %v6881_v41 }
 0x571   : > { %v4603_v47 = vpop.eup %4602  ;;  %v3238_v57 = vmul.f32 1.442695, %v3221_v50  ;;  %v2564_v50 = vld [vmem:[#allocation4 + $0x68] sm:$0xff] }
 0x572   : > { %v3268_v14 = vsel %vm1942_vm13, %v4603_v47, 0.0  ;;  %v4605_v27 = vpop.eup %4604  ;;  %v6900_v47 = vadd.f32 %v6798_v26, %v2667_v13 }
 0x573   : > { %3269 = vadd.xlane.f32.xlu0 %v3268_v14  ;;  %4608 = vpow2.f32 %v3238_v57  ;;  %v4607_v30 = vpop.eup %4606  ;;  %v2582_v48 = vmul.f32 0.6931472, %v4605_v27 }
 0x574   : > { %4610 = vlog2.f32 %v2556_v8  ;;  %v2630_v9 = vmul.f32 0.6931472, %v4607_v30  ;;  %v3512_v14 = vsel %vm1942_vm13, %v6900_v47, -inf }
 0x575   : > { %4612 = vlog2.f32 %v2604_v61 }
 0x576   : > { %v6889_v42 = vpop.xlane.xlu2 %3191  ;;  %4614 = vlog2.f32 %v2561_v56  ;;  %v2654_v12 = vsub.f32 %v2582_v48, %v2630_v9  ;;  %v3506_v56 = vsel %vm1942_vm13, %v6903_v33, -inf }
 0x577   : > { %7676 = vst [vmem:[#allocation45_spill] sm:$0xff] %v6889_v42  ;;  %4616 = vlog2.f32 %v2609_v23 }
 0x578   : > { %4618 = vlog2.f32 %v2559_v4  ;;  %v2670_v8 = vadd.f32 %v2654_v12, %v6379_v62  ;;  %v2565_v12 = vld [vmem:[#allocation4 + $0x70] sm:$0xff] }
 0x579   : > { %v4609_v22 = vpop.eup %4608  ;;  %4620 = vlog2.f32 %v2607_v15 }
 0x57a   : > { %v3271_v40 = vsel %vm1942_vm13, %v4609_v22, 0.0  ;;  %v4611_v0 = vpop.eup %4610  ;;  %4622 = vlog2.f32 %v2564_v50  ;;  %v2610_v22 = vld [vmem:[#allocation5 + $0x58] sm:$0xff]  ;;  %v6913_v60 = vadd.f32 %v6798_v26, %v2670_v8 }
 0x57b   : > { %3272 = vadd.xlane.f32.xlu1 %v3271_v40  ;;  %3504 = vmax.xlane.f32.xlu0 %v3503_v24  ;;  %v4613_v55 = vpop.eup %4612  ;;  %v2578_v29 = vmul.f32 0.6931472, %v4611_v0  ;;  %4624 = vlog2.f32 %v2612_v25 }
 0x57c   : > { %v4615_v2 = vpop.eup %4614  ;;  %v2626_v51 = vmul.f32 0.6931472, %v4613_v55  ;;  %4626 = vlog2.f32 %v2562_v16  ;;  %v3521_v50 = vsel %vm1942_vm13, %v6913_v60, -inf }
 0x57d   : > { %v4617_v57 = vpop.eup %4616  ;;  %v2588_v61 = vmul.f32 0.6931472, %v4615_v2  ;;  %4628 = vlog2.f32 %v2610_v22 }
 0x57e   : > { %v6905_v53 = vpop.xlane.xlu2 %3200  ;;  %v2636_v6 = vmul.f32 0.6931472, %v4617_v57  ;;  %v4619_v27 = vpop.eup %4618  ;;  %v2652_v30 = vsub.f32 %v2578_v29, %v2626_v51  ;;  %v2613_v29 = vld [vmem:[#allocation5 + $0x70] sm:$0xff]  ;;  %4630 = vlog2.f32 %v2565_v12 }
 0x57f   : > { %v4621_v23 = vpop.eup %4620  ;;  %v2584_v40 = vmul.f32 0.6931472, %v4619_v27  ;;  %v6922_v51 = vpop.xlane.xlu1 %3179  ;;  %4632 = vlog2.f32 %v2613_v29 }
 0x580   : > { %v4623_v13 = vpop.eup %4622  ;;  %v2657_v48 = vsub.f32 %v2588_v61, %v2636_v6  ;;  %v2668_v62 = vadd.f32 %v2652_v30, %v6344_v1  ;;  %v2632_v24 = vmul.f32 0.6931472, %v4621_v23  ;;  %7677 = vst [vmem:[#allocation47_spill] sm:$0xff] %v6922_v51 }
 0x581   : > { %v4625_v9 = vpop.eup %4624  ;;  %v2594_v0 = vmul.f32 0.6931472, %v4623_v13 }
 0x582   : > { %v2673_v4 = vadd.f32 %v2657_v48, %v6391_v21  ;;  %v2642_v15 = vmul.f32 0.6931472, %v4625_v9  ;;  %v4627_v2 = vpop.eup %4626  ;;  %v2655_v57 = vsub.f32 %v2584_v40, %v2632_v24  ;;  %v6925_v21 = vadd.f32 %v6798_v26, %v2668_v62 }
 0x583   : > { %3507 = vmax.xlane.f32.xlu1 %v3506_v56  ;;  %3513 = vmax.xlane.f32.xlu0 %v3512_v14  ;;  %v4629_v25 = vpop.eup %4628  ;;  %v2590_v8 = vmul.f32 0.6931472, %v4627_v2 }
 0x584   : > { %v2660_v1 = vsub.f32 %v2594_v0, %v2642_v15  ;;  %v6928_v14 = vadd.f32 %v6798_v26, %v2673_v4  ;;  %v2638_v61 = vmul.f32 0.6931472, %v4629_v25  ;;  %v2671_v6 = vadd.f32 %v2655_v57, %v6377_v46  ;;  %v4631_v22 = vpop.eup %4630 }
 0x585   : > { %v3515_v27 = vsel %vm1942_vm13, %v6925_v21, -inf  ;;  %v2596_v9 = vmul.f32 0.6931472, %v4631_v22 }
 0x586   : > { %v6917_v55 = vpop.xlane.xlu2 %3209  ;;  %v2676_v56 = vadd.f32 %v2660_v1, %v6397_v36  ;;  %v3530_v16 = vsel %vm1942_vm13, %v6928_v14, -inf  ;;  %v2658_v13 = vsub.f32 %v2590_v8, %v2638_v61  ;;  %v6941_v48 = vadd.f32 %v6798_v26, %v2671_v6  ;;  %v4633_v36 = vpop.eup %4632 }
 0x587   : > { %v2644_v40 = vmul.f32 0.6931472, %v4633_v36  ;;  %v3223_v8 = vsub.f32 %v6675_v28, %v6883_v43 }
 0x588   : > { %v6944_v46 = vadd.f32 %v6798_v26, %v2676_v56  ;;  %v2674_v62 = vadd.f32 %v2658_v13, %v6389_v63  ;;  %v3524_v24 = vsel %vm1942_vm13, %v6941_v48, -inf }
 0x589   : > { %v2661_v0 = vsub.f32 %v2596_v9, %v2644_v40 }
 0x58a   : > { %v3539_v4 = vsel %vm1942_vm13, %v6944_v46, -inf }
 0x58b   : > { %3147 = vadd.xlane.f32.xlu1 %v6879_v59  ;;  %3522 = vmax.xlane.f32.xlu0 %v3521_v50  ;;  %v3222_v59 = vsub.f32 %v6651_v44, %v6922_v51  ;;  %v6954_v50 = vadd.f32 %v6798_v26, %v2674_v62  ;;  %v2677_v63 = vadd.f32 %v2661_v0, %v6395_v7  ;;  %v3242_v7 = vmul.f32 1.442695, %v3223_v8 }
 0x58d   : > { %v3240_v30 = vmul.f32 1.442695, %v3222_v59  ;;  %v3533_v25 = vsel %vm1942_vm13, %v6954_v50, -inf  ;;  %v6963_v1 = vadd.f32 %v6798_v26, %v2677_v63  ;;  %v6971_v26 = vpop.xlane.xlu0 %3185 }
 0x58e   : > { %v6938_v23 = vpop.xlane.xlu2 %3218 }
 0x58f   : > { %4634 = vpow2.f32 %v3240_v30  ;;  %v3542_v61 = vsel %vm1942_vm13, %v6963_v1, -inf }
 0x593   : > { %3516 = vmax.xlane.f32.xlu1 %v3515_v27  ;;  %3531 = vmax.xlane.f32.xlu0 %v3530_v16  ;;  %v6973_v16 = vpop.xlane.xlu1 %3188 }
 0x594   : > { %7678 = vst [vmem:[#allocation49_spill] sm:$0xff] %v6973_v16 }
 0x595   : > { %v4635_v2 = vpop.eup %4634  ;;  %v6975_v30 = vpop.xlane.xlu0 %3194 }
 0x596   : > { %v6951_v15 = vpop.xlane.xlu2 %3501  ;;  %v3274_v57 = vsel %vm1942_vm13, %v4635_v2, 0.0 }
 0x597   : > { %v3548_v12 = vsub.f32 %v6772_v3, %v6951_v15 }
 0x599   : > { %v3564_v29 = vmul.f32 1.442695, %v3548_v12 }
 0x59b   : > { %3525 = vmax.xlane.f32.xlu1 %v3524_v24  ;;  %3540 = vmax.xlane.f32.xlu0 %v3539_v4  ;;  %4636 = vpow2.f32 %v3564_v29  ;;  %v6977_v22 = vpop.xlane.xlu1 %3197 }
 0x59c   : > { %4638 = vpow2.f32 %v3242_v7  ;;  %v3225_v7 = vsub.f32 %v6671_v19, %v6973_v16 }
 0x59d   : > { %v6979_v13 = vpop.xlane.xlu0 %3203 }
 0x59e   : > { %v6989_v24 = vpop.xlane.xlu2 %3510 }
 0x59f   : > { %7679 = vst [vmem:[#allocation46_spill] sm:$0xff] %v6989_v24  ;;  %v3551_v12 = vsub.f32 %v6784_v5, %v6989_v24 }
 0x5a1   : > { %v4637_v59 = vpop.eup %4636 }
 0x5a2   : > { %v3596_v6 = vsel %vm1942_vm13, %v4637_v59, 0.0  ;;  %v4639_v56 = vpop.eup %4638 }
 0x5a3   : > { %3534 = vmax.xlane.f32.xlu1 %v3533_v25  ;;  %3275 = vadd.xlane.f32.xlu0 %v3274_v57  ;;  %v3277_v27 = vsel %vm1942_vm13, %v4639_v56, 0.0  ;;  %v6981_v36 = vpop.xlane.xlu1 %3206  ;;  %v3570_v25 = vmul.f32 1.442695, %v3551_v12 }
 0x5a5   : > { %v6983_v9 = vpop.xlane.xlu0 %3212 }
 0x5a6   : > { %v7014_v43 = vpop.xlane.xlu2 %3519 }
 0x5a7   : > { %7682 = vst [vmem:[#allocation50_spill] sm:$0xff] %v7014_v43 }
 0x5ab   : > { %3543 = vmax.xlane.f32.xlu1 %v3542_v61  ;;  %v6985_v62 = vpop.xlane.xlu1 %3215 }
 0x5b3   : > { %3597 = vadd.xlane.f32.xlu1 %v3596_v6  ;;  %v3224_v6 = vsub.f32 %v6694_v18, %v6971_v26 }
 0x5bb   : > { %3278 = vadd.xlane.f32.xlu1 %v3277_v27 }
 0x5e6   : > { %v6987_v40 = vpop.xlane.xlu0 %3269 }
 0x5ee   : > { %v6991_v4 = vpop.xlane.xlu1 %3272  ;;  %v6993_v0 = vpop.xlane.xlu0 %3504 }
 0x5ef   : > { %v3549_v2 = vsub.f32 %v6892_v31, %v6993_v0 }
 0x5f1   : > { %v3566_v63 = vmul.f32 1.442695, %v3549_v2  ;;  %v3226_v2 = vsub.f32 %v6699_v38, %v6889_v42 }
 0x5f3   : > { %4640 = vpow2.f32 %v3566_v63  ;;  %v3246_v63 = vmul.f32 1.442695, %v3225_v7  ;;  %v3248_v24 = vmul.f32 1.442695, %v3226_v2 }
 0x5f4   : > { %4642 = vpow2.f32 %v3570_v25  ;;  %v3554_v25 = vsub.f32 %v6801_v32, %v7014_v43 }
 0x5f6   : > { %v6999_v57 = vpop.xlane.xlu1 %3507  ;;  %v7001_v29 = vpop.xlane.xlu0 %3513 }
 0x5f7   : > { %7680 = vst [vmem:[#allocation51_spill] sm:$0xff] %v6999_v57  ;;  %v3550_v8 = vsub.f32 %v6903_v33, %v6999_v57  ;;  %v3552_v61 = vsub.f32 %v6900_v47, %v7001_v29 }
 0x5f8   : > { %7681 = vst [vmem:[#allocation52_spill] sm:$0xff] %v7001_v29  ;;  %v3244_v29 = vmul.f32 1.442695, %v3224_v6 }
 0x5f9   : > { %v4641_v59 = vpop.eup %4640  ;;  %v3568_v56 = vmul.f32 1.442695, %v3550_v8  ;;  %v3572_v27 = vmul.f32 1.442695, %v3552_v61 }
 0x5fa   : > { %v3599_v12 = vsel %vm1942_vm13, %v4641_v59, 0.0  ;;  %v4643_v51 = vpop.eup %4642 }
 0x5fb   : > { %3600 = vadd.xlane.f32.xlu2 %v3599_v12  ;;  %4644 = vpow2.f32 %v3568_v56  ;;  %v3605_v7 = vsel %vm1942_vm13, %v4643_v51, 0.0 }
 0x5fc   : > { %4646 = vpow2.f32 %v3572_v27  ;;  %v3576_v27 = vmul.f32 1.442695, %v3554_v25 }
 0x5fd   : > { %4648 = vpow2.f32 %v3246_v63 }
 0x5fe   : > { %v3148_v16 = vpop.xlane.xlu1 %3147  ;;  %4650 = vpow2.f32 %v3244_v29 }
 0x5ff   : > { %v3149_v57 = vrot.slane %v3148_v16, 4  ;;  %4652 = vpow2.f32 %v3248_v24  ;;  %v3227_v24 = vsub.f32 %v6720_v37, %v6975_v30 }
 0x600   : > { %4654 = vpow2.f32 %v3576_v27 }
 0x601   : > { %v4645_v8 = vpop.eup %4644  ;;  %v3150_v61 = vadd.f32 %v3149_v57, %v3148_v16 }
 0x602   : > { %v4647_v42 = vpop.eup %4646  ;;  %v3602_v59 = vsel %vm1942_vm13, %v4645_v8, 0.0 }
 0x603   : > { %v3151_v6 = vrot.slane %v3150_v61, 2  ;;  %3603 = vadd.xlane.f32.xlu0 %v3602_v59  ;;  %v3608_v56 = vsel %vm1942_vm13, %v4647_v42, 0.0  ;;  %3606 = vadd.xlane.f32.xlu2 %v3605_v7  ;;  %v4649_v12 = vpop.eup %4648  ;;  %v3250_v59 = vmul.f32 1.442695, %v3227_v24  ;;  %v7030_v7 = vpop.xlane.xlu0 %3522 }
 0x604   : > { %3609 = vadd.xlane.f32.xlu1 %v3608_v56  ;;  %v4651_v43 = vpop.eup %4650  ;;  %v3283_v25 = vsel %vm1942_vm13, %v4649_v12, 0.0  ;;  %v3365_v56 = vmul.f32 %v6521_v58, %v6678_v52  ;;  %v3692_v52 = vmul.f32 %v6525_v49, %v6772_v3  ;;  %v7052_v3 = vpop.xlane.xlu2 %3528 }
 0x605   : > { %v3152_v2 = vadd.f32 %v3151_v6, %v3150_v61  ;;  %v4653_v29 = vpop.eup %4652  ;;  %v3280_v42 = vsel %vm1942_vm13, %v4651_v43, 0.0  ;;  %v3555_v43 = vsub.f32 %v6913_v60, %v7030_v7 }
 0x606   : > { %v7021_v63 = vpop.xlane.xlu1 %3516  ;;  %v3286_v61 = vsel %vm1942_vm13, %v4653_v29, 0.0  ;;  %v4655_v6 = vpop.eup %4654  ;;  %v3364_v29 = vmul.f32 %v6525_v49, %v6656_v45  ;;  %v3693_v49 = vmul.f32 %v6521_v58, %v6892_v31 }
 0x607   : > { %v3553_v16 = vsub.f32 %v6925_v21, %v7021_v63  ;;  %v3153_v57 = vrot.slane %v3152_v2, 1  ;;  %v3614_v12 = vsel %vm1942_vm13, %v4655_v6, 0.0  ;;  %v3694_v6 = vmul.f32 %v6528_v54, %v6903_v33 }
 0x608   : > { %v3380_v24 = vsel %vm1942_vm13, %v3364_v29, 0.0  ;;  %v3366_v33 = vmul.f32 %v6528_v54, %v6651_v44  ;;  %v3229_v29 = vsub.f32 %v6717_v34, %v6905_v53 }
 0x609   : > { %v3574_v8 = vmul.f32 1.442695, %v3553_v16  ;;  %v3154_v51 = vadd.f32 %v3153_v57, %v3152_v2  ;;  %v3383_v16 = vsel %vm1942_vm13, %v3365_v56, 0.0  ;;  %v3578_v57 = vmul.f32 1.442695, %v3555_v43 }
 0x60a   : > { %v3711_v43 = vsel %vm1942_vm13, %v3693_v49, 0.0  ;;  %v3714_v58 = vsel %vm1942_vm13, %v3694_v6, 0.0  ;;  %v3254_v54 = vmul.f32 1.442695, %v3229_v29 }
 0x60b   : > { %4297 = vpush %v3154_v51  ;;  %3281 = vadd.xlane.f32.xlu0 %v3280_v42  ;;  %3284 = vadd.xlane.f32.xlu2 %v3283_v25  ;;  %4656 = vpow2.f32 %v3574_v8  ;;  %v3228_v51 = vsub.f32 %v6691_v11, %v6977_v22  ;;  %v3708_v42 = vsel %vm1942_vm13, %v3692_v52, 0.0  ;;  %v7683_v52 = vld [vmem:[#allocation75_spill] sm:$0xff] }
 0x60c   : > { %3287 = vadd.xlane.f32.xlu1 %v3286_v61  ;;  %4658 = vpow2.f32 %v3250_v59 }
 0x60d   : > { %4660 = vpow2.f32 %v3578_v57  ;;  %v3252_v61 = vmul.f32 1.442695, %v3228_v51  ;;  %v3367_v57 = vmul.f32 %v6549_v39, %v6675_v28  ;;  %v3386_v51 = vsel %vm1942_vm13, %v3366_v33, 0.0  ;;  %v7074_v28 = vpop.xlane.xlu0 %3531 }
 0x60e   : > { %v7048_v59 = vpop.xlane.xlu1 %3525 }
 0x60f   : > { %v3556_v56 = vsub.f32 %v6941_v48, %v7048_v59  ;;  %4662 = vpow2.f32 %v3252_v61 }
 0x611   : > { %v4657_v27 = vpop.eup %4656  ;;  %v3580_v31 = vmul.f32 1.442695, %v3556_v56 }
 0x612   : > { %v3611_v2 = vsel %vm1942_vm13, %v4657_v27, 0.0  ;;  %v4659_v8 = vpop.eup %4658  ;;  %v3557_v27 = vsub.f32 %v6815_v17, %v7052_v3 }
 0x613   : > { %3612 = vadd.xlane.f32.xlu0 %v3611_v2  ;;  %3615 = vadd.xlane.f32.xlu2 %v3614_v12  ;;  %v3289_v25 = vsel %vm1942_vm13, %v4659_v8, 0.0  ;;  %v4661_v45 = vpop.eup %4660  ;;  %4664 = vpow2.f32 %v3580_v31  ;;  %v3230_v8 = vsub.f32 %v7683_v52, %v6979_v13  ;;  %v7685_v31 = vld [vmem:[#allocation72_spill] sm:$0xff] }
 0x614   : > { %3384 = vadd.xlane.f32.xlu1 %v3383_v16  ;;  %v3617_v2 = vsel %vm1942_vm13, %v4661_v45, 0.0  ;;  %v3582_v12 = vmul.f32 1.442695, %v3557_v27  ;;  %v3558_v45 = vsub.f32 %v6928_v14, %v7074_v28 }
 0x615   : > { %v4663_v16 = vpop.eup %4662  ;;  %v3256_v44 = vmul.f32 1.442695, %v3230_v8 }
 0x616   : > { %4666 = vpow2.f32 %v3582_v12  ;;  %v3231_v12 = vsub.f32 %v7685_v31, %v6981_v36  ;;  %v7090_v8 = vpop.xlane.xlu1 %3534 }
 0x617   : > { %4668 = vpow2.f32 %v3254_v54 }
 0x618   : > { %4670 = vpow2.f32 %v3256_v44  ;;  %v3258_v29 = vmul.f32 1.442695, %v3231_v12  ;;  %v3559_v44 = vsub.f32 %v6954_v50, %v7090_v8 }
 0x619   : > { %v4665_v61 = vpop.eup %4664 }
 0x61a   : > { %v3620_v6 = vsel %vm1942_vm13, %v4665_v61, 0.0 }
 0x61b   : > { %3381 = vadd.xlane.f32.xlu0 %v3380_v24  ;;  %3709 = vadd.xlane.f32.xlu2 %v3708_v42  ;;  %v3292_v24 = vsel %vm1942_vm13, %v4663_v16, 0.0  ;;  %v3389_v42 = vsel %vm1942_vm13, %v3367_v57, 0.0 }
 0x61c   : > { %3290 = vadd.xlane.f32.xlu1 %v3289_v25  ;;  %v3695_v25 = vmul.f32 %v6549_v39, %v6784_v5  ;;  %v4667_v49 = vpop.eup %4666 }
 0x61d   : > { %v3623_v27 = vsel %vm1942_vm13, %v4667_v49, 0.0  ;;  %v4669_v5 = vpop.eup %4668 }
 0x61e   : > { %v3717_v56 = vsel %vm1942_vm13, %v3695_v25, 0.0  ;;  %v3295_v33 = vsel %vm1942_vm13, %v4669_v5, 0.0  ;;  %v7689_v5 = vld [vmem:[#allocation77_spill] sm:$0xff] }
 0x623   : > { %3712 = vadd.xlane.f32.xlu0 %v3711_v43  ;;  %3618 = vadd.xlane.f32.xlu2 %v3617_v2  ;;  %v3584_v43 = vmul.f32 1.442695, %v3558_v45  ;;  %v7684_v2 = vld [vmem:[#allocation60_spill] sm:$0xff]  ;;  %v3586_v45 = vmul.f32 1.442695, %v3559_v44 }
 0x624   : > { %3715 = vadd.xlane.f32.xlu1 %v3714_v58  ;;  %v3368_v39 = vmul.f32 %v7684_v2, %v6694_v18  ;;  %v4671_v58 = vpop.eup %4670  ;;  %v3696_v18 = vmul.f32 %v7684_v2, %v6900_v47  ;;  %v7688_v2 = vld [vmem:[#allocation74_spill] sm:$0xff] }
 0x625   : > { %4672 = vpow2.f32 %v3584_v43  ;;  %v3298_v57 = vsel %vm1942_vm13, %v4671_v58, 0.0  ;;  %v3233_v58 = vsub.f32 %v7689_v5, %v6983_v9 }
 0x626   : > { %v3392_v16 = vsel %vm1942_vm13, %v3368_v39, 0.0  ;;  %4674 = vpow2.f32 %v3258_v29  ;;  %v3720_v61 = vsel %vm1942_vm13, %v3696_v18, 0.0  ;;  %v3232_v39 = vsub.f32 %v7688_v2, %v6917_v55 }
 0x627   : > { %4676 = vpow2.f32 %v3586_v45 }
 0x62b   : > { %3387 = vadd.xlane.f32.xlu0 %v3386_v51  ;;  %3293 = vadd.xlane.f32.xlu2 %v3292_v24  ;;  %v4673_v51 = vpop.eup %4672  ;;  %v7094_v24 = vpop.xlane.xlu2 %3537 }
 0x62c   : > { %3390 = vadd.xlane.f32.xlu1 %v3389_v42  ;;  %v7686_v42 = vld [vmem:[#allocation61_spill] sm:$0xff]  ;;  %v3560_v25 = vsub.f32 %v6825_v35, %v7094_v24  ;;  %v3626_v49 = vsel %vm1942_vm13, %v4673_v51, 0.0 }
 0x62d   : > { %v3697_v54 = vmul.f32 %v7686_v42, %v6925_v21  ;;  %v3369_v21 = vmul.f32 %v7686_v42, %v6671_v19 }
 0x62f   : > { %v3723_v47 = vsel %vm1942_vm13, %v3697_v54, 0.0  ;;  %v3395_v12 = vsel %vm1942_vm13, %v3369_v21, 0.0 }
 0x633   : > { %3621 = vadd.xlane.f32.xlu0 %v3620_v6  ;;  %3718 = vadd.xlane.f32.xlu2 %v3717_v56  ;;  %v3588_v6 = vmul.f32 1.442695, %v3560_v25  ;;  %v4675_v56 = vpop.eup %4674 }
 0x634   : > { %3624 = vadd.xlane.f32.xlu1 %v3623_v27  ;;  %v7687_v27 = vld [vmem:[#allocation63_spill] sm:$0xff]  ;;  %v4677_v18 = vpop.eup %4676 }
 0x635   : > { %v3370_v43 = vmul.f32 %v7687_v27, %v6699_v38  ;;  %4678 = vpow2.f32 %v3588_v6  ;;  %v7116_v38 = vpop.xlane.xlu0 %3540  ;;  %v3698_v29 = vmul.f32 %v7687_v27, %v6801_v32  ;;  %v3629_v54 = vsel %vm1942_vm13, %v4677_v18, 0.0  ;;  %v7691_v6 = vld [vmem:[#allocation73_spill] sm:$0xff] }
 0x636   : > { %v3561_v42 = vsub.f32 %v6944_v46, %v7116_v38  ;;  %v3234_v21 = vsub.f32 %v7691_v6, %v6985_v62 }
 0x637   : > { %v3398_v19 = vsel %vm1942_vm13, %v3370_v43, 0.0  ;;  %v3726_v44 = vsel %vm1942_vm13, %v3698_v29, 0.0  ;;  %v7131_v43 = vpop.xlane.xlu1 %3543 }
 0x63b   : > { %3296 = vadd.xlane.f32.xlu0 %v3295_v33  ;;  %3393 = vadd.xlane.f32.xlu2 %v3392_v16  ;;  %v3301_v33 = vsel %vm1942_vm13, %v4675_v56, 0.0  ;;  %v3260_v16 = vmul.f32 1.442695, %v3232_v39  ;;  %v4679_v51 = vpop.eup %4678 }
 0x63c   : > { %3299 = vadd.xlane.f32.xlu1 %v3298_v57  ;;  %v3262_v57 = vmul.f32 1.442695, %v3233_v58  ;;  %v3632_v25 = vsel %vm1942_vm13, %v4679_v51, 0.0  ;;  %v3264_v58 = vmul.f32 1.442695, %v3234_v21  ;;  %s4298_s15 = spop %4297 }
 0x63d   : > { %4680 = vpow2.f32 %v3260_v16 }
 0x63e   : > { %4682 = vpow2.f32 %v3262_v57  ;;  %v3562_v57 = vsub.f32 %v6963_v1, %v7131_v43 }
 0x643   : > { %3721 = vadd.xlane.f32.xlu0 %v3720_v61  ;;  %3627 = vadd.xlane.f32.xlu2 %v3626_v49  ;;  %v3590_v61 = vmul.f32 1.442695, %v3561_v42  ;;  %v7690_v49 = vld [vmem:[#allocation62_spill] sm:$0xff]  ;;  %v3592_v42 = vmul.f32 1.442695, %v3562_v57 }
 0x644   : > { %3724 = vadd.xlane.f32.xlu1 %v3723_v47  ;;  %v3371_v32 = vmul.f32 %v7690_v49, %v6720_v37  ;;  %v4681_v47 = vpop.eup %4680  ;;  %v3699_v37 = vmul.f32 %v7690_v49, %v6913_v60 }
 0x645   : > { %v4683_v45 = vpop.eup %4682  ;;  %4684 = vpow2.f32 %v3590_v61  ;;  %v3304_v56 = vsel %vm1942_vm13, %v4681_v47, 0.0  ;;  %v7693_v61 = vld [vmem:[#allocation66_spill] sm:$0xff] }
 0x646   : > { %v3401_v27 = vsel %vm1942_vm13, %v3371_v32, 0.0  ;;  %v3307_v39 = vsel %vm1942_vm13, %v4683_v45, 0.0  ;;  %4686 = vpow2.f32 %v3264_v58  ;;  %v3729_v18 = vsel %vm1942_vm13, %v3699_v37, 0.0  ;;  %v7694_v32 = vld [vmem:[#allocation76_spill] sm:$0xff] }
 0x647   : > { %v3373_v49 = vmul.f32 %v7693_v61, %v6717_v34  ;;  %v3235_v47 = vsub.f32 %v7694_v32, %v6938_v23  ;;  %4688 = vpow2.f32 %v3592_v42  ;;  %v3701_v34 = vmul.f32 %v7693_v61, %v6815_v17 }
 0x64b   : > { %3396 = vadd.xlane.f32.xlu0 %v3395_v12  ;;  %3302 = vadd.xlane.f32.xlu2 %v3301_v33  ;;  %v4685_v12 = vpop.eup %4684  ;;  %v7136_v33 = vpop.xlane.xlu2 %3546 }
 0x64c   : > { %3399 = vadd.xlane.f32.xlu1 %v3398_v19  ;;  %v7692_v19 = vld [vmem:[#allocation64_spill] sm:$0xff]  ;;  %v3563_v29 = vsub.f32 %v6839_v20, %v7136_v33  ;;  %v3635_v51 = vsel %vm1942_vm13, %v4685_v12, 0.0 }
 0x64d   : > { %v3700_v16 = vmul.f32 %v7692_v19, %v6941_v48  ;;  %v3372_v48 = vmul.f32 %v7692_v19, %v6691_v11  ;;  %v7156_v11 = vpop.xlane.xlu0 %3275 }
 0x64f   : > { %v3732_v60 = vsel %vm1942_vm13, %v3700_v16, 0.0  ;;  %v3404_v45 = vsel %vm1942_vm13, %v3372_v48, 0.0  ;;  %v3735_v16 = vsel %vm1942_vm13, %v3701_v34, 0.0 }
 0x653   : > { %3630 = vadd.xlane.f32.xlu0 %v3629_v54  ;;  %3727 = vadd.xlane.f32.xlu2 %v3726_v44  ;;  %v3598_v54 = vpop.xlane.xlu1 %3597  ;;  %v3594_v44 = vmul.f32 1.442695, %v3563_v29 }
 0x654   : > { %3633 = vadd.xlane.f32.xlu1 %v3632_v25  ;;  %v4687_v25 = vpop.eup %4686 }
 0x655   : > { %4690 = vpow2.f32 %v3594_v44  ;;  %v3310_v21 = vsel %vm1942_vm13, %v4687_v25, 0.0  ;;  %v4689_v58 = vpop.eup %4688  ;;  %v7696_v44 = vld [vmem:[#allocation67_spill] sm:$0xff] }
 0x656   : > { %v3638_v19 = vsel %vm1942_vm13, %v4689_v58, 0.0  ;;  %v3375_v48 = vmul.f32 %v7696_v44, %v7685_v31  ;;  %v3703_v31 = vmul.f32 %v7696_v44, %v6954_v50 }
 0x65b   : > { %3305 = vadd.xlane.f32.xlu0 %v3304_v56  ;;  %3402 = vadd.xlane.f32.xlu2 %v3401_v27  ;;  %v3407_v56 = vsel %vm1942_vm13, %v3373_v49, 0.0  ;;  %v3266_v27 = vmul.f32 1.442695, %v3235_v47  ;;  %v7160_v37 = vpop.xlane.xlu1 %3278  ;;  %v4691_v12 = vpop.eup %4690  ;;  %v3413_v49 = vsel %vm1942_vm13, %v3375_v48, 0.0 }
 0x65c   : > { %3308 = vadd.xlane.f32.xlu1 %v3307_v39  ;;  %v3641_v57 = vsel %vm1942_vm13, %v4691_v12, 0.0  ;;  %v3741_v12 = vsel %vm1942_vm13, %v3703_v31, 0.0 }
 0x65d   : > { %4692 = vpow2.f32 %v3266_v27 }
 0x65e   : > { %4694 = vlog2.f32 %v6991_v4 }
 0x65f   : > { %4696 = vlog2.f32 %v6987_v40 }
 0x660   : > { %4698 = vlog2.f32 %v3598_v54  ;;  %v7698_v54 = vld [vmem:[#allocation68_spill] sm:$0xff] }
 0x663   : > { %3730 = vadd.xlane.f32.xlu0 %v3729_v18  ;;  %3636 = vadd.xlane.f32.xlu2 %v3635_v51  ;;  %v7695_v51 = vld [vmem:[#allocation65_spill] sm:$0xff] }
 0x664   : > { %3733 = vadd.xlane.f32.xlu1 %v3732_v60  ;;  %v3374_v17 = vmul.f32 %v7695_v51, %v7683_v52  ;;  %v4693_v60 = vpop.eup %4692 }
 0x665   : > { %v3313_v25 = vsel %vm1942_vm13, %v4693_v60, 0.0  ;;  %v4695_v4 = vpop.eup %4694  ;;  %v7699_v60 = vld [vmem:[#allocation70_spill] sm:$0xff] }
 0x666   : > { %v3410_v61 = vsel %vm1942_vm13, %v3374_v17, 0.0  ;;  %v3319_v34 = vmul.f32 0.6931472, %v4695_v4  ;;  %v4697_v50 = vpop.eup %4696  ;;  %v3378_v44 = vmul.f32 %v7699_v60, %v7691_v6  ;;  %v3705_v4 = vmul.f32 %v7698_v54, %v6944_v46 }
 0x668   : > { %v3349_v40 = vadd.f32 %v3319_v34, %v6881_v41 }
 0x66b   : > { %3405 = vadd.xlane.f32.xlu0 %v3404_v45  ;;  %3311 = vadd.xlane.f32.xlu2 %v3310_v21  ;;  %v3702_v45 = vmul.f32 %v7695_v51, %v6928_v14  ;;  %v3377_v51 = vmul.f32 %v7698_v54, %v7689_v5  ;;  %v7702_v54 = vld [vmem:[#allocation51_spill] sm:$0xff] }
 0x66c   : > { %3408 = vadd.xlane.f32.xlu1 %v3407_v56  ;;  %v7697_v56 = vld [vmem:[#allocation69_spill] sm:$0xff] }
 0x66d   : > { %v3704_v27 = vmul.f32 %v7697_v56, %v6825_v35  ;;  %v3738_v58 = vsel %vm1942_vm13, %v3702_v45, 0.0  ;;  %v3376_v35 = vmul.f32 %v7697_v56, %v7688_v2  ;;  %v3419_v41 = vsel %vm1942_vm13, %v3377_v51, 0.0 }
 0x66e   : > { %v3601_v39 = vpop.xlane.xlu2 %3600  ;;  %v3422_v2 = vsel %vm1942_vm13, %v3378_v44, 0.0 }
 0x66f   : > { %v3744_v14 = vsel %vm1942_vm13, %v3704_v27, 0.0  ;;  %4700 = vlog2.f32 %v3601_v39 }
 0x673   : > { %3639 = vadd.xlane.f32.xlu0 %v3638_v19  ;;  %3736 = vadd.xlane.f32.xlu2 %v3735_v16  ;;  %v4699_v19 = vpop.eup %4698 }
 0x674   : > { %3642 = vadd.xlane.f32.xlu1 %v3641_v57 }
 0x675   : > { %v4701_v31 = vpop.eup %4700 }
 0x676   : > { %v3604_v29 = vpop.xlane.xlu0 %3603  ;;  %v7165_v18 = vpop.xlane.xlu2 %3606 }
 0x677   : > { %v7169_v42 = vpop.xlane.xlu1 %3609  ;;  %4702 = vlog2.f32 %v3604_v29  ;;  %v3706_v29 = vmul.f32 %v7699_v60, %v6963_v1  ;;  %v3747_v1 = vsel %vm1942_vm13, %v3705_v4, 0.0 }
 0x678   : > { %4704 = vlog2.f32 %v7156_v11 }
 0x679   : > { %4706 = vlog2.f32 %v7160_v37 }
 0x67a   : > { %4708 = vlog2.f32 %v7165_v18 }
 0x67b   : > { %3314 = vadd.xlane.f32.xlu0 %v3313_v25  ;;  %3411 = vadd.xlane.f32.xlu2 %v3410_v61  ;;  %v3317_v25 = vmul.f32 0.6931472, %v4697_v50  ;;  %v3645_v61 = vmul.f32 0.6931472, %v4699_v19 }
 0x67c   : > { %3414 = vadd.xlane.f32.xlu1 %v3413_v49  ;;  %v3416_v49 = vsel %vm1942_vm13, %v3376_v35, 0.0 }
 0x67d   : > { %v3348_v5 = vadd.f32 %v3317_v25, %v6873_v10  ;;  %v3676_v45 = vadd.f32 %v3645_v61, %v6951_v15  ;;  %v4703_v56 = vpop.eup %4702  ;;  %v3647_v10 = vmul.f32 0.6931472, %v4701_v31 }
 0x67e   : > { %v7177_v47 = vpop.xlane.xlu0 %3281  ;;  %v7179_v52 = vpop.xlane.xlu2 %3284  ;;  %v3649_v50 = vmul.f32 0.6931472, %v4703_v56  ;;  %v7707_v56 = vld [vmem:[#allocation48_spill] sm:$0xff] }
 0x67f   : > { %v7186_v21 = vpop.xlane.xlu1 %3287  ;;  %v4705_v11 = vpop.eup %4704  ;;  %4710 = vlog2.f32 %v7177_v47 }
 0x680   : > { %v3678_v51 = vadd.f32 %v3649_v50, %v7702_v54  ;;  %v4707_v44 = vpop.eup %4706  ;;  %4712 = vlog2.f32 %v7169_v42 }
 0x681   : > { %v4709_v4 = vpop.eup %4708 }
 0x683   : > { %3739 = vadd.xlane.f32.xlu0 %v3738_v58  ;;  %3742 = vadd.xlane.f32.xlu2 %v3741_v12  ;;  %v7700_v12 = vld [vmem:[#allocation71_spill] sm:$0xff] }
 0x684   : > { %3745 = vadd.xlane.f32.xlu1 %v3744_v14  ;;  %v3707_v14 = vmul.f32 %v7700_v12, %v6839_v20  ;;  %v3677_v20 = vadd.f32 %v3647_v10, %v6993_v0  ;;  %v3379_v60 = vmul.f32 %v7700_v12, %v7694_v32  ;;  %v7706_v32 = vld [vmem:[#allocation47_spill] sm:$0xff]  ;;  %v3651_v10 = vmul.f32 0.6931472, %v4709_v4 }
 0x686   : > { %v7193_v16 = vpop.xlane.xlu0 %3612  ;;  %v7196_v57 = vpop.xlane.xlu2 %3615  ;;  %v3753_v35 = vsel %vm1942_vm13, %v3707_v14, 0.0 }
 0x687   : > { %v3385_v17 = vpop.xlane.xlu1 %3384  ;;  %4714 = vlog2.f32 %v7193_v16 }
 0x688   : > { %v3429_v48 = vsub.f32 %v3349_v40, %v3385_v17  ;;  %v3750_v40 = vsel %vm1942_vm13, %v3706_v29, 0.0  ;;  %4716 = vlog2.f32 %v7179_v52 }
 0x689   : > { %4718 = vlog2.f32 %v7186_v21 }
 0x68a   : > { %v3445_v15 = vsel %vm7701_vm14, %v3429_v48, 0.0  ;;  %4720 = vlog2.f32 %v7196_v57  ;;  %vm7724_vm14 = vmmov %vm7651_vm0 }
 0x68b   : > { %3417 = vadd.xlane.f32.xlu0 %v3416_v49  ;;  %3420 = vadd.xlane.f32.xlu2 %v3419_v41  ;;  %v3321_v49 = vmul.f32 0.6931472, %v4705_v11 }
 0x68c   : > { %3423 = vadd.xlane.f32.xlu1 %v3422_v2  ;;  %v3323_v2 = vmul.f32 0.6931472, %v4707_v44 }
 0x68e   : > { %v3382_v6 = vpop.xlane.xlu0 %3381  ;;  %v3710_v39 = vpop.xlane.xlu2 %3709  ;;  %v3351_v18 = vadd.f32 %v3323_v2, %v7707_v56 }
 0x68f   : > { %v3428_v27 = vsub.f32 %v3348_v5, %v3382_v6  ;;  %v7213_v34 = vpop.xlane.xlu1 %3290  ;;  %v3756_v58 = vsub.f32 %v3676_v45, %v3710_v39  ;;  %v3425_v45 = vsel %vm1942_vm13, %v3379_v60, 0.0  ;;  %v3350_v39 = vadd.f32 %v3321_v49, %v7706_v32  ;;  %vm7709_vm13 = vmmov %vm7651_vm0 }
 0x690   : > { %4722 = vlog2.f32 %v7213_v34 }
 0x691   : > { %v3444_v46 = vsel %vm7651_vm0, %v3428_v27, 0.0  ;;  %v3772_v41 = vsel %vm7703_vm5, %v3756_v58, 0.0  ;;  %vm7725_vm5 = vmmov %vm7651_vm0 }
 0x692   : > { %v3446_v19 = vadd.f32 %v3445_v15, %v3444_v46 }
 0x693   : > { %3748 = vadd.xlane.f32.xlu0 %v3747_v1  ;;  %3751 = vadd.xlane.f32.xlu2 %v3750_v40  ;;  %v7710_v40 = vld [vmem:[#allocation46_spill] sm:$0xff] }
 0x694   : > { %3754 = vadd.xlane.f32.xlu1 %v3753_v35  ;;  %v3679_v35 = vadd.f32 %v3651_v10, %v7710_v40 }
 0x696   : > { %v3713_v37 = vpop.xlane.xlu0 %3712  ;;  %v7226_v17 = vpop.xlane.xlu2 %3618 }
 0x697   : > { %v3757_v48 = vsub.f32 %v3677_v20, %v3713_v37  ;;  %v3716_v25 = vpop.xlane.xlu1 %3715  ;;  %v4711_v20 = vpop.eup %4710  ;;  %4724 = vlog2.f32 %v7226_v17 }
 0x698   : > { %v3758_v61 = vsub.f32 %v3678_v51, %v3716_v25  ;;  %v3325_v60 = vmul.f32 0.6931472, %v4711_v20 }
 0x699   : > { %v3773_v0 = vsel %vm7704_vm9, %v3757_v48, 0.0  ;;  %v4713_v48 = vpop.eup %4712  ;;  %vm7726_vm9 = vmmov %vm7651_vm0 }
 0x69a   : > { %v3774_v5 = vadd.f32 %v3773_v0, %v3772_v41  ;;  %v3775_v31 = vsel %vm7705_vm11, %v3758_v61, 0.0  ;;  %v4715_v49 = vpop.eup %4714  ;;  %v3653_v2 = vmul.f32 0.6931472, %v4713_v48  ;;  %v7720_v48 = vld [vmem:[#allocation50_spill] sm:$0xff]  ;;  %vm7727_vm11 = vmmov %vm7651_vm0 }
 0x69b   : > { %3426 = vadd.xlane.f32.xlu0 %v3425_v45  ;;  %v3655_v16 = vmul.f32 0.6931472, %v4715_v49  ;;  %v7713_v45 = vld [vmem:[#allocation52_spill] sm:$0xff] }
 0x69c   : > { %v3776_v6 = vadd.f32 %v3775_v31, %v3774_v5  ;;  %v3680_v31 = vadd.f32 %v3653_v2, %v7713_v45 }
 0x69d   : > { %v3681_v32 = vadd.f32 %v3655_v16, %v7021_v63 }
 0x69e   : > { %v3388_v29 = vpop.xlane.xlu0 %3387  ;;  %v7237_v27 = vpop.xlane.xlu2 %3293 }
 0x69f   : > { %v3430_v12 = vsub.f32 %v3350_v39, %v3388_v29  ;;  %v3391_v58 = vpop.xlane.xlu1 %3390 }
 0x6a0   : > { %v3431_v14 = vsub.f32 %v3351_v18, %v3391_v58 }
 0x6a1   : > { %v3447_v15 = vsel %vm7708_vm1, %v3430_v12, 0.0  ;;  %vm7728_vm1 = vmmov %vm7651_vm0 }
 0x6a2   : > { %v3448_v46 = vadd.f32 %v3447_v15, %v3446_v19  ;;  %v3449_v50 = vsel %vm7709_vm13, %v3431_v14, 0.0  ;;  %v3352_v19 = vadd.f32 %v3325_v60, %v6971_v26  ;;  %v7716_v15 = vld [vmem:[#allocation49_spill] sm:$0xff]  ;;  %vm7729_vm13 = vmmov %vm7651_vm0 }
 0x6a4   : > { %v3450_v1 = vadd.f32 %v3449_v50, %v3448_v46 }
 0x6a6   : > { %v3622_v11 = vpop.xlane.xlu0 %3621  ;;  %v3719_v37 = vpop.xlane.xlu2 %3718 }
 0x6a7   : > { %v7243_v54 = vpop.xlane.xlu1 %3624  ;;  %v3759_v51 = vsub.f32 %v3679_v35, %v3719_v37  ;;  %4726 = vlog2.f32 %v3622_v11 }
 0x6a8   : > { %4728 = vlog2.f32 %v7237_v27 }
 0x6a9   : > { %v3777_v47 = vsel %vm7711_vm8, %v3759_v51, 0.0  ;;  %vm7730_vm8 = vmmov %vm7651_vm0 }
 0x6aa   : > { %v3778_v44 = vadd.f32 %v3777_v47, %v3776_v6  ;;  %v4717_v6 = vpop.eup %4716 }
 0x6ab   : > { %v4719_v4 = vpop.eup %4718  ;;  %v3327_v18 = vmul.f32 0.6931472, %v4717_v6 }
 0x6ac   : > { %v3329_v12 = vmul.f32 0.6931472, %v4719_v4  ;;  %v4721_v50 = vpop.eup %4720 }
 0x6ad   : > { %v3353_v46 = vadd.f32 %v3327_v18, %v7716_v15  ;;  %v3657_v51 = vmul.f32 0.6931472, %v4721_v50  ;;  %v4723_v49 = vpop.eup %4722 }
 0x6ae   : > { %v3297_v25 = vpop.xlane.xlu0 %3296  ;;  %v3394_v61 = vpop.xlane.xlu2 %3393  ;;  %v3331_v34 = vmul.f32 0.6931472, %v4723_v49 }
 0x6af   : > { %v7249_v41 = vpop.xlane.xlu1 %3299  ;;  %v3432_v0 = vsub.f32 %v3352_v19, %v3394_v61  ;;  %v3682_v61 = vadd.f32 %v3657_v51, %v7720_v48  ;;  %v4725_v6 = vpop.eup %4724  ;;  %4730 = vlog2.f32 %v3297_v25 }
 0x6b0   : > { %v4727_v4 = vpop.eup %4726  ;;  %4732 = vlog2.f32 %v7243_v54 }
 0x6b1   : > { %v3451_v42 = vsel %vm7712_vm12, %v3432_v0, 0.0  ;;  %v3661_v17 = vmul.f32 0.6931472, %v4727_v4  ;;  %4734 = vlog2.f32 %v7249_v41  ;;  %vm7731_vm12 = vmmov %vm7651_vm0 }
 0x6b2   : > { %v3452_v5 = vadd.f32 %v3451_v42, %v3450_v1  ;;  %v7717_v1 = vld [vmem:[#allocation45_spill] sm:$0xff] }
 0x6b3   : > { %v3354_v40 = vadd.f32 %v3329_v12, %v7717_v1  ;;  %v4729_v12 = vpop.eup %4728 }
 0x6b4   : > { %v3333_v27 = vmul.f32 0.6931472, %v4729_v12 }
 0x6b6   : > { %v3722_v26 = vpop.xlane.xlu0 %3721  ;;  %v7256_v39 = vpop.xlane.xlu2 %3627 }
 0x6b7   : > { %v3760_v29 = vsub.f32 %v3680_v31, %v3722_v26  ;;  %v3725_v56 = vpop.xlane.xlu1 %3724  ;;  %4736 = vlog2.f32 %v7256_v39 }
 0x6b8   : > { %v3761_v52 = vsub.f32 %v3681_v32, %v3725_v56 }
 0x6b9   : > { %v3779_v21 = vsel %vm7714_vm15, %v3760_v29, 0.0  ;;  %vm7732_vm15 = vmmov %vm7651_vm0 }
 0x6ba   : > { %v3780_v58 = vadd.f32 %v3779_v21, %v3778_v44  ;;  %v3781_v14 = vsel %vm7715_vm6, %v3761_v52, 0.0  ;;  %v3659_v52 = vmul.f32 0.6931472, %v4725_v6  ;;  %vm7733_vm6 = vmmov %vm7651_vm0 }
 0x6bc   : > { %v3782_v10 = vadd.f32 %v3781_v14, %v3780_v58  ;;  %v3683_v11 = vadd.f32 %v3659_v52, %v7030_v7  ;;  %v3356_v7 = vadd.f32 %v3333_v27, %v6977_v22 }
 0x6be   : > { %v3397_v63 = vpop.xlane.xlu0 %3396  ;;  %v7263_v35 = vpop.xlane.xlu2 %3302 }
 0x6bf   : > { %v3433_v20 = vsub.f32 %v3353_v46, %v3397_v63  ;;  %v3400_v37 = vpop.xlane.xlu1 %3399 }
 0x6c0   : > { %v3434_v57 = vsub.f32 %v3354_v40, %v3400_v37 }
 0x6c1   : > { %v3453_v60 = vsel %vm7718_vm10, %v3433_v20, 0.0  ;;  %vm7734_vm10 = vmmov %vm7651_vm0 }
 0x6c2   : > { %v3454_v47 = vadd.f32 %v3453_v60, %v3452_v5  ;;  %v3455_v44 = vsel %vm7719_vm3, %v3434_v57, 0.0  ;;  %v3355_v5 = vadd.f32 %v3331_v34, %v6975_v30  ;;  %v3684_v30 = vadd.f32 %v3661_v17, %v7048_v59  ;;  %vm7735_vm3 = vmmov %vm7651_vm0 }
 0x6c4   : > { %v3456_v19 = vadd.f32 %v3455_v44, %v3454_v47 }
 0x6c6   : > { %v7269_v0 = vpop.xlane.xlu0 %3630  ;;  %v3728_v2 = vpop.xlane.xlu2 %3727 }
 0x6c7   : > { %v7271_v42 = vpop.xlane.xlu1 %3633  ;;  %v3762_v16 = vsub.f32 %v3682_v61, %v3728_v2  ;;  %4738 = vlog2.f32 %v7269_v0 }
 0x6c8   : > { %4740 = vlog2.f32 %v7263_v35 }
 0x6c9   : > { %v3783_v45 = vsel %vm7721_vm7, %v3762_v16, 0.0  ;;  %vm7736_vm7 = vmmov %vm7651_vm0 }
 0x6ca   : > { %v3784_v31 = vadd.f32 %v3783_v45, %v3782_v10  ;;  %v4731_v10 = vpop.eup %4730 }
 0x6cb   : > { %v3335_v63 = vmul.f32 0.6931472, %v4731_v10  ;;  %v4733_v37 = vpop.eup %4732 }
 0x6cc   : > { %v3663_v44 = vmul.f32 0.6931472, %v4733_v37  ;;  %v4735_v22 = vpop.eup %4734 }
 0x6cd   : > { %v3357_v59 = vadd.f32 %v3335_v63, %v6905_v53 }
 0x6ce   : > { %v3306_v26 = vpop.xlane.xlu0 %3305  ;;  %v3403_v32 = vpop.xlane.xlu2 %3402  ;;  %v3685_v2 = vadd.f32 %v3663_v44, %v7052_v3 }
 0x6cf   : > { %v3309_v29 = vpop.xlane.xlu1 %3308  ;;  %v3435_v56 = vsub.f32 %v3355_v5, %v3403_v32  ;;  %4742 = vlog2.f32 %v3306_v26 }
 0x6d0   : > { %4744 = vlog2.f32 %v7271_v42 }
 0x6d1   : > { %v3457_v18 = vsel %vm7722_vm4, %v3435_v56, 0.0  ;;  %4746 = vlog2.f32 %v3309_v29  ;;  %vm7737_vm4 = vmmov %vm7651_vm0 }
 0x6d2   : > { %v3458_v21 = vadd.f32 %v3457_v18, %v3456_v19  ;;  %v4737_v18 = vpop.eup %4736 }
 0x6d3   : > { %v4739_v39 = vpop.eup %4738 }
 0x6d4   : > { %v4741_v12 = vpop.eup %4740  ;;  %v3667_v0 = vmul.f32 0.6931472, %v4739_v39 }
 0x6d5   : > { %v4743_v10 = vpop.eup %4742  ;;  %v3339_v26 = vmul.f32 0.6931472, %v4741_v12 }
 0x6d6   : > { %v3731_v58 = vpop.xlane.xlu0 %3730  ;;  %v3637_v14 = vpop.xlane.xlu2 %3636 }
 0x6d7   : > { %v3763_v15 = vsub.f32 %v3683_v11, %v3731_v58  ;;  %v3734_v46 = vpop.xlane.xlu1 %3733  ;;  %4748 = vlog2.f32 %v3637_v14 }
 0x6d8   : > { %v3764_v50 = vsub.f32 %v3684_v30, %v3734_v46  ;;  %v3341_v46 = vmul.f32 0.6931472, %v4743_v10 }
 0x6d9   : > { %v3785_v25 = vsel %vm7723_vm2, %v3763_v15, 0.0  ;;  %v4745_v15 = vpop.eup %4744  ;;  %vm7738_vm2 = vmmov %vm7651_vm0 }
 0x6da   : > { %v3786_v1 = vadd.f32 %v3785_v25, %v3784_v31  ;;  %v3787_v40 = vsel %vm7724_vm14, %v3764_v50, 0.0  ;;  %v3337_v31 = vmul.f32 0.6931472, %v4735_v22  ;;  %v4747_v50 = vpop.eup %4746  ;;  %v3669_v27 = vmul.f32 0.6931472, %v4745_v15 }
 0x6db   : > { %v3687_v25 = vadd.f32 %v3667_v0, %v7090_v8 }
 0x6dc   : > { %v3788_v20 = vadd.f32 %v3787_v40, %v3786_v1  ;;  %v3358_v6 = vadd.f32 %v3337_v31, %v6979_v13  ;;  %v3359_v40 = vadd.f32 %v3339_v26, %v6981_v36 }
 0x6dd   : > { %v4749_v42 = vpop.eup %4748 }
 0x6de   : > { %v3406_v57 = vpop.xlane.xlu0 %3405  ;;  %v3312_v51 = vpop.xlane.xlu2 %3311 }
 0x6df   : > { %v3436_v60 = vsub.f32 %v3356_v7, %v3406_v57  ;;  %v3409_v47 = vpop.xlane.xlu1 %3408  ;;  %v3360_v7 = vadd.f32 %v3341_v46, %v6917_v55  ;;  %v3343_v57 = vmul.f32 0.6931472, %v4747_v50 }
 0x6e0   : > { %v3437_v54 = vsub.f32 %v3357_v59, %v3409_v47  ;;  %v3671_v59 = vmul.f32 0.6931472, %v4749_v42 }
 0x6e1   : > { %v3459_v19 = vsel %vm7651_vm0, %v3436_v60, 0.0  ;;  %v3361_v36 = vadd.f32 %v3343_v57, %v6983_v9 }
 0x6e2   : > { %v3460_v48 = vadd.f32 %v3459_v19, %v3458_v21  ;;  %v3461_v61 = vsel %vm7725_vm5, %v3437_v54, 0.0  ;;  %v3665_v21 = vmul.f32 0.6931472, %v4737_v18  ;;  %v3688_v54 = vadd.f32 %v3669_v27, %v7094_v24 }
 0x6e3   : > { %v3689_v55 = vadd.f32 %v3671_v59, %v7116_v38  ;;  %v7740_v59 = vld [vmem:[#allocation13_spill] sm:$0xff] }
 0x6e4   : > { %v3462_v49 = vadd.f32 %v3461_v61, %v3460_v48  ;;  %v3686_v58 = vadd.f32 %v3665_v21, %v7074_v28  ;;  %vm3819_vm0 = vcmp.eq.s32.totalorder %v7740_v59, 2  ;;  %vm3817_vm5 = vcmp.eq.s32.totalorder %v7740_v59, 1 }
 0x6e6   : > { %v3640_v16 = vpop.xlane.xlu0 %3639  ;;  %v3737_v34 = vpop.xlane.xlu2 %3736 }
 0x6e7   : > { %v3643_v45 = vpop.xlane.xlu1 %3642  ;;  %v3765_v53 = vsub.f32 %v3685_v2, %v3737_v34  ;;  %4750 = vlog2.f32 %v3640_v16 }
 0x6e8   : > { %4752 = vlog2.f32 %v3643_v45 }
 0x6e9   : > { %v3789_v5 = vsel %vm7726_vm9, %v3765_v53, 0.0  ;;  %4754 = vlog2.f32 %v3312_v51  ;;  %vm3815_vm9 = vcmp.eq.s32.totalorder %v7740_v59, 0 }
 0x6ea   : > { %v3790_v41 = vadd.f32 %v3789_v5, %v3788_v20 }
 0x6ed   : > { %v4751_v14 = vpop.eup %4750 }
 0x6ee   : > { %v3315_v32 = vpop.xlane.xlu0 %3314  ;;  %v3412_v4 = vpop.xlane.xlu2 %3411  ;;  %v3673_v60 = vmul.f32 0.6931472, %v4751_v14 }
 0x6ef   : > { %v3415_v56 = vpop.xlane.xlu1 %3414  ;;  %v3438_v52 = vsub.f32 %v3358_v6, %v3412_v4  ;;  %v4753_v1 = vpop.eup %4752  ;;  %4756 = vlog2.f32 %v3315_v32 }
 0x6f0   : > { %v3439_v47 = vsub.f32 %v3359_v40, %v3415_v56  ;;  %v4755_v8 = vpop.eup %4754  ;;  %v3675_v19 = vmul.f32 0.6931472, %v4753_v1  ;;  %v3690_v34 = vadd.f32 %v3673_v60, %v7131_v43 }
 0x6f1   : > { %v3463_v3 = vsel %vm7727_vm11, %v3438_v52, 0.0  ;;  %v3345_v2 = vmul.f32 0.6931472, %v4755_v8 }
 0x6f2   : > { %v3464_v17 = vadd.f32 %v3463_v3, %v3462_v49  ;;  %v3465_v22 = vsel %vm7730_vm8, %v3439_v47, 0.0  ;;  %v3691_v31 = vadd.f32 %v3675_v19, %v7136_v33 }
 0x6f3   : > { %v3362_v18 = vadd.f32 %v3345_v2, %v6985_v62 }
 0x6f4   : > { %v3466_v24 = vadd.f32 %v3465_v22, %v3464_v17 }
 0x6f5   : > { %v4757_v45 = vpop.eup %4756 }
 0x6f6   : > { %v3740_v11 = vpop.xlane.xlu0 %3739  ;;  %v3743_v13 = vpop.xlane.xlu2 %3742  ;;  %v3347_v52 = vmul.f32 0.6931472, %v4757_v45 }
 0x6f7   : > { %v3746_v30 = vpop.xlane.xlu1 %3745  ;;  %v3766_v35 = vsub.f32 %v3686_v58, %v3740_v11  ;;  %v3767_v20 = vsub.f32 %v3687_v25, %v3743_v13 }
 0x6f8   : > { %v3768_v48 = vsub.f32 %v3688_v54, %v3746_v30  ;;  %v3363_v58 = vadd.f32 %v3347_v52, %v6938_v23  ;;  %v3825_v54 = vstv %s4298_s15 }
 0x6f9   : > { %v3791_v29 = vsel %vm7728_vm1, %v3766_v35, 0.0  ;;  %v3793_v61 = vsel %vm7729_vm13, %v3767_v20, 0.0 }
 0x6fa   : > { %v3792_v51 = vadd.f32 %v3791_v29, %v3790_v41  ;;  %v3795_v41 = vsel %vm7732_vm15, %v3768_v48, 0.0 }
 0x6fc   : > { %v3794_v49 = vadd.f32 %v3793_v61, %v3792_v51 }
 0x6fe   : > { %v3418_v63 = vpop.xlane.xlu0 %3417  ;;  %v3421_v28 = vpop.xlane.xlu2 %3420  ;;  %v3796_v56 = vadd.f32 %v3795_v41, %v3794_v49 }
 0x6ff   : > { %v3424_v37 = vpop.xlane.xlu1 %3423  ;;  %v3440_v44 = vsub.f32 %v3360_v7, %v3418_v63  ;;  %v3441_v6 = vsub.f32 %v3361_v36, %v3421_v28 }
 0x700   : > { %v3442_v17 = vsub.f32 %v3362_v18, %v3424_v37  ;;  %v7739_v37 = vlaneseq }
 0x701   : > { %v3467_v16 = vsel %vm7731_vm12, %v3440_v44, 0.0  ;;  %v3469_v39 = vsel %vm7734_vm10, %v3441_v6, 0.0 }
 0x702   : > { %v3468_v38 = vadd.f32 %v3467_v16, %v3466_v24  ;;  %v3471_v0 = vsel %vm7737_vm4, %v3442_v17, 0.0  ;;  %v3813_v57 = vshrl.u32 %v7739_v37, 7 }
 0x704   : > { %v3470_v11 = vadd.f32 %v3469_v39, %v3468_v38  ;;  %vm3814_vm14 = vcmp.eq.s32.totalorder %v3813_v57, 0 }
 0x705   : > { %vm3820_vm11 = vmand %vm3814_vm14, %vm3819_vm0 }
 0x706   : > { %v3749_v53 = vpop.xlane.xlu0 %3748  ;;  %v3752_v5 = vpop.xlane.xlu2 %3751  ;;  %v3472_v35 = vadd.f32 %v3471_v0, %v3470_v11  ;;  %vm3818_vm1 = vmand %vm3814_vm14, %vm3817_vm5 }
 0x707   : > { %v3769_v32 = vsub.f32 %v3689_v55, %v3749_v53  ;;  %v3755_v9 = vpop.xlane.xlu1 %3754  ;;  %v3770_v4 = vsub.f32 %v3690_v34, %v3752_v5  ;;  %vm3816_vm13 = vmand %vm3814_vm14, %vm3815_vm9 }
 0x708   : > { %v3771_v43 = vsub.f32 %v3691_v31, %v3755_v9 }
 0x709   : > { %v3797_v3 = vsel %vm7733_vm6, %v3769_v32, 0.0  ;;  %v3799_v33 = vsel %vm7735_vm3, %v3770_v4, 0.0 }
 0x70a   : > { %v3798_v21 = vadd.f32 %v3797_v3, %v3796_v56  ;;  %v3801_v12 = vsel %vm7736_vm7, %v3771_v43, 0.0 }
 0x70c   : > { %v3800_v13 = vadd.f32 %v3799_v33, %v3798_v21 }
 0x70e   : > { %v3427_v30 = vpop.xlane.xlu0 %3426  ;;  %v3802_v10 = vadd.f32 %v3801_v12, %v3800_v13 }
 0x70f   : > { %v3443_v62 = vsub.f32 %v3363_v58, %v3427_v30 }
 0x710   : > { %3803 = vadd.xlane.f32.xlu0 %v3802_v10 }
 0x711   : > { %v3473_v15 = vsel %vm7738_vm2, %v3443_v62, 0.0 }
 0x712   : > { %v3474_v26 = vadd.f32 %v3473_v15, %v3472_v35 }
 0x714   : > { %3475 = vadd.xlane.f32.xlu2 %v3474_v26 }
 0x783   : > { %v3804_v46 = vpop.xlane.xlu0 %3803 }
 0x784   : > { %v3805_v50 = vrot.slane %v3804_v46, 4 }
 0x786   : > { %v3806_v42 = vadd.f32 %v3805_v50, %v3804_v46 }
 0x787   : > { %v3476_v27 = vpop.xlane.xlu2 %3475 }
 0x788   : > { %v3807_v29 = vrot.slane %v3806_v42, 2  ;;  %v3477_v25 = vrot.slane %v3476_v27, 4 }
 0x78a   : > { %v3478_v14 = vadd.f32 %v3477_v25, %v3476_v27  ;;  %v3808_v63 = vadd.f32 %v3807_v29, %v3806_v42 }
 0x78c   : > { %v3479_v23 = vrot.slane %v3478_v14, 2  ;;  %v3809_v1 = vrot.slane %v3808_v63, 1 }
 0x78e   : > { %v3480_v28 = vadd.f32 %v3479_v23, %v3478_v14  ;;  %v3810_v7 = vadd.f32 %v3809_v1, %v3808_v63 }
 0x790   : > { %v3481_v40 = vrot.slane %v3480_v28, 1 }
 0x792   : > { %v3482_v20 = vadd.f32 %v3481_v40, %v3480_v28 }
 0x794   : > { %4299 = vpush %v3482_v20 }
 0x795   : > { %4301 = vpush %v3810_v7 }
 0x7c5   : > { %s4300_s14 = spop %4299 }
 0x7c6   : > { %v3823_v51 = vstv %s4300_s14  ;;  %s4302_s27 = spop %4301 }
 0x7c7   : > { %v3821_v60 = vstv %s4302_s27 }
 0x7c8   : > { %v3822_v47 = vsel %vm3820_vm11, %v3821_v60, 0.0 }
 0x7c9   : > { %v3824_v44 = vsel %vm3818_vm1, %v3823_v51, %v3822_v47 }
 0x7ca   : > { %v3826_v8 = vsel %vm3816_vm13, %v3825_v54, %v3824_v44 }
 0x7cb   : > { %3827 = vst [vmem:[%s4978_s19] sm:$0xff] %v3826_v8 }
 0x7cc PF: > { %s21_s21 = sadd.s32 1, %s4813_s21   ;;  %s7741_s29 = sld [smem:[#allocation12_spill]] }
 0x7cd   : > { %p18_p2 = scmp.ge.s32.totalorder %s21_s21, 6   ;;  %s7742_s17 = sld [smem:[#allocation8_spill]] }
 0x7ce   : > { %s7743_s18 = sld [smem:[#allocation9_spill]]  ;;  %s7746_s15 = smov %s4793_s16 }
 0x7cf   : > { %s7744_s19 = sld [smem:[#allocation10_spill]]  ;;  %20 = sbr.rel (!%p18_p2) target bundleno = 8 (0x8), region = 159 }
 0x7d0   : > { %s7745_s20 = sld [smem:[#allocation11_spill]] }
 0x7d2   : > { %s7747_s16 = smov %s7741_s29 }

</bundles_post_ra>
